<compile_context>
chip_gen: v5e
topology: v5e:2x2
jax: 0.10.0
libtpu: 0.0.40
codegen_flags: <defaults>
</compile_context>

<pallas_src>
import math
from functools import partial

import jax
import jax.numpy as jnp
from jax import lax
from jax.experimental import pallas as pl
from jax.experimental.pallas import tpu as pltpu


NEG_INF = -10000.0

# Parameter ordering shared by the kernel argument list and init.
PARAM_NAMES = [
    "sa_wqkv", "sa_bqkv", "sa_wo", "sa_bo",
    "ca_wq", "ca_bq", "ca_wkv", "ca_bkv", "ca_wo", "ca_bo",
    "ln1_g", "ln1_b", "ln2_g", "ln2_b", "ln3_g", "ln3_b",
    "ff_w1", "ff_b1", "ff_w2", "ff_b2",
]


# ---------------------------------------------------------------------------
# Pallas kernel: full decoder stack for one batch tile.
# Grid: (batch_tiles [parallel], layers [arbitrary]).
# ---------------------------------------------------------------------------
def _decoder_stack_kernel(num_heads, *refs):
    dq_ref, enc_ref, dmask_ref, emask_ref = refs[:4]
    w = dict(zip(PARAM_NAMES, refs[4:4 + len(PARAM_NAMES)]))
    o_ref = refs[4 + len(PARAM_NAMES)]
    x_scr = refs[5 + len(PARAM_NAMES)]

    f32, bf16 = jnp.float32, jnp.bfloat16
    Bt, Ld, H = dq_ref.shape
    Le = enc_ref.shape[1]
    M = Bt * Ld

    layer = pl.program_id(1)
    n_layers = pl.num_programs(1)

    # ---- carry init: load the decoder input once per batch tile -------------
    @pl.when(layer == 0)
    def _():
        x_scr[...] = dq_ref[...].reshape(M, H).astype(f32)

    # ---- additive attention biases built in-kernel (cheap VPU work) --------
    rows = lax.broadcasted_iota(jnp.int32, (Ld, Ld), 0)
    cols = lax.broadcasted_iota(jnp.int32, (Ld, Ld), 1)
    causal = (cols <= rows).astype(f32)[None]                  # (1, Ld, Ld)
    # value 0 where attention allowed, -10000 otherwise (matches NeMo).
    self_bias = (causal * dmask_ref[...] - 1.0) * 10000.0      # (Bt, Ld, Ld)
    cross_bias = (emask_ref[...] - 1.0) * 10000.0              # (Bt, 1,  Le)

    def mm(a, w_ref, b_ref):
        # Weight refs read at point of use; bf16 MXU operands, f32 accumulate.
        return (jnp.dot(a.astype(bf16), w_ref[...],
                        preferred_element_type=f32) + b_ref[...])

    def layer_norm(v, g_ref, b_ref, eps=1e-5):
        mu = jnp.mean(v, axis=-1, keepdims=True)
        vc = v - mu
        var = jnp.mean(vc * vc, axis=-1, keepdims=True)
        return vc * lax.rsqrt(var + eps) * g_ref[...] + b_ref[...]

    def attention(q3, k3, v3, bias):
        dh = H // num_heads
        inv_scale = 1.0 / math.sqrt(float(dh))
        if num_heads == 1:
            s = jnp.einsum("bqd,bkd->bqk", q3.astype(bf16), k3.astype(bf16),
                           preferred_element_type=f32) * inv_scale + bias
            s = s - jnp.max(s, axis=-1, keepdims=True)
            p = jnp.exp(s)
            p = p * pl.reciprocal(jnp.sum(p, axis=-1, keepdims=True),
                                  approx=False)
            return jnp.einsum("bqk,bkd->bqd", p.astype(bf16), v3.astype(bf16),
                              preferred_element_type=f32)
        # Head-batched contraction: one MXU stream, no per-head lane slices.
        Lq, Lk = q3.shape[1], k3.shape[1]
        qh = q3.reshape(Bt, Lq, num_heads, dh).astype(bf16)
        kh = k3.reshape(Bt, Lk, num_heads, dh).astype(bf16)
        vh = v3.reshape(Bt, Lk, num_heads, dh).astype(bf16)
        s = jnp.einsum("bqhd,bkhd->bhqk", qh, kh,
                       preferred_element_type=f32) * inv_scale + bias[:, None]
        s = s - jnp.max(s, axis=-1, keepdims=True)
        p = jnp.exp(s)
        p = p * pl.reciprocal(jnp.sum(p, axis=-1, keepdims=True), approx=False)
        ctx = jnp.einsum("bhqk,bkhd->bqhd", p.astype(bf16), vh,
                         preferred_element_type=f32)
        return ctx.reshape(Bt, Lq, H)

    x2 = x_scr[...]                                            # (M, H) f32

    # ---- self-attention -> residual -> LN1 ----------------------------------
    qkv = mm(x2, w["sa_wqkv"], w["sa_bqkv"])                   # (M, 3H)
    q3 = qkv[:, 0 * H:1 * H].reshape(Bt, Ld, H)
    k3 = qkv[:, 1 * H:2 * H].reshape(Bt, Ld, H)
    v3 = qkv[:, 2 * H:3 * H].reshape(Bt, Ld, H)
    ctx = attention(q3, k3, v3, self_bias).reshape(M, H)
    h1 = layer_norm(mm(ctx, w["sa_wo"], w["sa_bo"]) + x2,
                    w["ln1_g"], w["ln1_b"])

    # ---- cross-attention -> residual -> LN2 ---------------------------------
    q = mm(h1, w["ca_wq"], w["ca_bq"])                         # (M, H)
    kv = mm(enc_ref[...].reshape(Bt * Le, H), w["ca_wkv"], w["ca_bkv"])
    q3 = q.reshape(Bt, Ld, H)
    k3 = kv[:, 0 * H:1 * H].reshape(Bt, Le, H)
    v3 = kv[:, 1 * H:2 * H].reshape(Bt, Le, H)
    ctx = attention(q3, k3, v3, cross_bias).reshape(M, H)
    h2 = layer_norm(mm(ctx, w["ca_wo"], w["ca_bo"]) + h1,
                    w["ln2_g"], w["ln2_b"])

    # ---- position-wise FFN (relu) -> residual -> LN3 -------------------------
    # TODO(synk): for NeMo-scale H/inner on v7x (64 MiB VMEM), chunk this over
    # the inner dimension with an (M, H) accumulator instead of materializing
    # the full (M, inner) intermediate plus both FFN weights at once.
    ff = jnp.maximum(mm(h2, w["ff_w1"], w["ff_b1"]), 0.0)
    out = layer_norm(mm(ff, w["ff_w2"], w["ff_b2"]) + h2,
                     w["ln3_g"], w["ln3_b"])

    x_scr[...] = out                                            # carry to l+1

    @pl.when(layer == n_layers - 1)
    def _():
        o_ref[...] = out.reshape(Bt, Ld, H).astype(o_ref.dtype)


# ---------------------------------------------------------------------------
# Tiling / VMEM budgeting helpers.
# ---------------------------------------------------------------------------
def _tensorcores_per_device():
    """Conservative per-device TensorCore count for grid partitioning."""
    try:
        kind = jax.devices()[0].device_kind.lower()
    except Exception:
        return 1
    if "v7" in kind or "7x" in kind:
        return 2       # v7x: 2 TensorCores per chip
    if "v4" in kind or "v5p" in kind:
        return 2       # megacore devices
    return 1           # v5e / v6e: single TensorCore


def _estimate_vmem_bytes(block_b, Ld, Le, H, inner, weight_bytes_per_layer):
    """Rough per-grid-step VMEM footprint: pipelined operands + intermediates
    + double-buffered per-layer weights. Used to size block_b / vmem limit."""
    f32, bf16, lane = 4, 2, 128
    m = block_b * Ld
    act = (
        2 * block_b * Ld * H * f32              # decoder tile (double buffered)
        + 2 * block_b * Le * H * bf16           # encoder tile (bf16)
        + 2 * block_b * (Ld + Le) * lane * f32  # key masks (lane padded)
        + 2 * block_b * Ld * H * f32            # output tile
        + m * H * f32                           # carried activation scratch
        + m * 3 * H * f32                       # fused QKV
        + block_b * Le * 2 * H * f32            # fused cross-attn KV
        + m * inner * f32                       # FFN intermediate
        + 2 * block_b * Ld * max(Ld, Le) * f32  # attention scores / probs
    )
    return int(act * 1.5) + 2 * weight_bytes_per_layer


def _choose_block_b(B, Ld, Le, H, inner, weight_bytes_per_layer, n_cores):
    """Batch elements per grid step + matching vmem_limit_bytes.

    Single-TC chips (v5e/v6e): one big step (best MXU row fill, no per-step
    overhead).  2-TC chips (v7x): keep >= n_cores parallel steps only when
    every step still gets >= 256 flattened matmul rows."""
    def est(bb):
        return _estimate_vmem_bytes(bb, Ld, Le, H, inner, weight_bytes_per_layer)

    divisors = [d for d in range(1, B + 1) if B % d == 0]
    fitting = [d for d in divisors if est(d) <= 44 * 2**20] or [1]
    block_b = max(fitting)
    if n_cores > 1:
        split = [d for d in fitting if B // d >= n_cores and d * Ld >= 256]
        if split:
            block_b = max(split)
    vmem_limit = int(min(64 * 2**20, max(32 * 2**20, est(block_b) + (4 << 20))))
    return block_b, vmem_limit


# ---------------------------------------------------------------------------
# pallas_call wrapper for the fused layer stack.
# ---------------------------------------------------------------------------
def _decoder_stack_call(x, enc_bf16, dmask_f, emask_f, params, num_heads,
                        block_b, vmem_limit):
    B, Ld, H = x.shape
    Le = enc_bf16.shape[1]
    num_layers = params[PARAM_NAMES[0]].shape[0]
    weights = [params[n] for n in PARAM_NAMES]

    act_map = lambda b, l: (b, 0, 0)   # activations: constant across layers
    in_specs = [
        pl.BlockSpec((block_b, Ld, H), act_map),
        pl.BlockSpec((block_b, Le, H), act_map),
        pl.BlockSpec((block_b, 1, Ld), act_map),
        pl.BlockSpec((block_b, 1, Le), act_map),
    ] + [
        # Per-layer weight slab: block index follows the (arbitrary) layer
        # axis, so layer l+1 weights prefetch behind layer l compute.
        pl.BlockSpec((None,) + w.shape[1:],
                     lambda b, l, nd=w.ndim - 1: (l,) + (0,) * nd)
        for w in weights
    ]

    return pl.pallas_call(
        partial(_decoder_stack_kernel, num_heads),
        out_shape=jax.ShapeDtypeStruct((B, Ld, H), x.dtype),
        grid_spec=pltpu.PrefetchScalarGridSpec(
            num_scalar_prefetch=0,
            grid=(B // block_b, num_layers),
            in_specs=in_specs,
            out_specs=pl.BlockSpec((block_b, Ld, H), act_map),
            scratch_shapes=[pltpu.VMEM((block_b * Ld, H), jnp.float32)],
        ),
        compiler_params=pltpu.CompilerParams(
            dimension_semantics=("parallel", "arbitrary"),
            vmem_limit_bytes=vmem_limit),
    )(x, enc_bf16, dmask_f, emask_f, *weights)


# ---------------------------------------------------------------------------
# TransformerDecoder.forward (decoder_mems_list=None, return_mems=False,
# pre_ln=False -> no final LayerNorm).
# ---------------------------------------------------------------------------
@partial(jax.jit, static_argnames=("num_heads",))
def transformer_decoder_forward(decoder_states, decoder_mask,
                                encoder_states, encoder_mask,
                                params, num_heads=1):
    B, Ld, H = decoder_states.shape
    _, Le, _ = encoder_states.shape
    num_layers = params[PARAM_NAMES[0]].shape[0]
    inner = params["ff_w1"].shape[-1]

    # Pad sequence dims to sublane multiples; padded keys are masked out and
    # padded query rows are sliced off at the end.  (H assumed lane-aligned.)
    Ld_p = -(-Ld // 8) * 8
    Le_p = -(-Le // 8) * 8
    x, enc = decoder_states, encoder_states
    dmask, emask = decoder_mask, encoder_mask
    if Ld_p != Ld:
        x = jnp.pad(x, ((0, 0), (0, Ld_p - Ld), (0, 0)))
        dmask = jnp.pad(dmask, ((0, 0), (0, Ld_p - Ld)))
    if Le_p != Le:
        enc = jnp.pad(enc, ((0, 0), (0, Le_p - Le), (0, 0)))
        emask = jnp.pad(emask, ((0, 0), (0, Le_p - Le)))

    # Encoder states are only ever consumed as a bf16 MXU operand.
    enc = enc.astype(jnp.bfloat16)
    dmask_f = dmask.astype(jnp.float32)[:, None, :]   # (B, 1, Ld) 0/1
    emask_f = emask.astype(jnp.float32)[:, None, :]   # (B, 1, Le) 0/1

    weight_bytes_per_layer = sum(
        (math.prod(params[n].shape) // num_layers)
        * jnp.dtype(params[n].dtype).itemsize for n in PARAM_NAMES)
    block_b, vmem_limit = _choose_block_b(
        B, Ld_p, Le_p, H, inner, weight_bytes_per_layer,
        _tensorcores_per_device())

    out = _decoder_stack_call(x, enc, dmask_f, emask_f, params,
                              num_heads, block_b, vmem_limit)
    return out[:, :Ld] if Ld_p != Ld else out


# ---------------------------------------------------------------------------
# Pure-JAX reference (correctness check; same bf16 matmul operand dtypes).
# ---------------------------------------------------------------------------
def form_attention_mask(input_mask, diagonal=None):
    if input_mask is None:
        return None
    m = input_mask.astype(bool)[:, None, :]
    if diagonal is not None:
        L = input_mask.shape[1]
        tri = jnp.tril(jnp.ones((L, L), dtype=bool), diagonal)
        m = m & tri[None]
    return (1.0 - m.astype(jnp.float32)) * NEG_INF


def _ref_block(x, enc, dmask_add, emask_add, p, num_heads):
    f32, bf16 = jnp.float32, jnp.bfloat16

    def mm(a, w, b):
        return jnp.dot(a.astype(bf16), w, preferred_element_type=f32) + b

    def ln(v, g, b):
        mu = v.mean(-1, keepdims=True)
        vc = v - mu
        var = (vc * vc).mean(-1, keepdims=True)
        return vc / jnp.sqrt(var + 1e-5) * g + b

    B, Ld, H = x.shape
    dh = H // num_heads

    def attn(q, k, v, mask_add):
        Lq, Lk = q.shape[1], k.shape[1]
        qh = q.reshape(B, Lq, num_heads, dh).transpose(0, 2, 1, 3).astype(bf16)
        kh = k.reshape(B, Lk, num_heads, dh).transpose(0, 2, 1, 3).astype(bf16)
        vh = v.reshape(B, Lk, num_heads, dh).transpose(0, 2, 1, 3).astype(bf16)
        s = jnp.einsum("bhqd,bhkd->bhqk", qh, kh,
                       preferred_element_type=f32) / math.sqrt(dh)
        s = s + mask_add[:, None]
        pr = jax.nn.softmax(s, axis=-1)
        ctx = jnp.einsum("bhqk,bhkd->bhqd", pr.astype(bf16), vh,
                         preferred_element_type=f32)
        return ctx.transpose(0, 2, 1, 3).reshape(B, Lq, H)

    qkv = mm(x, p["sa_wqkv"], p["sa_bqkv"])
    q, k, v = qkv[..., :H], qkv[..., H:2 * H], qkv[..., 2 * H:]
    sa = mm(attn(q, k, v, dmask_add), p["sa_wo"], p["sa_bo"])
    h1 = ln(sa + x, p["ln1_g"], p["ln1_b"])

    q = mm(h1, p["ca_wq"], p["ca_bq"])
    kv = mm(enc, p["ca_wkv"], p["ca_bkv"])
    k, v = kv[..., :H], kv[..., H:]
    ca = mm(attn(q, k, v, emask_add), p["ca_wo"], p["ca_bo"])
    h2 = ln(ca + h1, p["ln2_g"], p["ln2_b"])

    ff = jnp.maximum(mm(h2, p["ff_w1"], p["ff_b1"]), 0.0)
    ff = mm(ff, p["ff_w2"], p["ff_b2"])
    return ln(ff + h2, p["ln3_g"], p["ln3_b"])


def _ref_decoder(dec, dmask, enc, emask, stacked, num_heads):
    dmask_add = form_attention_mask(dmask, diagonal=0)
    emask_add = form_attention_mask(emask)
    x = dec
    num_layers = stacked[PARAM_NAMES[0]].shape[0]
    for i in range(num_layers):
        p = {n: stacked[n][i] for n in PARAM_NAMES}
        x = _ref_block(x, enc, dmask_add, emask_add, p, num_heads)
    return x


# ---------------------------------------------------------------------------
# Deterministic parameter init (fused QKV/KV layout; matmul weights in bf16;
# per-layer weights stacked along a leading num_layers axis).
# ---------------------------------------------------------------------------
def init_layer_params(key, hidden, inner):
    ks = jax.random.split(key, 17)
    f32, bf16 = jnp.float32, jnp.bfloat16

    def lin(k, din, dout):
        return 0.05 * jax.random.normal(k, (din, dout), f32)

    def bias(k, dout):
        return 0.02 * jax.random.normal(k, (1, dout), f32)

    p = {}
    p["sa_wqkv"] = jnp.concatenate(
        [lin(ks[0], hidden, hidden), lin(ks[1], hidden, hidden),
         lin(ks[2], hidden, hidden)], axis=1).astype(bf16)
    p["sa_bqkv"] = bias(ks[3], 3 * hidden)
    p["sa_wo"] = lin(ks[4], hidden, hidden).astype(bf16)
    p["sa_bo"] = bias(ks[5], hidden)

    p["ca_wq"] = lin(ks[6], hidden, hidden).astype(bf16)
    p["ca_bq"] = bias(ks[7], hidden)
    p["ca_wkv"] = jnp.concatenate(
        [lin(ks[8], hidden, hidden), lin(ks[9], hidden, hidden)],
        axis=1).astype(bf16)
    p["ca_bkv"] = bias(ks[10], 2 * hidden)
    p["ca_wo"] = lin(ks[11], hidden, hidden).astype(bf16)
    p["ca_bo"] = bias(ks[12], hidden)

    for n in ("ln1", "ln2", "ln3"):
        p[n + "_g"] = jnp.ones((1, hidden), f32)
        p[n + "_b"] = jnp.zeros((1, hidden), f32)

    p["ff_w1"] = lin(ks[13], hidden, inner).astype(bf16)
    p["ff_b1"] = bias(ks[14], inner)
    p["ff_w2"] = lin(ks[15], inner, hidden).astype(bf16)
    p["ff_b2"] = bias(ks[16], hidden)
    return p


def init_stacked_params(key, num_layers, hidden, inner):
    # NOTE: the PyTorch module deepcopies one initialized layer; we initialize
    # each layer independently, which is the general (post-training) case and
    # exercises the per-layer weight indexing.
    layer_keys = jax.random.split(key, num_layers)
    layers = [init_layer_params(k, hidden, inner) for k in layer_keys]
    return {n: jnp.stack([l[n] for l in layers], axis=0) for n in PARAM_NAMES}


if __name__ == "__main__":
    # Small but lane-dense shapes: H multiple of 128, seq multiples of 8.
    B, L_DEC, L_ENC, HIDDEN, INNER = 4, 16, 16, 128, 512
    NUM_LAYERS = 2
    NUM_HEADS = 1  # module default (num_attention_heads=1)

    key = jax.random.PRNGKey(0)
    k_dec, k_enc, k_par = jax.random.split(key, 3)

    decoder_states = jax.random.normal(k_dec, (B, L_DEC, HIDDEN), jnp.float32)
    encoder_states = jax.random.normal(k_enc, (B, L_ENC, HIDDEN), jnp.float32)
    decoder_mask = jnp.ones((B, L_DEC), jnp.int32)
    encoder_mask = jnp.ones((B, L_ENC), jnp.int32).at[1, -4:].set(0)  # padding

    params = init_stacked_params(k_par, NUM_LAYERS, HIDDEN, INNER)

    out = transformer_decoder_forward(decoder_states, decoder_mask,
                                      encoder_states, encoder_mask,
                                      params, num_heads=NUM_HEADS)
    out = jax.block_until_ready(out)

    ref = _ref_decoder(decoder_states, decoder_mask, encoder_states,
                       encoder_mask, params, NUM_HEADS)
    assert out.shape == (B, L_DEC, HIDDEN)
    max_err = float(jnp.max(jnp.abs(out - ref)))
    assert jnp.allclose(out, ref, atol=2e-2, rtol=2e-2), max_err

    print("KERNEL_OK")
</pallas_src>

<mosaic_0001>
module attributes {stable_mosaic.version = 11 : i64} {
  func.func @_decoder_stack_kernel(%arg0: i32, %arg1: i32, %arg2: memref<4x16x128xf32, #tpu.memory_space<vmem>>, %arg3: memref<4x16x128xbf16, #tpu.memory_space<vmem>>, %arg4: memref<4x1x16xf32, #tpu.memory_space<vmem>>, %arg5: memref<4x1x16xf32, #tpu.memory_space<vmem>>, %arg6: memref<1x128x384xbf16, #tpu.memory_space<vmem>>, %arg7: memref<1x1x384xf32, #tpu.memory_space<vmem>>, %arg8: memref<1x128x128xbf16, #tpu.memory_space<vmem>>, %arg9: memref<1x1x128xf32, #tpu.memory_space<vmem>>, %arg10: memref<1x128x128xbf16, #tpu.memory_space<vmem>>, %arg11: memref<1x1x128xf32, #tpu.memory_space<vmem>>, %arg12: memref<1x128x256xbf16, #tpu.memory_space<vmem>>, %arg13: memref<1x1x256xf32, #tpu.memory_space<vmem>>, %arg14: memref<1x128x128xbf16, #tpu.memory_space<vmem>>, %arg15: memref<1x1x128xf32, #tpu.memory_space<vmem>>, %arg16: memref<1x1x128xf32, #tpu.memory_space<vmem>>, %arg17: memref<1x1x128xf32, #tpu.memory_space<vmem>>, %arg18: memref<1x1x128xf32, #tpu.memory_space<vmem>>, %arg19: memref<1x1x128xf32, #tpu.memory_space<vmem>>, %arg20: memref<1x1x128xf32, #tpu.memory_space<vmem>>, %arg21: memref<1x1x128xf32, #tpu.memory_space<vmem>>, %arg22: memref<1x128x512xbf16, #tpu.memory_space<vmem>>, %arg23: memref<1x1x512xf32, #tpu.memory_space<vmem>>, %arg24: memref<1x512x128xbf16, #tpu.memory_space<vmem>>, %arg25: memref<1x1x128xf32, #tpu.memory_space<vmem>>, %arg26: memref<4x16x128xf32, #tpu.memory_space<vmem>>, %arg27: memref<64x128xf32, #tpu.memory_space<vmem>>) attributes {dimension_semantics = [#tpu.dimension_semantics<parallel>, #tpu.dimension_semantics<arbitrary>], iteration_bounds = array<i64: 1, 2>, scalar_prefetch = 0 : i64, scratch_operands = 1 : i64, tpu.core_type = #tpu.core_type<tc>, window_params = [{transform_indices = @transform_0, window_bounds = array<i64: 4, 16, 128>}, {transform_indices = @transform_1, window_bounds = array<i64: 4, 16, 128>}, {transform_indices = @transform_2, window_bounds = array<i64: 4, 1, 16>}, {transform_indices = @transform_3, window_bounds = array<i64: 4, 1, 16>}, {transform_indices = @transform_4, window_bounds = array<i64: 1, 128, 384>}, {transform_indices = @transform_5, window_bounds = array<i64: 1, 1, 384>}, {transform_indices = @transform_6, window_bounds = array<i64: 1, 128, 128>}, {transform_indices = @transform_7, window_bounds = array<i64: 1, 1, 128>}, {transform_indices = @transform_8, window_bounds = array<i64: 1, 128, 128>}, {transform_indices = @transform_9, window_bounds = array<i64: 1, 1, 128>}, {transform_indices = @transform_10, window_bounds = array<i64: 1, 128, 256>}, {transform_indices = @transform_11, window_bounds = array<i64: 1, 1, 256>}, {transform_indices = @transform_12, window_bounds = array<i64: 1, 128, 128>}, {transform_indices = @transform_13, window_bounds = array<i64: 1, 1, 128>}, {transform_indices = @transform_14, window_bounds = array<i64: 1, 1, 128>}, {transform_indices = @transform_15, window_bounds = array<i64: 1, 1, 128>}, {transform_indices = @transform_16, window_bounds = array<i64: 1, 1, 128>}, {transform_indices = @transform_17, window_bounds = array<i64: 1, 1, 128>}, {transform_indices = @transform_18, window_bounds = array<i64: 1, 1, 128>}, {transform_indices = @transform_19, window_bounds = array<i64: 1, 1, 128>}, {transform_indices = @transform_20, window_bounds = array<i64: 1, 128, 512>}, {transform_indices = @transform_21, window_bounds = array<i64: 1, 1, 512>}, {transform_indices = @transform_22, window_bounds = array<i64: 1, 512, 128>}, {transform_indices = @transform_23, window_bounds = array<i64: 1, 1, 128>}, {transform_indices = @transform_24, window_bounds = array<i64: 4, 16, 128>}]} {
    %c0_i32 = arith.constant 0 : i32
    %0 = arith.cmpi eq, %arg1, %c0_i32 : i32
    %1 = arith.extui %0 : i1 to i32
    %c0_i32_0 = arith.constant 0 : i32
    %2 = arith.cmpi ne, %1, %c0_i32_0 : i32
    scf.if %2 {
      %c0_110 = arith.constant 0 : index
      %c0_111 = arith.constant 0 : index
      %c0_112 = arith.constant 0 : index
      %213 = vector.load %arg2[%c0_110, %c0_111, %c0_112] : memref<4x16x128xf32, #tpu.memory_space<vmem>>, vector<4x16x128xf32>
      %214 = vector.shape_cast %213 : vector<4x16x128xf32> to vector<64x128xf32>
      %c0_113 = arith.constant 0 : index
      %c0_114 = arith.constant 0 : index
      %215 = vector.load %arg27[%c0_113, %c0_114] : memref<64x128xf32, #tpu.memory_space<vmem>>, vector<64x128xf32>
      tpu.vector_store %arg27[%c0_113, %c0_114], %214 {strides = array<i32>} : memref<64x128xf32, #tpu.memory_space<vmem>>, vector<64x128xf32>,
    } else {
    }
    %3 = tpu.iota {dimensions = array<i32: 0>} : vector<16x16xi32>
    %4 = tpu.iota {dimensions = array<i32: 1>} : vector<16x16xi32>
    %5 = arith.cmpi sle, %4, %3 : vector<16x16xi32>
    %6 = arith.extui %5 : vector<16x16xi1> to vector<16x16xi32>
    %7 = arith.sitofp %6 : vector<16x16xi32> to vector<16x16xf32>
    %8 = vector.shape_cast %7 : vector<16x16xf32> to vector<1x16x16xf32>
    %c0 = arith.constant 0 : index
    %c0_1 = arith.constant 0 : index
    %c0_2 = arith.constant 0 : index
    %9 = vector.load %arg4[%c0, %c0_1, %c0_2] : memref<4x1x16xf32, #tpu.memory_space<vmem>>, vector<4x1x16xf32>
    %10 = vector.broadcast %8 : vector<1x16x16xf32> to vector<4x16x16xf32>
    %11 = vector.broadcast %9 : vector<4x1x16xf32> to vector<4x16x16xf32>
    %12 = arith.mulf %10, %11 : vector<4x16x16xf32>
    %cst = arith.constant 1.000000e+00 : f32
    %13 = vector.broadcast %cst : f32 to vector<4x16x16xf32>
    %14 = arith.subf %12, %13 : vector<4x16x16xf32>
    %cst_3 = arith.constant 1.000000e+04 : f32
    %15 = vector.broadcast %cst_3 : f32 to vector<4x16x16xf32>
    %16 = arith.mulf %14, %15 : vector<4x16x16xf32>
    %c0_4 = arith.constant 0 : index
    %c0_5 = arith.constant 0 : index
    %c0_6 = arith.constant 0 : index
    %17 = vector.load %arg5[%c0_4, %c0_5, %c0_6] : memref<4x1x16xf32, #tpu.memory_space<vmem>>, vector<4x1x16xf32>
    %cst_7 = arith.constant 1.000000e+00 : f32
    %18 = vector.broadcast %cst_7 : f32 to vector<4x1x16xf32>
    %19 = arith.subf %17, %18 : vector<4x1x16xf32>
    %cst_8 = arith.constant 1.000000e+04 : f32
    %20 = vector.broadcast %cst_8 : f32 to vector<4x1x16xf32>
    %21 = arith.mulf %19, %20 : vector<4x1x16xf32>
    %c0_9 = arith.constant 0 : index
    %c0_10 = arith.constant 0 : index
    %22 = vector.load %arg27[%c0_9, %c0_10] : memref<64x128xf32, #tpu.memory_space<vmem>>, vector<64x128xf32>
    %23 = arith.truncf %22 : vector<64x128xf32> to vector<64x128xbf16>
    %c0_11 = arith.constant 0 : index
    %c0_12 = arith.constant 0 : index
    %c0_13 = arith.constant 0 : index
    %24 = vector.load %arg6[%c0_11, %c0_12, %c0_13] : memref<1x128x384xbf16, #tpu.memory_space<vmem>>, vector<1x128x384xbf16>
    %25 = vector.shape_cast %24 : vector<1x128x384xbf16> to vector<128x384xbf16>
    %cst_14 = arith.constant dense<0.000000e+00> : vector<64x384xf32>
    %26 = tpu.matmul %23, %25, %cst_14 {dimension_numbers = #tpu.dot_dimension_numbers<[1], [0], [0], [1], [0, 0, 1, 1], [], []>} : vector<64x128xbf16>, vector<128x384xbf16>, vector<64x384xf32> -> vector<64x384xf32>
    %c0_15 = arith.constant 0 : index
    %c0_16 = arith.constant 0 : index
    %c0_17 = arith.constant 0 : index
    %27 = vector.load %arg7[%c0_15, %c0_16, %c0_17] : memref<1x1x384xf32, #tpu.memory_space<vmem>>, vector<1x1x384xf32>
    %28 = vector.shape_cast %27 : vector<1x1x384xf32> to vector<1x384xf32>
    %29 = vector.broadcast %28 : vector<1x384xf32> to vector<64x384xf32>
    %30 = arith.addf %26, %29 : vector<64x384xf32>
    %31 = vector.extract_strided_slice %30 {offsets = [0, 0], sizes = [64, 128], strides = [1, 1]} : vector<64x384xf32> to vector<64x128xf32>
    %32 = vector.shape_cast %31 : vector<64x128xf32> to vector<4x16x128xf32>
    %33 = vector.extract_strided_slice %30 {offsets = [0, 128], sizes = [64, 128], strides = [1, 1]} : vector<64x384xf32> to vector<64x128xf32>
    %34 = vector.shape_cast %33 : vector<64x128xf32> to vector<4x16x128xf32>
    %35 = vector.extract_strided_slice %30 {offsets = [0, 256], sizes = [64, 128], strides = [1, 1]} : vector<64x384xf32> to vector<64x128xf32>
    %36 = vector.shape_cast %35 : vector<64x128xf32> to vector<4x16x128xf32>
    %37 = arith.truncf %32 : vector<4x16x128xf32> to vector<4x16x128xbf16>
    %38 = arith.truncf %34 : vector<4x16x128xf32> to vector<4x16x128xbf16>
    "tpu.trace_start"() <{level = 10 : i32, message = "bqd,bkd->bqk"}> : () -> ()
    %cst_18 = arith.constant dense<0.000000e+00> : vector<4x16x16xf32>
    %39 = tpu.matmul %37, %38, %cst_18 {dimension_numbers = #tpu.dot_dimension_numbers<[2], [2], [1], [1], [0, 0, 0, 1, 1, 1], [0], [0]>} : vector<4x16x128xbf16>, vector<4x16x128xbf16>, vector<4x16x16xf32> -> vector<4x16x16xf32>
    "tpu.trace_stop"() : () -> ()
    %cst_19 = arith.constant 0.0883883461 : f32
    %40 = vector.broadcast %cst_19 : f32 to vector<4x16x16xf32>
    %41 = arith.mulf %39, %40 : vector<4x16x16xf32>
    %42 = arith.addf %41, %16 : vector<4x16x16xf32>
    %cst_20 = arith.constant dense<0xFF800000> : vector<4x16xf32>
    %43 = vector.multi_reduction <maximumf>, %42, %cst_20 [2] : vector<4x16x16xf32> to vector<4x16xf32>
    %44 = vector.shape_cast %43 : vector<4x16xf32> to vector<4x16x1xf32>
    %45 = vector.broadcast %44 : vector<4x16x1xf32> to vector<4x16x16xf32>
    %46 = arith.subf %42, %45 : vector<4x16x16xf32>
    %47 = math.exp %46 : vector<4x16x16xf32>
    %cst_21 = arith.constant dense<0.000000e+00> : vector<4x16xf32>
    %48 = vector.multi_reduction <add>, %47, %cst_21 [2] : vector<4x16x16xf32> to vector<4x16xf32>
    %49 = vector.shape_cast %48 : vector<4x16xf32> to vector<4x16x1xf32>
    %50 = tpu.reciprocal %49 : vector<4x16x1xf32> -> vector<4x16x1xf32>
    %51 = vector.broadcast %50 : vector<4x16x1xf32> to vector<4x16x16xf32>
    %52 = arith.mulf %47, %51 : vector<4x16x16xf32>
    %53 = arith.truncf %52 : vector<4x16x16xf32> to vector<4x16x16xbf16>
    %54 = arith.truncf %36 : vector<4x16x128xf32> to vector<4x16x128xbf16>
    "tpu.trace_start"() <{level = 10 : i32, message = "bqk,bkd->bqd"}> : () -> ()
    %cst_22 = arith.constant dense<0.000000e+00> : vector<4x16x128xf32>
    %55 = tpu.matmul %53, %54, %cst_22 {dimension_numbers = #tpu.dot_dimension_numbers<[2], [1], [1], [2], [0, 0, 0, 1, 1, 2], [0], [0]>} : vector<4x16x16xbf16>, vector<4x16x128xbf16>, vector<4x16x128xf32> -> vector<4x16x128xf32>
    "tpu.trace_stop"() : () -> ()
    %56 = vector.shape_cast %55 : vector<4x16x128xf32> to vector<64x128xf32>
    %57 = arith.truncf %56 : vector<64x128xf32> to vector<64x128xbf16>
    %c0_23 = arith.constant 0 : index
    %c0_24 = arith.constant 0 : index
    %c0_25 = arith.constant 0 : index
    %58 = vector.load %arg8[%c0_23, %c0_24, %c0_25] : memref<1x128x128xbf16, #tpu.memory_space<vmem>>, vector<1x128x128xbf16>
    %59 = vector.shape_cast %58 : vector<1x128x128xbf16> to vector<128x128xbf16>
    %cst_26 = arith.constant dense<0.000000e+00> : vector<64x128xf32>
    %60 = tpu.matmul %57, %59, %cst_26 {dimension_numbers = #tpu.dot_dimension_numbers<[1], [0], [0], [1], [0, 0, 1, 1], [], []>} : vector<64x128xbf16>, vector<128x128xbf16>, vector<64x128xf32> -> vector<64x128xf32>
    %c0_27 = arith.constant 0 : index
    %c0_28 = arith.constant 0 : index
    %c0_29 = arith.constant 0 : index
    %61 = vector.load %arg9[%c0_27, %c0_28, %c0_29] : memref<1x1x128xf32, #tpu.memory_space<vmem>>, vector<1x1x128xf32>
    %62 = vector.shape_cast %61 : vector<1x1x128xf32> to vector<1x128xf32>
    %63 = vector.broadcast %62 : vector<1x128xf32> to vector<64x128xf32>
    %64 = arith.addf %60, %63 : vector<64x128xf32>
    %65 = arith.addf %64, %22 : vector<64x128xf32>
    %cst_30 = arith.constant dense<0.000000e+00> : vector<64xf32>
    %66 = vector.multi_reduction <add>, %65, %cst_30 [1] : vector<64x128xf32> to vector<64xf32>
    %67 = vector.shape_cast %66 : vector<64xf32> to vector<64x1xf32>
    %cst_31 = arith.constant 1.280000e+02 : f32
    %68 = vector.broadcast %cst_31 : f32 to vector<64x1xf32>
    %69 = arith.divf %67, %68 : vector<64x1xf32>
    %70 = vector.broadcast %69 : vector<64x1xf32> to vector<64x128xf32>
    %71 = arith.subf %65, %70 : vector<64x128xf32>
    %72 = arith.mulf %71, %71 : vector<64x128xf32>
    %cst_32 = arith.constant dense<0.000000e+00> : vector<64xf32>
    %73 = vector.multi_reduction <add>, %72, %cst_32 [1] : vector<64x128xf32> to vector<64xf32>
    %74 = vector.shape_cast %73 : vector<64xf32> to vector<64x1xf32>
    %cst_33 = arith.constant 1.280000e+02 : f32
    %75 = vector.broadcast %cst_33 : f32 to vector<64x1xf32>
    %76 = arith.divf %74, %75 : vector<64x1xf32>
    %cst_34 = arith.constant 9.99999974E-6 : f32
    %77 = vector.broadcast %cst_34 : f32 to vector<64x1xf32>
    %78 = arith.addf %76, %77 : vector<64x1xf32>
    %79 = math.rsqrt %78 : vector<64x1xf32>
    %80 = vector.broadcast %79 : vector<64x1xf32> to vector<64x128xf32>
    %81 = arith.mulf %71, %80 : vector<64x128xf32>
    %c0_35 = arith.constant 0 : index
    %c0_36 = arith.constant 0 : index
    %c0_37 = arith.constant 0 : index
    %82 = vector.load %arg16[%c0_35, %c0_36, %c0_37] : memref<1x1x128xf32, #tpu.memory_space<vmem>>, vector<1x1x128xf32>
    %83 = vector.shape_cast %82 : vector<1x1x128xf32> to vector<1x128xf32>
    %84 = vector.broadcast %83 : vector<1x128xf32> to vector<64x128xf32>
    %85 = arith.mulf %81, %84 : vector<64x128xf32>
    %c0_38 = arith.constant 0 : index
    %c0_39 = arith.constant 0 : index
    %c0_40 = arith.constant 0 : index
    %86 = vector.load %arg17[%c0_38, %c0_39, %c0_40] : memref<1x1x128xf32, #tpu.memory_space<vmem>>, vector<1x1x128xf32>
    %87 = vector.shape_cast %86 : vector<1x1x128xf32> to vector<1x128xf32>
    %88 = vector.broadcast %87 : vector<1x128xf32> to vector<64x128xf32>
    %89 = arith.addf %85, %88 : vector<64x128xf32>
    %90 = arith.truncf %89 : vector<64x128xf32> to vector<64x128xbf16>
    %c0_41 = arith.constant 0 : index
    %c0_42 = arith.constant 0 : index
    %c0_43 = arith.constant 0 : index
    %91 = vector.load %arg10[%c0_41, %c0_42, %c0_43] : memref<1x128x128xbf16, #tpu.memory_space<vmem>>, vector<1x128x128xbf16>
    %92 = vector.shape_cast %91 : vector<1x128x128xbf16> to vector<128x128xbf16>
    %cst_44 = arith.constant dense<0.000000e+00> : vector<64x128xf32>
    %93 = tpu.matmul %90, %92, %cst_44 {dimension_numbers = #tpu.dot_dimension_numbers<[1], [0], [0], [1], [0, 0, 1, 1], [], []>} : vector<64x128xbf16>, vector<128x128xbf16>, vector<64x128xf32> -> vector<64x128xf32>
    %c0_45 = arith.constant 0 : index
    %c0_46 = arith.constant 0 : index
    %c0_47 = arith.constant 0 : index
    %94 = vector.load %arg11[%c0_45, %c0_46, %c0_47] : memref<1x1x128xf32, #tpu.memory_space<vmem>>, vector<1x1x128xf32>
    %95 = vector.shape_cast %94 : vector<1x1x128xf32> to vector<1x128xf32>
    %96 = vector.broadcast %95 : vector<1x128xf32> to vector<64x128xf32>
    %97 = arith.addf %93, %96 : vector<64x128xf32>
    %c0_48 = arith.constant 0 : index
    %c0_49 = arith.constant 0 : index
    %c0_50 = arith.constant 0 : index
    %98 = vector.load %arg3[%c0_48, %c0_49, %c0_50] : memref<4x16x128xbf16, #tpu.memory_space<vmem>>, vector<4x16x128xbf16>
    %99 = vector.shape_cast %98 : vector<4x16x128xbf16> to vector<64x128xbf16>
    %c0_51 = arith.constant 0 : index
    %c0_52 = arith.constant 0 : index
    %c0_53 = arith.constant 0 : index
    %100 = vector.load %arg12[%c0_51, %c0_52, %c0_53] : memref<1x128x256xbf16, #tpu.memory_space<vmem>>, vector<1x128x256xbf16>
    %101 = vector.shape_cast %100 : vector<1x128x256xbf16> to vector<128x256xbf16>
    %cst_54 = arith.constant dense<0.000000e+00> : vector<64x256xf32>
    %102 = tpu.matmul %99, %101, %cst_54 {dimension_numbers = #tpu.dot_dimension_numbers<[1], [0], [0], [1], [0, 0, 1, 1], [], []>} : vector<64x128xbf16>, vector<128x256xbf16>, vector<64x256xf32> -> vector<64x256xf32>
    %c0_55 = arith.constant 0 : index
    %c0_56 = arith.constant 0 : index
    %c0_57 = arith.constant 0 : index
    %103 = vector.load %arg13[%c0_55, %c0_56, %c0_57] : memref<1x1x256xf32, #tpu.memory_space<vmem>>, vector<1x1x256xf32>
    %104 = vector.shape_cast %103 : vector<1x1x256xf32> to vector<1x256xf32>
    %105 = vector.broadcast %104 : vector<1x256xf32> to vector<64x256xf32>
    %106 = arith.addf %102, %105 : vector<64x256xf32>
    %107 = vector.shape_cast %97 : vector<64x128xf32> to vector<4x16x128xf32>
    %108 = vector.extract_strided_slice %106 {offsets = [0, 0], sizes = [64, 128], strides = [1, 1]} : vector<64x256xf32> to vector<64x128xf32>
    %109 = vector.shape_cast %108 : vector<64x128xf32> to vector<4x16x128xf32>
    %110 = vector.extract_strided_slice %106 {offsets = [0, 128], sizes = [64, 128], strides = [1, 1]} : vector<64x256xf32> to vector<64x128xf32>
    %111 = vector.shape_cast %110 : vector<64x128xf32> to vector<4x16x128xf32>
    %112 = arith.truncf %107 : vector<4x16x128xf32> to vector<4x16x128xbf16>
    %113 = arith.truncf %109 : vector<4x16x128xf32> to vector<4x16x128xbf16>
    "tpu.trace_start"() <{level = 10 : i32, message = "bqd,bkd->bqk"}> : () -> ()
    %cst_58 = arith.constant dense<0.000000e+00> : vector<4x16x16xf32>
    %114 = tpu.matmul %112, %113, %cst_58 {dimension_numbers = #tpu.dot_dimension_numbers<[2], [2], [1], [1], [0, 0, 0, 1, 1, 1], [0], [0]>} : vector<4x16x128xbf16>, vector<4x16x128xbf16>, vector<4x16x16xf32> -> vector<4x16x16xf32>
    "tpu.trace_stop"() : () -> ()
    %cst_59 = arith.constant 0.0883883461 : f32
    %115 = vector.broadcast %cst_59 : f32 to vector<4x16x16xf32>
    %116 = arith.mulf %114, %115 : vector<4x16x16xf32>
    %117 = vector.broadcast %21 : vector<4x1x16xf32> to vector<4x16x16xf32>
    %118 = arith.addf %116, %117 : vector<4x16x16xf32>
    %cst_60 = arith.constant dense<0xFF800000> : vector<4x16xf32>
    %119 = vector.multi_reduction <maximumf>, %118, %cst_60 [2] : vector<4x16x16xf32> to vector<4x16xf32>
    %120 = vector.shape_cast %119 : vector<4x16xf32> to vector<4x16x1xf32>
    %121 = vector.broadcast %120 : vector<4x16x1xf32> to vector<4x16x16xf32>
    %122 = arith.subf %118, %121 : vector<4x16x16xf32>
    %123 = math.exp %122 : vector<4x16x16xf32>
    %cst_61 = arith.constant dense<0.000000e+00> : vector<4x16xf32>
    %124 = vector.multi_reduction <add>, %123, %cst_61 [2] : vector<4x16x16xf32> to vector<4x16xf32>
    %125 = vector.shape_cast %124 : vector<4x16xf32> to vector<4x16x1xf32>
    %126 = tpu.reciprocal %125 : vector<4x16x1xf32> -> vector<4x16x1xf32>
    %127 = vector.broadcast %126 : vector<4x16x1xf32> to vector<4x16x16xf32>
    %128 = arith.mulf %123, %127 : vector<4x16x16xf32>
    %129 = arith.truncf %128 : vector<4x16x16xf32> to vector<4x16x16xbf16>
    %130 = arith.truncf %111 : vector<4x16x128xf32> to vector<4x16x128xbf16>
    "tpu.trace_start"() <{level = 10 : i32, message = "bqk,bkd->bqd"}> : () -> ()
    %cst_62 = arith.constant dense<0.000000e+00> : vector<4x16x128xf32>
    %131 = tpu.matmul %129, %130, %cst_62 {dimension_numbers = #tpu.dot_dimension_numbers<[2], [1], [1], [2], [0, 0, 0, 1, 1, 2], [0], [0]>} : vector<4x16x16xbf16>, vector<4x16x128xbf16>, vector<4x16x128xf32> -> vector<4x16x128xf32>
    "tpu.trace_stop"() : () -> ()
    %132 = vector.shape_cast %131 : vector<4x16x128xf32> to vector<64x128xf32>
    %133 = arith.truncf %132 : vector<64x128xf32> to vector<64x128xbf16>
    %c0_63 = arith.constant 0 : index
    %c0_64 = arith.constant 0 : index
    %c0_65 = arith.constant 0 : index
    %134 = vector.load %arg14[%c0_63, %c0_64, %c0_65] : memref<1x128x128xbf16, #tpu.memory_space<vmem>>, vector<1x128x128xbf16>
    %135 = vector.shape_cast %134 : vector<1x128x128xbf16> to vector<128x128xbf16>
    %cst_66 = arith.constant dense<0.000000e+00> : vector<64x128xf32>
    %136 = tpu.matmul %133, %135, %cst_66 {dimension_numbers = #tpu.dot_dimension_numbers<[1], [0], [0], [1], [0, 0, 1, 1], [], []>} : vector<64x128xbf16>, vector<128x128xbf16>, vector<64x128xf32> -> vector<64x128xf32>
    %c0_67 = arith.constant 0 : index
    %c0_68 = arith.constant 0 : index
    %c0_69 = arith.constant 0 : index
    %137 = vector.load %arg15[%c0_67, %c0_68, %c0_69] : memref<1x1x128xf32, #tpu.memory_space<vmem>>, vector<1x1x128xf32>
    %138 = vector.shape_cast %137 : vector<1x1x128xf32> to vector<1x128xf32>
    %139 = vector.broadcast %138 : vector<1x128xf32> to vector<64x128xf32>
    %140 = arith.addf %136, %139 : vector<64x128xf32>
    %141 = arith.addf %140, %89 : vector<64x128xf32>
    %cst_70 = arith.constant dense<0.000000e+00> : vector<64xf32>
    %142 = vector.multi_reduction <add>, %141, %cst_70 [1] : vector<64x128xf32> to vector<64xf32>
    %143 = vector.shape_cast %142 : vector<64xf32> to vector<64x1xf32>
    %cst_71 = arith.constant 1.280000e+02 : f32
    %144 = vector.broadcast %cst_71 : f32 to vector<64x1xf32>
    %145 = arith.divf %143, %144 : vector<64x1xf32>
    %146 = vector.broadcast %145 : vector<64x1xf32> to vector<64x128xf32>
    %147 = arith.subf %141, %146 : vector<64x128xf32>
    %148 = arith.mulf %147, %147 : vector<64x128xf32>
    %cst_72 = arith.constant dense<0.000000e+00> : vector<64xf32>
    %149 = vector.multi_reduction <add>, %148, %cst_72 [1] : vector<64x128xf32> to vector<64xf32>
    %150 = vector.shape_cast %149 : vector<64xf32> to vector<64x1xf32>
    %cst_73 = arith.constant 1.280000e+02 : f32
    %151 = vector.broadcast %cst_73 : f32 to vector<64x1xf32>
    %152 = arith.divf %150, %151 : vector<64x1xf32>
    %cst_74 = arith.constant 9.99999974E-6 : f32
    %153 = vector.broadcast %cst_74 : f32 to vector<64x1xf32>
    %154 = arith.addf %152, %153 : vector<64x1xf32>
    %155 = math.rsqrt %154 : vector<64x1xf32>
    %156 = vector.broadcast %155 : vector<64x1xf32> to vector<64x128xf32>
    %157 = arith.mulf %147, %156 : vector<64x128xf32>
    %c0_75 = arith.constant 0 : index
    %c0_76 = arith.constant 0 : index
    %c0_77 = arith.constant 0 : index
    %158 = vector.load %arg18[%c0_75, %c0_76, %c0_77] : memref<1x1x128xf32, #tpu.memory_space<vmem>>, vector<1x1x128xf32>
    %159 = vector.shape_cast %158 : vector<1x1x128xf32> to vector<1x128xf32>
    %160 = vector.broadcast %159 : vector<1x128xf32> to vector<64x128xf32>
    %161 = arith.mulf %157, %160 : vector<64x128xf32>
    %c0_78 = arith.constant 0 : index
    %c0_79 = arith.constant 0 : index
    %c0_80 = arith.constant 0 : index
    %162 = vector.load %arg19[%c0_78, %c0_79, %c0_80] : memref<1x1x128xf32, #tpu.memory_space<vmem>>, vector<1x1x128xf32>
    %163 = vector.shape_cast %162 : vector<1x1x128xf32> to vector<1x128xf32>
    %164 = vector.broadcast %163 : vector<1x128xf32> to vector<64x128xf32>
    %165 = arith.addf %161, %164 : vector<64x128xf32>
    %166 = arith.truncf %165 : vector<64x128xf32> to vector<64x128xbf16>
    %c0_81 = arith.constant 0 : index
    %c0_82 = arith.constant 0 : index
    %c0_83 = arith.constant 0 : index
    %167 = vector.load %arg22[%c0_81, %c0_82, %c0_83] : memref<1x128x512xbf16, #tpu.memory_space<vmem>>, vector<1x128x512xbf16>
    %168 = vector.shape_cast %167 : vector<1x128x512xbf16> to vector<128x512xbf16>
    %cst_84 = arith.constant dense<0.000000e+00> : vector<64x512xf32>
    %169 = tpu.matmul %166, %168, %cst_84 {dimension_numbers = #tpu.dot_dimension_numbers<[1], [0], [0], [1], [0, 0, 1, 1], [], []>} : vector<64x128xbf16>, vector<128x512xbf16>, vector<64x512xf32> -> vector<64x512xf32>
    %c0_85 = arith.constant 0 : index
    %c0_86 = arith.constant 0 : index
    %c0_87 = arith.constant 0 : index
    %170 = vector.load %arg23[%c0_85, %c0_86, %c0_87] : memref<1x1x512xf32, #tpu.memory_space<vmem>>, vector<1x1x512xf32>
    %171 = vector.shape_cast %170 : vector<1x1x512xf32> to vector<1x512xf32>
    %172 = vector.broadcast %171 : vector<1x512xf32> to vector<64x512xf32>
    %173 = arith.addf %169, %172 : vector<64x512xf32>
    %cst_88 = arith.constant 0.000000e+00 : f32
    %174 = vector.broadcast %cst_88 : f32 to vector<64x512xf32>
    %175 = arith.maximumf %173, %174 : vector<64x512xf32>
    %176 = arith.truncf %175 : vector<64x512xf32> to vector<64x512xbf16>
    %c0_89 = arith.constant 0 : index
    %c0_90 = arith.constant 0 : index
    %c0_91 = arith.constant 0 : index
    %177 = vector.load %arg24[%c0_89, %c0_90, %c0_91] : memref<1x512x128xbf16, #tpu.memory_space<vmem>>, vector<1x512x128xbf16>
    %178 = vector.shape_cast %177 : vector<1x512x128xbf16> to vector<512x128xbf16>
    %cst_92 = arith.constant dense<0.000000e+00> : vector<64x128xf32>
    %179 = tpu.matmul %176, %178, %cst_92 {dimension_numbers = #tpu.dot_dimension_numbers<[1], [0], [0], [1], [0, 0, 1, 1], [], []>} : vector<64x512xbf16>, vector<512x128xbf16>, vector<64x128xf32> -> vector<64x128xf32>
    %c0_93 = arith.constant 0 : index
    %c0_94 = arith.constant 0 : index
    %c0_95 = arith.constant 0 : index
    %180 = vector.load %arg25[%c0_93, %c0_94, %c0_95] : memref<1x1x128xf32, #tpu.memory_space<vmem>>, vector<1x1x128xf32>
    %181 = vector.shape_cast %180 : vector<1x1x128xf32> to vector<1x128xf32>
    %182 = vector.broadcast %181 : vector<1x128xf32> to vector<64x128xf32>
    %183 = arith.addf %179, %182 : vector<64x128xf32>
    %184 = arith.addf %183, %165 : vector<64x128xf32>
    %cst_96 = arith.constant dense<0.000000e+00> : vector<64xf32>
    %185 = vector.multi_reduction <add>, %184, %cst_96 [1] : vector<64x128xf32> to vector<64xf32>
    %186 = vector.shape_cast %185 : vector<64xf32> to vector<64x1xf32>
    %cst_97 = arith.constant 1.280000e+02 : f32
    %187 = vector.broadcast %cst_97 : f32 to vector<64x1xf32>
    %188 = arith.divf %186, %187 : vector<64x1xf32>
    %189 = vector.broadcast %188 : vector<64x1xf32> to vector<64x128xf32>
    %190 = arith.subf %184, %189 : vector<64x128xf32>
    %191 = arith.mulf %190, %190 : vector<64x128xf32>
    %cst_98 = arith.constant dense<0.000000e+00> : vector<64xf32>
    %192 = vector.multi_reduction <add>, %191, %cst_98 [1] : vector<64x128xf32> to vector<64xf32>
    %193 = vector.shape_cast %192 : vector<64xf32> to vector<64x1xf32>
    %cst_99 = arith.constant 1.280000e+02 : f32
    %194 = vector.broadcast %cst_99 : f32 to vector<64x1xf32>
    %195 = arith.divf %193, %194 : vector<64x1xf32>
    %cst_100 = arith.constant 9.99999974E-6 : f32
    %196 = vector.broadcast %cst_100 : f32 to vector<64x1xf32>
    %197 = arith.addf %195, %196 : vector<64x1xf32>
    %198 = math.rsqrt %197 : vector<64x1xf32>
    %199 = vector.broadcast %198 : vector<64x1xf32> to vector<64x128xf32>
    %200 = arith.mulf %190, %199 : vector<64x128xf32>
    %c0_101 = arith.constant 0 : index
    %c0_102 = arith.constant 0 : index
    %c0_103 = arith.constant 0 : index
    %201 = vector.load %arg20[%c0_101, %c0_102, %c0_103] : memref<1x1x128xf32, #tpu.memory_space<vmem>>, vector<1x1x128xf32>
    %202 = vector.shape_cast %201 : vector<1x1x128xf32> to vector<1x128xf32>
    %203 = vector.broadcast %202 : vector<1x128xf32> to vector<64x128xf32>
    %204 = arith.mulf %200, %203 : vector<64x128xf32>
    %c0_104 = arith.constant 0 : index
    %c0_105 = arith.constant 0 : index
    %c0_106 = arith.constant 0 : index
    %205 = vector.load %arg21[%c0_104, %c0_105, %c0_106] : memref<1x1x128xf32, #tpu.memory_space<vmem>>, vector<1x1x128xf32>
    %206 = vector.shape_cast %205 : vector<1x1x128xf32> to vector<1x128xf32>
    %207 = vector.broadcast %206 : vector<1x128xf32> to vector<64x128xf32>
    %208 = arith.addf %204, %207 : vector<64x128xf32>
    %c0_107 = arith.constant 0 : index
    %c0_108 = arith.constant 0 : index
    %209 = vector.load %arg27[%c0_107, %c0_108] : memref<64x128xf32, #tpu.memory_space<vmem>>, vector<64x128xf32>
    tpu.vector_store %arg27[%c0_107, %c0_108], %208 {strides = array<i32>} : memref<64x128xf32, #tpu.memory_space<vmem>>, vector<64x128xf32>,
    %c1_i32 = arith.constant 1 : i32
    %210 = arith.cmpi eq, %arg1, %c1_i32 : i32
    %211 = arith.extui %210 : i1 to i32
    %c0_i32_109 = arith.constant 0 : i32
    %212 = arith.cmpi ne, %211, %c0_i32_109 : i32
    scf.if %212 {
      %213 = vector.shape_cast %208 : vector<64x128xf32> to vector<4x16x128xf32>
      %c0_110 = arith.constant 0 : index
      %c0_111 = arith.constant 0 : index
      %c0_112 = arith.constant 0 : index
      %214 = vector.load %arg26[%c0_110, %c0_111, %c0_112] : memref<4x16x128xf32, #tpu.memory_space<vmem>>, vector<4x16x128xf32>
      tpu.vector_store %arg26[%c0_110, %c0_111, %c0_112], %213 {strides = array<i32>} : memref<4x16x128xf32, #tpu.memory_space<vmem>>, vector<4x16x128xf32>,
    } else {
    }
    return
  }
  func.func @transform_0(%arg0: i32, %arg1: i32) -> (i32, i32, i32) {
    %c0_i32 = arith.constant 0 : i32
    %c0_i32_0 = arith.constant 0 : i32
    %c0_i32_1 = arith.constant 0 : i32
    return %arg0, %c0_i32, %c0_i32_0 : i32, i32, i32
  }
  func.func @transform_1(%arg0: i32, %arg1: i32) -> (i32, i32, i32) {
    %c0_i32 = arith.constant 0 : i32
    %c0_i32_0 = arith.constant 0 : i32
    %c0_i32_1 = arith.constant 0 : i32
    return %arg0, %c0_i32, %c0_i32_0 : i32, i32, i32
  }
  func.func @transform_2(%arg0: i32, %arg1: i32) -> (i32, i32, i32) {
    %c0_i32 = arith.constant 0 : i32
    %c0_i32_0 = arith.constant 0 : i32
    %c0_i32_1 = arith.constant 0 : i32
    return %arg0, %c0_i32, %c0_i32_0 : i32, i32, i32
  }
  func.func @transform_3(%arg0: i32, %arg1: i32) -> (i32, i32, i32) {
    %c0_i32 = arith.constant 0 : i32
    %c0_i32_0 = arith.constant 0 : i32
    %c0_i32_1 = arith.constant 0 : i32
    return %arg0, %c0_i32, %c0_i32_0 : i32, i32, i32
  }
  func.func @transform_4(%arg0: i32, %arg1: i32) -> (i32, i32, i32) {
    %c0_i32 = arith.constant 0 : i32
    %c0_i32_0 = arith.constant 0 : i32
    %c0_i32_1 = arith.constant 0 : i32
    return %arg1, %c0_i32, %c0_i32_0 : i32, i32, i32
  }
  func.func @transform_5(%arg0: i32, %arg1: i32) -> (i32, i32, i32) {
    %c0_i32 = arith.constant 0 : i32
    %c0_i32_0 = arith.constant 0 : i32
    %c0_i32_1 = arith.constant 0 : i32
    return %arg1, %c0_i32, %c0_i32_0 : i32, i32, i32
  }
  func.func @transform_6(%arg0: i32, %arg1: i32) -> (i32, i32, i32) {
    %c0_i32 = arith.constant 0 : i32
    %c0_i32_0 = arith.constant 0 : i32
    %c0_i32_1 = arith.constant 0 : i32
    return %arg1, %c0_i32, %c0_i32_0 : i32, i32, i32
  }
  func.func @transform_7(%arg0: i32, %arg1: i32) -> (i32, i32, i32) {
    %c0_i32 = arith.constant 0 : i32
    %c0_i32_0 = arith.constant 0 : i32
    %c0_i32_1 = arith.constant 0 : i32
    return %arg1, %c0_i32, %c0_i32_0 : i32, i32, i32
  }
  func.func @transform_8(%arg0: i32, %arg1: i32) -> (i32, i32, i32) {
    %c0_i32 = arith.constant 0 : i32
    %c0_i32_0 = arith.constant 0 : i32
    %c0_i32_1 = arith.constant 0 : i32
    return %arg1, %c0_i32, %c0_i32_0 : i32, i32, i32
  }
  func.func @transform_9(%arg0: i32, %arg1: i32) -> (i32, i32, i32) {
    %c0_i32 = arith.constant 0 : i32
    %c0_i32_0 = arith.constant 0 : i32
    %c0_i32_1 = arith.constant 0 : i32
    return %arg1, %c0_i32, %c0_i32_0 : i32, i32, i32
  }
  func.func @transform_10(%arg0: i32, %arg1: i32) -> (i32, i32, i32) {
    %c0_i32 = arith.constant 0 : i32
    %c0_i32_0 = arith.constant 0 : i32
    %c0_i32_1 = arith.constant 0 : i32
    return %arg1, %c0_i32, %c0_i32_0 : i32, i32, i32
  }
  func.func @transform_11(%arg0: i32, %arg1: i32) -> (i32, i32, i32) {
    %c0_i32 = arith.constant 0 : i32
    %c0_i32_0 = arith.constant 0 : i32
    %c0_i32_1 = arith.constant 0 : i32
    return %arg1, %c0_i32, %c0_i32_0 : i32, i32, i32
  }
  func.func @transform_12(%arg0: i32, %arg1: i32) -> (i32, i32, i32) {
    %c0_i32 = arith.constant 0 : i32
    %c0_i32_0 = arith.constant 0 : i32
    %c0_i32_1 = arith.constant 0 : i32
    return %arg1, %c0_i32, %c0_i32_0 : i32, i32, i32
  }
  func.func @transform_13(%arg0: i32, %arg1: i32) -> (i32, i32, i32) {
    %c0_i32 = arith.constant 0 : i32
    %c0_i32_0 = arith.constant 0 : i32
    %c0_i32_1 = arith.constant 0 : i32
    return %arg1, %c0_i32, %c0_i32_0 : i32, i32, i32
  }
  func.func @transform_14(%arg0: i32, %arg1: i32) -> (i32, i32, i32) {
    %c0_i32 = arith.constant 0 : i32
    %c0_i32_0 = arith.constant 0 : i32
    %c0_i32_1 = arith.constant 0 : i32
    return %arg1, %c0_i32, %c0_i32_0 : i32, i32, i32
  }
  func.func @transform_15(%arg0: i32, %arg1: i32) -> (i32, i32, i32) {
    %c0_i32 = arith.constant 0 : i32
    %c0_i32_0 = arith.constant 0 : i32
    %c0_i32_1 = arith.constant 0 : i32
    return %arg1, %c0_i32, %c0_i32_0 : i32, i32, i32
  }
  func.func @transform_16(%arg0: i32, %arg1: i32) -> (i32, i32, i32) {
    %c0_i32 = arith.constant 0 : i32
    %c0_i32_0 = arith.constant 0 : i32
    %c0_i32_1 = arith.constant 0 : i32
    return %arg1, %c0_i32, %c0_i32_0 : i32, i32, i32
  }
  func.func @transform_17(%arg0: i32, %arg1: i32) -> (i32, i32, i32) {
    %c0_i32 = arith.constant 0 : i32
    %c0_i32_0 = arith.constant 0 : i32
    %c0_i32_1 = arith.constant 0 : i32
    return %arg1, %c0_i32, %c0_i32_0 : i32, i32, i32
  }
  func.func @transform_18(%arg0: i32, %arg1: i32) -> (i32, i32, i32) {
    %c0_i32 = arith.constant 0 : i32
    %c0_i32_0 = arith.constant 0 : i32
    %c0_i32_1 = arith.constant 0 : i32
    return %arg1, %c0_i32, %c0_i32_0 : i32, i32, i32
  }
  func.func @transform_19(%arg0: i32, %arg1: i32) -> (i32, i32, i32) {
    %c0_i32 = arith.constant 0 : i32
    %c0_i32_0 = arith.constant 0 : i32
    %c0_i32_1 = arith.constant 0 : i32
    return %arg1, %c0_i32, %c0_i32_0 : i32, i32, i32
  }
  func.func @transform_20(%arg0: i32, %arg1: i32) -> (i32, i32, i32) {
    %c0_i32 = arith.constant 0 : i32
    %c0_i32_0 = arith.constant 0 : i32
    %c0_i32_1 = arith.constant 0 : i32
    return %arg1, %c0_i32, %c0_i32_0 : i32, i32, i32
  }
  func.func @transform_21(%arg0: i32, %arg1: i32) -> (i32, i32, i32) {
    %c0_i32 = arith.constant 0 : i32
    %c0_i32_0 = arith.constant 0 : i32
    %c0_i32_1 = arith.constant 0 : i32
    return %arg1, %c0_i32, %c0_i32_0 : i32, i32, i32
  }
  func.func @transform_22(%arg0: i32, %arg1: i32) -> (i32, i32, i32) {
    %c0_i32 = arith.constant 0 : i32
    %c0_i32_0 = arith.constant 0 : i32
    %c0_i32_1 = arith.constant 0 : i32
    return %arg1, %c0_i32, %c0_i32_0 : i32, i32, i32
  }
  func.func @transform_23(%arg0: i32, %arg1: i32) -> (i32, i32, i32) {
    %c0_i32 = arith.constant 0 : i32
    %c0_i32_0 = arith.constant 0 : i32
    %c0_i32_1 = arith.constant 0 : i32
    return %arg1, %c0_i32, %c0_i32_0 : i32, i32, i32
  }
  func.func @transform_24(%arg0: i32, %arg1: i32) -> (i32, i32, i32) {
    %c0_i32 = arith.constant 0 : i32
    %c0_i32_0 = arith.constant 0 : i32
    %c0_i32_1 = arith.constant 0 : i32
    return %arg0, %c0_i32, %c0_i32_0 : i32, i32, i32
  }
}

</mosaic_0001>

<bundles_post_ra>
// kernel: transformer_decoder_forward.1
= control target key start
LH: loop header
LB: loop body
LE: loop exit
PB: predicated region body
PF: predicated region fallthrough
CT: control target
= control target key end

     0   :  { %s7443_s0 = inlined_call_operand.vmem [shape: f32[4,16,128], index: 0, kind: input, shape index: {}]   ;;  %s7444_s1 = inlined_call_operand.vmem [shape: bf16[4,16,128], index: 1, kind: input, shape index: {}]   ;;  %s7445_s2 = inlined_call_operand.vmem [shape: f32[4,1,16], index: 2, kind: input, shape index: {}]   ;;  %s7446_s3 = inlined_call_operand.vmem [shape: f32[4,1,16], index: 3, kind: input, shape index: {}]   ;;  %s7447_s4 = inlined_call_operand.hbm [shape: bf16[2,128,384], index: 4, kind: input, shape index: {}]   ;;  %s7448_s5 = inlined_call_operand.vmem [shape: f32[2,1,384], index: 5, kind: input, shape index: {}]   ;;  %s7449_s6 = inlined_call_operand.hbm [shape: bf16[2,128,128], index: 6, kind: input, shape index: {}]   ;;  %s7450_s7 = inlined_call_operand.vmem [shape: f32[2,1,128], index: 7, kind: input, shape index: {}]   ;;  %s7451_s8 = inlined_call_operand.hbm [shape: bf16[2,128,128], index: 8, kind: input, shape index: {}]   ;;  %s7452_s9 = inlined_call_operand.vmem [shape: f32[2,1,128], index: 9, kind: input, shape index: {}]   ;;  %s7453_s10 = inlined_call_operand.hbm [shape: bf16[2,128,256], index: 10, kind: input, shape index: {}]   ;;  %s7454_s11 = inlined_call_operand.vmem [shape: f32[2,1,256], index: 11, kind: input, shape index: {}]   ;;  %s7455_s12 = inlined_call_operand.hbm [shape: bf16[2,128,128], index: 12, kind: input, shape index: {}]   ;;  %s7456_s13 = inlined_call_operand.vmem [shape: f32[2,1,128], index: 13, kind: input, shape index: {}]   ;;  %s7457_s14 = inlined_call_operand.vmem [shape: f32[2,1,128], index: 14, kind: input, shape index: {}]   ;;  %s7458_s15 = inlined_call_operand.vmem [shape: f32[2,1,128], index: 15, kind: input, shape index: {}]   ;;  %s7459_s16 = inlined_call_operand.vmem [shape: f32[2,1,128], index: 16, kind: input, shape index: {}]   ;;  %s7460_s17 = inlined_call_operand.vmem [shape: f32[2,1,128], index: 17, kind: input, shape index: {}]   ;;  %s7461_s18 = inlined_call_operand.vmem [shape: f32[2,1,128], index: 18, kind: input, shape index: {}]   ;;  %s7462_s19 = inlined_call_operand.vmem [shape: f32[2,1,128], index: 19, kind: input, shape index: {}]   ;;  %s7463_s20 = inlined_call_operand.hbm [shape: bf16[2,128,512], index: 20, kind: input, shape index: {}]   ;;  %s7464_s21 = inlined_call_operand.vmem [shape: f32[2,1,512], index: 21, kind: input, shape index: {}]   ;;  %s7465_s22 = inlined_call_operand.hbm [shape: bf16[2,512,128], index: 22, kind: input, shape index: {}]   ;;  %s7466_s23 = inlined_call_operand.vmem [shape: f32[2,1,128], index: 23, kind: input, shape index: {}]   ;;  %s7467_s24 = inlined_call_operand.hbm [shape: f32[4,16,128], index: 24, kind: output, shape index: {}]  }
   0x1   :  { %7487 = sst [smem:[#allocation30_spill]] %s7443_s0 }
   0x2   :  { %7488 = sst [smem:[#allocation31_spill]] %s7444_s1 }
   0x3   :  { %7489 = sst [smem:[#allocation32_spill]] %s7445_s2 }
   0x4   :  { %7490 = sst [smem:[#allocation33_spill]] %s7446_s3 }
   0x5   :  { %7491 = sst [smem:[#allocation34_spill]] %s7447_s4 }
   0x6   :  { %7492 = sst [smem:[#allocation35_spill]] %s7448_s5 }
   0x7   :  { %7493 = sst [smem:[#allocation36_spill]] %s7449_s6 }
   0x8   :  { %7494 = sst [smem:[#allocation37_spill]] %s7450_s7 }
   0x9   :  { %7495 = sst [smem:[#allocation38_spill]] %s7451_s8 }
   0xa   :  { %7496 = sst [smem:[#allocation39_spill]] %s7452_s9 }
   0xb   :  { %7497 = sst [smem:[#allocation40_spill]] %s7453_s10 }
   0xc   :  { %7498 = sst [smem:[#allocation41_spill]] %s7454_s11 }
   0xd   :  { %7499 = sst [smem:[#allocation42_spill]] %s7455_s12 }
   0xe   :  { %7500 = sst [smem:[#allocation43_spill]] %s7456_s13 }
   0xf   :  { %7501 = sst [smem:[#allocation44_spill]] %s7457_s14 }
  0x10   :  { %7502 = sst [smem:[#allocation45_spill]] %s7458_s15 }
  0x11   :  { %7503 = sst [smem:[#allocation46_spill]] %s7459_s16 }
  0x12   :  { %7504 = sst [smem:[#allocation47_spill]] %s7460_s17 }
  0x13   :  { %7505 = sst [smem:[#allocation48_spill]] %s7461_s18 }
  0x14   :  { %7506 = sst [smem:[#allocation49_spill]] %s7462_s19 }
  0x15   :  { %7507 = sst [smem:[#allocation50_spill]] %s7463_s20 }
  0x16   :  { %7508 = sst [smem:[#allocation51_spill]] %s7464_s21 }
  0x17   :  { %7509 = sst [smem:[#allocation52_spill]] %s7465_s22 }
  0x18   :  { %7510 = sst [smem:[#allocation53_spill]] %s7466_s23 }
  0x19   :  { %7511 = sst [smem:[#allocation54_spill]] %s7467_s24 }
  0x1a   :  { %29 = vsyncpa [#allocation4], 0 }
  0x1b   :  { %31 = vsyncpa [#allocation4 + $0x1], 0 }
  0x1c   :  { %32 = vsyncpa [#allocation7], 0 }
  0x1d   :  { %34 = vsyncpa [#allocation7 + $0x1], 0 }
  0x1e   :  { %35 = vsyncpa [#allocation10], 0 }
  0x1f   :  { %37 = vsyncpa [#allocation10 + $0x1], 0 }
  0x20   :  { %38 = vsyncpa [#allocation13], 0 }
  0x21   :  { %40 = vsyncpa [#allocation13 + $0x1], 0 }
  0x22   :  { %41 = vsyncpa [#allocation5], 0  ;;  %s6214_s5 = smov 0   ;;  %s6216_s26 = smov 0  }
  0x23   :  { %s6218_s27 = smov 0   ;;  %s6220_s28 = smov 0  }
  0x24   :  { %s6222_s6 = smov 0   ;;  %s6224_s2 = smov 0  }
  0x25 LB: > { %7512 = sst [smem:[#allocation21_spill]] %s6058_s26  ;;  %s6243_s29 = sadd.s32 4294967295, %s6074_s2   ;;  %s6074_s2 = sphi %s6224_s2, %s47_s2   ;;  %s6070_s6 = sphi %s6222_s6, %s7580_s6   ;;  %s6066_s28 = sphi %s6220_s28, %s7579_s28   ;;  %s6062_s27 = sphi %s6218_s27, %s7578_s27   ;;  %s6058_s26 = sphi %s6216_s26, %s7577_s26   ;;  %s6054_s5 = sphi %s6214_s5, %s7576_s5  }
  0x26   : > { %7513 = sst [smem:[#allocation22_spill]] %s6062_s27  ;;  %s56_s0 = sadd.s32 1, %s6070_s6 }
  0x27   : > { %7514 = sst [smem:[#allocation23_spill]] %s6070_s6  ;;  %p57_p0 = scmp.ge.s32.totalorder %s56_s0, 2 }
  0x28   : > { %7515 = sst [smem:[#allocation24_spill]] %s6074_s2  ;;  %s170_s7 = sadd.s32 1, %s6062_s27 }
  0x29   : > { %7516 = sst [smem:[#allocation25_spill]] %s6243_s29  ;;  %p177_p1 = scmp.ne.s32.totalorder %s6062_s27, %s6058_s26 }
  0x2a   : > { %p178_p2 = scmp.eq.s32.totalorder %s6074_s2, 0  ;;  %s7582_s0 = smov (%p57_p0, %s56_s0), 0 }
  0x2b   : > { %7517 = sst [smem:[#allocation26_spill]] %s7582_s0  ;;  %p183_p4 = scmp.ne.s32.totalorder %s6058_s26, %s6054_s5 }
  0x2c   : > { %p179_p3 = por %p178_p2, %p177_p1  ;;  %s167_s30 = ssub.s32 %s6070_s6, %s7582_s0 }
  0x2d   : > { %p184_p5 = scmp.eq.s32.totalorder %s6243_s29, 0  ;;  %p168_p6 = scmp.eq.s32.totalorder %s167_s30, 0 }
  0x2e   : > { %p5572_p8 = scmp.lt.s32.totalorder %s6074_s2, 2  ;;  %s6265_s8 = sand.u32 1, %s6062_s27  }
  0x2f   : > { %p6256_p7 = por %p184_p5, %p183_p4  ;;  %s6272_s1 = sand.u32 1, %s6074_s2  }
  0x30   : > { %s6262_s25 = scalar_select %p168_p6, %s6062_s27, %s170_s7  }
  0x31   : > { %p6267_p9 = pnand %p5572_p8, %p179_p3  ;;  %s6275_s5 = sshll.u32 %s6265_s8, 6 }
  0x32   : > { %7519 = sst [smem:[#allocation27_spill]] %s6262_s25  ;;  %s6278_s7 = sshll.u32 %s6070_s6, 6 }
  0x33   : > { %s7521_s25 = sld [smem:[#allocation36_spill]]  ;;  %s796_s24 = scalar_lea.vmem [#allocation6], %s6275_s5 }
  0x34   : > { %s804_s23 = sshll.u32 %s796_s24, 4  ;;  %p4817_p10 = scmp.ge.s32.totalorder %s6074_s2, 1  ;;  %s805_s23 = int_to_ptr.vmem [resolvable:$true] %s804_s23 }
  0x35   : > { %s7474_s19 = scalar_lea.sflag [#allocation7], %s6272_s1  ;;  %s7475_s18 = smov 64  }
  0x36   : > { %s7477_s17 = smov 4   ;;  %p996_p11 = scmp.lt.s32.totalorder %s6074_s2, 3 }
  0x37   : > { %s4805_s24 = sshll.u32 %s6265_s8, 7  ;;  %s7523_s10 = sld [smem:[#allocation40_spill]] }
  0x38   : > { %p6297_p12 = pnand %p4817_p10, %p996_p11  ;;  %s852_s15 = scalar_lea.vmem [#allocation9], %s4805_s24 }
  0x39   : > { %s801_s27 = scalar_lea.hbm %s7521_s25, %s6278_s7  ;;  %s860_s14 = sshll.u32 %s852_s15, 4  ;;  %s861_s14 = int_to_ptr.vmem [resolvable:$true] %s860_s14 }
  0x3a   : > { %s802_s21 = sshll.u32 %s801_s27, 4  ;;  %s5384_s27 = sshll.u32 %s6070_s6, 7  ;;  %s803_s21 = int_to_ptr.hbm [resolvable:$true] %s802_s21 }
  0x3b   : > { %5556 = dma.hbm_to_vmem [thread:$0]  (!%p6267_p9), %s803_s21, 1024, %s805_s23, %s7474_s19, %s7475_s18, %s7475_s18, %s7477_s17  }
  0x3c   : > { %s7480_s21 = scalar_lea.sflag [#allocation10], %s6272_s1  ;;  %s6078_s23 = smov 128  }
  0x3d   : > { %s857_s16 = scalar_lea.hbm %s7523_s10, %s5384_s27  ;;  %s6079_s19 = smov 8  }
  0x3e   : > { %s858_s13 = sshll.u32 %s857_s16, 4  ;;  %s4811_s18 = sshll.u32 %s6265_s8, 8  ;;  %s859_s13 = int_to_ptr.hbm [resolvable:$true] %s858_s13 }
  0x3f   : > { %5562 = dma.hbm_to_vmem [thread:$0]  (!%p6267_p9), %s859_s13, 2048, %s861_s14, %s7480_s21, %s6078_s23, %s6078_s23, %s6079_s19  }
  0x40   : > { %s5386_s17 = sshll.u32 %s6070_s6, 8  ;;  %s7524_s20 = sld [smem:[#allocation50_spill]] }
  0x41   : > { %s945_s16 = scalar_lea.vmem [#allocation12], %s4811_s18  ;;  %s7481_s25 = scalar_lea.sflag [#allocation13], %s6272_s1 }
  0x42   : > { %s953_s24 = sshll.u32 %s945_s16, 4  ;;  %s6080_s30 = smov 256   ;;  %s954_s24 = int_to_ptr.vmem [resolvable:$true] %s953_s24 }
  0x43   : > { %s6081_s10 = smov 16   ;;  %s7525_s22 = sld [smem:[#allocation52_spill]] }
  0x44   : > { %s974_s2 = scalar_lea.vmem [#allocation14], %s4811_s18  ;;  %s5529_s16 = smul.u32 192, %s6070_s6 }
  0x45   : > { %s982_s23 = sshll.u32 %s974_s2, 4  ;;  %s7526_s9 = sld [smem:[#allocation34_spill]]  ;;  %s6324_s23 = int_to_ptr.vmem [resolvable:$true] %s982_s23 }
  0x46   : > { %s950_s27 = scalar_lea.hbm %s7524_s20, %s5386_s17  ;;  %s6083_s13 = smov 12  }
  0x47   : > { %s951_s15 = sshll.u32 %s950_s27, 4  ;;  %s5528_s27 = smul.u32 192, %s6265_s8  ;;  %s952_s15 = int_to_ptr.hbm [resolvable:$true] %s951_s15 }
  0x48   : > { %5568 = dma.hbm_to_vmem [thread:$0]  (!%p6267_p9), %s952_s15, 4096, %s954_s24, %s7481_s25, %s6080_s30, %s6080_s30, %s6081_s10  }
  0x49   : > { %s979_s19 = scalar_lea.hbm %s7525_s22, %s5386_s17  ;;  %s767_s15 = scalar_lea.vmem [#allocation3], %s5528_s27 }
  0x4a   : > { %s980_s11 = sshll.u32 %s979_s19, 4  ;;  %s775_s17 = sshll.u32 %s767_s15, 4  ;;  %s6322_s11 = int_to_ptr.hbm [resolvable:$true] %s980_s11  ;;  %s776_s17 = int_to_ptr.vmem [resolvable:$true] %s775_s17 }
  0x4b   : > { %s772_s10 = scalar_lea.hbm %s7526_s9, %s5529_s16  ;;  %s764_s24 = scalar_lea.sflag [#allocation4], %s6265_s8 }
  0x4c   : > { %s773_s18 = sshll.u32 %s772_s10, 4  ;;  %s6082_s30 = smov 192   ;;  %s774_s18 = int_to_ptr.hbm [resolvable:$true] %s773_s18 }
  0x4d   : > { %5553 = dma.hbm_to_vmem [thread:$0]  (!%p6267_p9), %s774_s18, 3072, %s776_s17, %s764_s24, %s6082_s30, %s6082_s30, %s6083_s13  }
  0x4e   : > { %s7527_s21 = sld [smem:[#allocation38_spill]]  ;;  %s824_s19 = scalar_lea.vmem [#allocation8], %s6275_s5 }
  0x4f   : > { %s832_s2 = sshll.u32 %s824_s19, 4  ;;  %s7528_s8 = smov 4   ;;  %s833_s2 = int_to_ptr.vmem [resolvable:$true] %s832_s2 }
  0x50   : > { %s7529_s16 = smov 64   ;;  %s7530_s10 = scalar_lea.sflag [#allocation7], %s6272_s1 }
  0x51   : > { %s7531_s12 = sld [smem:[#allocation42_spill]]  ;;  %s881_s17 = scalar_lea.vmem [#allocation11], %s6275_s5 }
  0x52   : > { %s889_s18 = sshll.u32 %s881_s17, 4  ;;  %s7532_s30 = scalar_lea.sflag [#allocation10], %s6272_s1  ;;  %s890_s18 = int_to_ptr.vmem [resolvable:$true] %s889_s18 }
  0x53   : > { %s7533_s13 = scalar_lea.sflag [#allocation13], %s6272_s1 }
  0x54   : > { %s829_s14 = scalar_lea.hbm %s7527_s21, %s6278_s7 }
  0x55   : > { %s830_s27 = sshll.u32 %s829_s14, 4  ;;  %s831_s27 = int_to_ptr.hbm [resolvable:$true] %s830_s27 }
  0x56   : > { %5559 = dma.hbm_to_vmem [thread:$0]  (!%p6267_p9), %s831_s27, 1024, %s833_s2, %s7530_s10, %s7529_s16, %s7529_s16, %s7528_s8  }
  0x57   : > { %s886_s22 = scalar_lea.hbm %s7531_s12, %s6278_s7  ;;  %1000 = sbr.rel (%p6297_p12) target bundleno = 3096 (0xc18), region = 116 }
  0x58   : > { %s887_s24 = sshll.u32 %s886_s22, 4  ;;  %s888_s24 = int_to_ptr.hbm [resolvable:$true] %s887_s24 }
  0x59   : > { %5565 = dma.hbm_to_vmem [thread:$0]  (!%p6267_p9), %s888_s24, 1024, %s890_s18, %s7532_s30, %s7529_s16, %s7529_s16, %s7528_s8  }
  0x5a   : > { %5571 = dma.hbm_to_vmem [thread:$0]  (!%p6267_p9), %s6322_s11, 4096, %s6324_s23, %s7533_s13, %s7529_s16, %s7529_s16, %s7528_s8  }
  0x5c   : > { %s6370_s22 = sand.u32 1, %s6058_s26  }
  0x5d   : > { %s5530_s5 = smul.u32 192, %s6370_s22  ;;  %s1003_s7 = scalar_lea.sflag [#allocation4], %s6370_s22 }
  0x5f   : > { %s6374_s25 = scalar_lea.vmem [#allocation3], %s5530_s5 }
  0x60   : > { %6033 = dma.done.wait (%p6256_p7), %s1003_s7, 3072  }
  0x61   : > { %6035 = vsyncadd (%p6256_p7), %s1003_s7, 4294964224  ;;  %s1012_s4 = sand.u32 1, %s6243_s29   ;;  %s4818_s1 = sshll.u32 %s6370_s22, 6 }
  0x62   : > { %s1013_s0 = scalar_lea.sflag [#allocation7], %s1012_s4  ;;  %s6382_s11 = scalar_lea.vmem [#allocation6], %s4818_s1 }
  0x63   : > { %6037 = dma.done.wait (%p6256_p7), %s1013_s0, 2048  }
  0x64   : > { %6039 = vsyncadd (%p6256_p7), %s1013_s0, 4294965248  ;;  %s4820_s23 = sshll.u32 %s6370_s22, 7  ;;  %s6389_s9 = scalar_lea.vmem [#allocation8], %s4818_s1 }
  0x65   : > { %s1033_s20 = scalar_lea.sflag [#allocation10], %s1012_s4  ;;  %s6391_s21 = scalar_lea.vmem [#allocation9], %s4820_s23 }
  0x66   : > { %6041 = dma.done.wait (%p6256_p7), %s1033_s20, 3072  }
  0x67   : > { %6043 = vsyncadd (%p6256_p7), %s1033_s20, 4294964224  ;;  %s4822_s14 = sshll.u32 %s6370_s22, 8  ;;  %s6398_s19 = scalar_lea.vmem [#allocation11], %s4818_s1 }
  0x68   : > { %7534 = sst [smem:[#allocation28_spill]] %s6398_s19  ;;  %s1053_s2 = scalar_lea.sflag [#allocation13], %s1012_s4 }
  0x69   : > { %s6400_s27 = scalar_lea.vmem [#allocation12], %s4822_s14 }
  0x6a   : > { %7535 = sst [smem:[#allocation29_spill]] %s6400_s27 }
  0x6b   : > { %6045 = dma.done.wait (%p6256_p7), %s1053_s2, 8192  }
  0x6c   : > { %6047 = vsyncadd (%p6256_p7), %s1053_s2, 4294959104  ;;  %p1243_p13 = scmp.lt.s32.totalorder %s6066_s28, 1  ;;  %s7538_s4 = sld [smem:[#allocation35_spill]] }
  0x6d   : > { %s7539_s20 = sld [smem:[#allocation41_spill]]  ;;  %s6468_s27 = scalar_lea.vmem [#allocation14], %s4822_s14 }
  0x6e   : > { %s6408_s8 = scalar_select %p1243_p13, %s6066_s28, 1 }
  0x6f   : > { %s7542_s13 = sld [smem:[#allocation45_spill]]  ;;  %p4826_p0 = scmp.ne.s32.totalorder %s6066_s28, 0 }
  0x70   : > { %s5531_s3 = smul.u32 3, %s6408_s8  ;;  %s4824_s22 = sshll.u32 %s6408_s8, 1 }
  0x71   : > { %s7545_s12 = sld [smem:[#allocation48_spill]]  ;;  %s4825_s15 = sshll.u32 %s6408_s8, 2 }
  0x72   : > { %s6423_s1 = scalar_lea.vmem %s7538_s4, %s5531_s3  ;;  %s7546_s10 = sld [smem:[#allocation49_spill]] }
  0x73   : > { %s6428_s2 = scalar_lea.vmem %s7539_s20, %s4824_s22  ;;  %s7544_s22 = sld [smem:[#allocation47_spill]] }
  0x74   : > { %s7548_s7 = sld [smem:[#allocation53_spill]] }
  0x75   : > { %s1265_s29 = scalar_lea.vmem %s7542_s13, %s6408_s8  ;;  %s7547_s13 = sld [smem:[#allocation51_spill]] }
  0x77   : > { %s1274_s26 = scalar_lea.vmem %s7545_s12, %s6408_s8  ;;  %1290 = sbr.rel (%p4826_p0) target bundleno = 136 (0x88), region = 148 }
  0x78   : > { %s1277_s17 = scalar_lea.vmem %s7546_s10, %s6408_s8 }
  0x79   : > { %s1271_s23 = scalar_lea.vmem %s7544_s22, %s6408_s8  ;;  %s7549_s22 = sld [smem:[#allocation30_spill]] (!%p4826_p0) }
  0x7a   : > { %s1284_s4 = scalar_lea.vmem %s7548_s7, %s6408_s8 }
  0x7b   : > { %s6462_s30 = scalar_lea.vmem %s7547_s13, %s4825_s15 }
  0x7f   : > { %v1291_v0 = vld [vmem:[%s7549_s22] sm:$0xff]  ;;  %v1292_v1 = vld [vmem:[%s7549_s22 + $0x8] sm:$0xff]  ;;  %v1293_v2 = vld [vmem:[%s7549_s22 + $0x10] sm:$0xff] }
  0x80   : > { %1299 = vst [vmem:[#allocation2 + $0x30] sm:$0xff] %v1291_v0  ;;  %v1294_v3 = vld [vmem:[%s7549_s22 + $0x18] sm:$0xff]  ;;  %v1295_v4 = vld [vmem:[%s7549_s22 + $0x20] sm:$0xff]  ;;  %v1296_v5 = vld [vmem:[%s7549_s22 + $0x28] sm:$0xff] }
  0x81   : > { %1300 = vst [vmem:[#allocation2] sm:$0xff] %v1292_v1  ;;  %v1297_v6 = vld [vmem:[%s7549_s22 + $0x30] sm:$0xff]  ;;  %v1298_v7 = vld [vmem:[%s7549_s22 + $0x38] sm:$0xff] }
  0x82   : > { %1301 = vst [vmem:[#allocation2 + $0x18] sm:$0xff] %v1293_v2 }
  0x83   : > { %1302 = vst [vmem:[#allocation2 + $0x10] sm:$0xff] %v1294_v3 }
  0x84   : > { %1303 = vst [vmem:[#allocation2 + $0x8] sm:$0xff] %v1295_v4 }
  0x85   : > { %1304 = vst [vmem:[#allocation2 + $0x20] sm:$0xff] %v1296_v5 }
  0x86   : > { %1305 = vst [vmem:[#allocation2 + $0x28] sm:$0xff] %v1297_v6 }
  0x87   : > { %1306 = vst [vmem:[#allocation2 + $0x38] sm:$0xff] %v1298_v7 }
  0x88 PF: > { %v4927_v8 = vld [vmem:[%s6374_s25 + $0xa8] sm:$0xf]  ;;  %v5410_v9 = vld [vmem:[%s6374_s25 + $0xb0] sm:$0xf0]  ;;  %v5409_v10 = vld [vmem:[%s6374_s25 + $0xac] sm:$0xf] }
  0x89   : > { %v4928_v11 = vor.u32 %v5410_v9, %v4927_v8  ;;  %v4929_v12 = vld [vmem:[%s6374_s25 + $0xb4] sm:$0xf0]  ;;  %v4915_v13 = vld [vmem:[%s6374_s25 + $0x90] sm:$0xf]  ;;  %v5407_v14 = vld [vmem:[%s6374_s25 + $0x98] sm:$0xf0] }
  0x8a   : > { %v4932_v15 = vor.u32 %v5409_v10, %v4929_v12  ;;  %v5406_v16 = vld [vmem:[%s6374_s25 + $0x94] sm:$0xf]  ;;  %v4917_v17 = vld [vmem:[%s6374_s25 + $0x9c] sm:$0xf0]  ;;  %v4916_v18 = vor.u32 %v5407_v14, %v4915_v13  ;;  %v4903_v20 = vld [vmem:[%s6374_s25 + $0x78] sm:$0xf] }
  0x8b   : > { %1550 = vmatpush.bf16.msra.mxu0 %v4928_v11  ;;  %v4920_v19 = vor.u32 %v5406_v16, %v4917_v17  ;;  %v5404_v21 = vld [vmem:[%s6374_s25 + $0x80] sm:$0xf0]  ;;  %v5403_v22 = vld [vmem:[%s6374_s25 + $0x7c] sm:$0xf]  ;;  %v4905_v23 = vld [vmem:[%s6374_s25 + $0x84] sm:$0xf0] }
  0x8c   : > { %1579 = vmatpush.bf16.msra.mxu1 %v4932_v15  ;;  %5520 = vmatpush.bf16.msra.mxu2 %v4932_v15  ;;  %v4904_v24 = vor.u32 %v5404_v21, %v4903_v20  ;;  %v4908_v25 = vor.u32 %v5403_v22, %v4905_v23  ;;  %v4891_v26 = vld [vmem:[%s6374_s25 + $0x60] sm:$0xf]  ;;  %v5401_v27 = vld [vmem:[%s6374_s25 + $0x68] sm:$0xf0]  ;;  %v5400_v28 = vld [vmem:[%s6374_s25 + $0x64] sm:$0xf] }
  0x8d   : > { %v4893_v29 = vld [vmem:[%s6374_s25 + $0x6c] sm:$0xf0]  ;;  %v4879_v30 = vld [vmem:[%s6374_s25 + $0x48] sm:$0xf]  ;;  %v4892_v31 = vor.u32 %v5401_v27, %v4891_v26  ;;  %v5398_v32 = vld [vmem:[%s6374_s25 + $0x50] sm:$0xf0] }
  0x8e   : > { %v5397_v33 = vld [vmem:[%s6374_s25 + $0x4c] sm:$0xf]  ;;  %v4881_v34 = vld [vmem:[%s6374_s25 + $0x54] sm:$0xf0]  ;;  %v4896_v35 = vor.u32 %v5400_v28, %v4893_v29  ;;  %v4867_v36 = vld [vmem:[%s6374_s25 + $0x30] sm:$0xf]  ;;  %v4880_v37 = vor.u32 %v5398_v32, %v4879_v30 }
  0x8f   : > { %1551 = vmatpush.bf16.msra.mxu0 %v4916_v18  ;;  %v4884_v38 = vor.u32 %v5397_v33, %v4881_v34  ;;  %v5395_v39 = vld [vmem:[%s6374_s25 + $0x38] sm:$0xf0]  ;;  %v5394_v40 = vld [vmem:[%s6374_s25 + $0x34] sm:$0xf]  ;;  %v4869_v41 = vld [vmem:[%s6374_s25 + $0x3c] sm:$0xf0] }
  0x90   : > { %1580 = vmatpush.bf16.msra.mxu1 %v4920_v19  ;;  %5521 = vmatpush.bf16.msra.mxu2 %v4920_v19  ;;  %v4868_v42 = vor.u32 %v5395_v39, %v4867_v36  ;;  %v4872_v43 = vor.u32 %v5394_v40, %v4869_v41  ;;  %v4855_v44 = vld [vmem:[%s6374_s25 + $0x18] sm:$0xf]  ;;  %v5392_v45 = vld [vmem:[%s6374_s25 + $0x20] sm:$0xf0]  ;;  %v5391_v46 = vld [vmem:[%s6374_s25 + $0x1c] sm:$0xf] }
  0x91   : > { %v4857_v47 = vld [vmem:[%s6374_s25 + $0x24] sm:$0xf0]  ;;  %v4856_v48 = vor.u32 %v5392_v45, %v4855_v44  ;;  %v4843_v50 = vld [vmem:[%s6374_s25] sm:$0xf]  ;;  %v5389_v51 = vld [vmem:[%s6374_s25 + $0x8] sm:$0xf0] }
  0x92   : > { %v4860_v49 = vor.u32 %v5391_v46, %v4857_v47  ;;  %v5388_v52 = vld [vmem:[%s6374_s25 + $0x4] sm:$0xf]  ;;  %v4845_v53 = vld [vmem:[%s6374_s25 + $0xc] sm:$0xf0]  ;;  %v4844_v54 = vor.u32 %v5389_v51, %v4843_v50  ;;  %v1374_v58 = vld [vmem:[#allocation2 + $0x8] sm:$0xff]  ;;  %s7550_s16 = sld [smem:[#allocation32_spill]] }
  0x93   : > { %1552 = vmatpush.bf16.msra.mxu0 %v4904_v24  ;;  %v1370_v55 = vld [vmem:[#allocation2 + $0x30] sm:$0xff]  ;;  %v1371_v56 = vld [vmem:[#allocation2] sm:$0xff]  ;;  %v4848_v57 = vor.u32 %v5388_v52, %v4845_v53  ;;  %v6534_v62 = vld [vmem:[#allocation2 + $0x18] sm:$0xff]  ;;  %vm1773_vm2 = vcmask 130048   ;;  %s7551_s15 = sld [smem:[#allocation37_spill]]  ;;  %p5377_p1 = scmp.ne.s32.totalorder %s6066_s28, 1 }
  0x94   : > { %1581 = vmatpush.bf16.msra.mxu1 %v4908_v25  ;;  %5522 = vmatpush.bf16.msra.mxu2 %v4908_v25  ;;  %v1375_v59 = vld [vmem:[#allocation2 + $0x20] sm:$0xff]  ;;  %v6527_v60 = vpack.c.bf16 %v1371_v56, %v1370_v55  ;;  %v6536_v63 = vld [vmem:[#allocation2 + $0x10] sm:$0xff]  ;;  %v1376_v0 = vld [vmem:[#allocation2 + $0x28] sm:$0xff]  ;;  %s7553_s3 = sld [smem:[#allocation31_spill]] }
  0x95   : > { %v6529_v61 = vpack.c.bf16 %v1375_v59, %v1374_v58  ;;  %v1377_v1 = vld [vmem:[#allocation2 + $0x38] sm:$0xff]  ;;  %v6540_v2 = vpack.c.bf16 %v6536_v63, %v6534_v62  ;;  %v6550_v4 = vld [vmem:[%s6423_s1] sm:$0x7]  ;;  %s7554_s0 = sld [smem:[#allocation44_spill]] }
  0x96   : > { %v6542_v3 = vpack.c.bf16 %v1377_v1, %v1376_v0  ;;  %v1417_v7 = vperm.slane %v6550_v4, 1  ;;  %v6554_v9 = vperm.slane %v6550_v4, 0  ;;  %s7561_s5 = sld [smem:[#allocation33_spill]] }
  0x97   : > { %1553 = vmatpush.bf16.msra.mxu0 %v4892_v31  ;;  %s7563_s12 = sld [smem:[#allocation28_spill]] }
  0x98   : > { %1582 = vmatpush.bf16.msra.mxu1 %v4896_v35  ;;  %5523 = vmatpush.bf16.msra.mxu2 %v4896_v35  ;;  %s7564_s10 = sld [smem:[#allocation43_spill]] }
  0x99   : > { %s7552_s24 = scalar_lea.vmem %s7551_s15, %s6408_s8 }
  0x9b   : > { %1554 = vmatpush.bf16.msra.mxu0 %v4880_v37  ;;  %s7555_s20 = scalar_lea.vmem %s7554_s0, %s6408_s8 }
  0x9c   : > { %1583 = vmatpush.bf16.msra.mxu1 %v4884_v38  ;;  %5524 = vmatpush.bf16.msra.mxu2 %v4884_v38 }
  0x9e   : > { %s7565_s14 = scalar_lea.vmem %s7564_s10, %s6408_s8 }
  0x9f   : > { %1555 = vmatpush.bf16.msra.mxu0 %v4868_v42 }
  0xa0   : > { %1584 = vmatpush.bf16.msra.mxu1 %v4872_v43  ;;  %5525 = vmatpush.bf16.msra.mxu2 %v4872_v43 }
  0xa3   : > { %1556 = vmatpush.bf16.msra.mxu0 %v4856_v48 }
  0xa4   : > { %1585 = vmatpush.bf16.msra.mxu1 %v4860_v49  ;;  %5526 = vmatpush.bf16.msra.mxu2 %v4860_v49 }
  0xa7   : > { %1557 = vmatpush.bf16.msra.mxu0 %v4844_v54 }
  0xa8   : > { %1586 = vmatpush.bf16.msra.mxu1 %v4848_v57  ;;  %5527 = vmatpush.bf16.msra.mxu2 %v4848_v57 }
  0xaa   : > { %1558 = vmatmul.bf16.vlgmr.msra.gmra.mxu0 %v6527_v60 }
  0xab   : > { %1587 = vmatmul.bf16.vlgmr.msra.gmra.mxu1 %v6527_v60  ;;  %1597 = vmatmul.bf16.vlgmr.msra.gmra.mxu2 %v6529_v61 }
  0xba   : > { %1563 = vmatmul.bf16.gmra.mxu0 %v6540_v2 }
  0xbb   : > { %1592 = vmatmul.bf16.gmra.mxu1 %v6540_v2  ;;  %1602 = vmatmul.bf16.gmra.mxu2 %v6542_v3 }
  0xca   : > { %1568 = vmatmul.bf16.gmra.mxu0 %v6529_v61 }
  0xda   : > { %1573 = vmatmul.bf16.gmra.mxu0 %v6542_v3 }
 0x127   : > { %v1559_v5 = vpop.f32.mrf.mxu0 }
 0x128   : > { %v1588_v6 = vpop.f32.mrf.mxu1  ;;  %v1560_v15 = vadd.f32 %v1559_v5, %v6554_v9 }
 0x129   : > { %v1589_v8 = vadd.f32 %v1588_v6, %v1417_v7 }
 0x12a   : > { %v1637_v20 = vpack.c.bf16 %v1560_v15, %v1560_v15 }
 0x12b   : > { %v1645_v13 = vpack.c.bf16 %v1589_v8, %v1589_v8 }
 0x12c   : > { %v1655_v26 = vunpack.c.l.b16 %v1637_v20 }
 0x12d   : > { %v1661_v18 = vunpack.c.l.b16 %v1645_v13 }
 0x12e   : > { %v1598_v10 = vpop.f32.mrf.mxu2 }
 0x12f   : > { %v1561_v11 = vpop.f32.mrf.mxu0  ;;  %v1599_v28 = vadd.f32 %v1598_v10, %v1417_v7 }
 0x130   : > { %v1590_v12 = vpop.f32.mrf.mxu1  ;;  %v1562_v16 = vadd.f32 %v1561_v11, %v6554_v9 }
 0x131   : > { %v1591_v14 = vadd.f32 %v1590_v12, %v1417_v7  ;;  %v1649_v32 = vpack.c.bf16 %v1599_v28, %v1599_v28 }
 0x132   : > { %v1638_v21 = vpack.c.bf16 %v1562_v16, %v1562_v16 }
 0x133   : > { %v1646_v17 = vpack.c.bf16 %v1591_v14, %v1591_v14  ;;  %v1713_v42 = vunpack.c.l.b16 %v1649_v32 }
 0x134   : > { %v1656_v27 = vunpack.c.l.b16 %v1638_v21 }
 0x135   : > { %v1662_v19 = vunpack.c.l.b16 %v1646_v17 }
 0x136   : > { %v1600_v22 = vpop.f32.mrf.mxu2  ;;  %v1657_v31 = vpack.c.b16 %v1656_v27, %v1655_v26  ;;  %v5636_v26 = vld [vmem:[%s7550_s16] ss:$0 sm:$0xff]  ;;  %v6084_v27 = vmov 0.0  }
 0x137   : > { %v1663_v23 = vpack.c.b16 %v1662_v19, %v1661_v18  ;;  %v1564_v24 = vpop.f32.mrf.mxu0  ;;  %v1601_v29 = vadd.f32 %v1600_v22, %v1417_v7 }
 0x138   : > { %v1593_v25 = vpop.f32.mrf.mxu1  ;;  %v1565_v37 = vadd.f32 %v1564_v24, %v6554_v9 }
 0x139   : > { %1672 = vmatpush.bf16.xpose.msra.mxu3 %v1663_v23  ;;  %v1594_v30 = vadd.f32 %v1593_v25, %v1417_v7  ;;  %v1650_v33 = vpack.c.bf16 %v1601_v29, %v1601_v29  ;;  %v1307_v23 = vlaneseq }
 0x13a   : > { %v1639_v46 = vpack.c.bf16 %v1565_v37, %v1565_v37 }
 0x13b   : > { %v1647_v35 = vpack.c.bf16 %v1594_v30, %v1594_v30  ;;  %v1714_v43 = vunpack.c.l.b16 %v1650_v33  ;;  %v1308_v24 = vshrl.u32 %v1307_v23, 7  ;;  %v1311_v25 = vand.u32 127, %v1307_v23  ;;  %v5399_v23 = vld [vmem:[%s6374_s25 + $0x58] sm:$0xf0] }
 0x13c   : > { %v1681_v55 = vunpack.c.l.b16 %v1639_v46 }
 0x13d   : > { %v1687_v44 = vunpack.c.l.b16 %v1647_v35  ;;  %v1715_v50 = vpack.c.b16 %v1714_v43, %v1713_v42  ;;  %vm1312_vm0 = vcmp.le.s32.totalorder %v1311_v25, %v1308_v24  ;;  %v1309_v29 = vadd.s32 8, %v1308_v24 }
 0x13e   : > { %v1603_v34 = vpop.f32.mrf.mxu2  ;;  %v6567_v28 = vsel %vm1312_vm0, 1.0, %v6084_v27 }
 0x13f   : > { %v1566_v36 = vpop.f32.mrf.mxu0  ;;  %v1604_v41 = vadd.f32 %v1603_v34, %v1417_v7  ;;  %vm1313_vm1 = vcmp.le.s32.totalorder %v1311_v25, %v1309_v29 }
 0x140   : > { %v1595_v38 = vpop.f32.mrf.mxu1  ;;  %1673 = vmatmul.bf16.vlgmr.msra.gmra.mxu3 %v1657_v31  ;;  %v1567_v39 = vadd.f32 %v1566_v36, %v6554_v9  ;;  %v6570_v31 = vsel %vm1313_vm1, 1.0, %v6084_v27 }
 0x141   : > { %v1596_v40 = vadd.f32 %v1595_v38, %v1417_v7  ;;  %v1651_v49 = vpack.c.bf16 %v1604_v41, %v1604_v41  ;;  %v1335_v33 = vmul.f32 %v5636_v26, %v6570_v31  ;;  %v5637_v38 = vld [vmem:[%s7550_s16 + $0x1] ss:$0 sm:$0xff] }
 0x142   : > { %v1640_v47 = vpack.c.bf16 %v1567_v39, %v1567_v39  ;;  %v1336_v41 = vmul.f32 %v5637_v38, %v6567_v28 }
 0x143   : > { %v1648_v45 = vpack.c.bf16 %v1596_v40, %v1596_v40  ;;  %v1739_v57 = vunpack.c.l.b16 %v1651_v49  ;;  %v4830_v37 = vadd.f32 -1.0, %v1335_v33 }
 0x144   : > { %v1682_v56 = vunpack.c.l.b16 %v1640_v47 }
 0x145   : > { %v1688_v48 = vunpack.c.l.b16 %v1648_v45  ;;  %v1351_v40 = vmul.f32 10000.0, %v4830_v37  ;;  %v4831_v45 = vadd.f32 -1.0, %v1336_v41 }
 0x146   : > { %v1605_v51 = vpop.f32.mrf.mxu2  ;;  %v1683_v0 = vpack.c.b16 %v1682_v56, %v1681_v55  ;;  %v4935_v55 = vld [vmem:[%s6374_s25 + $0xb0] sm:$0xf]  ;;  %v5411_v56 = vld [vmem:[%s6374_s25 + $0xb8] sm:$0xf0] }
 0x147   : > { %v1689_v52 = vpack.c.b16 %v1688_v48, %v1687_v44  ;;  %v1569_v53 = vpop.f32.mrf.mxu0  ;;  %v1606_v54 = vadd.f32 %v1605_v51, %v1417_v7  ;;  %v1352_v47 = vmul.f32 10000.0, %v4831_v45  ;;  %v1337_v48 = vmul.f32 %v5637_v38, %v6570_v31  ;;  %v4863_v38 = vld [vmem:[%s6374_s25 + $0x20] sm:$0xf]  ;;  %v4851_v45 = vld [vmem:[%s6374_s25 + $0x8] sm:$0xf] }
 0x148   : > { %v1570_v6 = vadd.f32 %v1569_v53, %v6554_v9  ;;  %v5638_v53 = vld [vmem:[%s7550_s16 + $0x2] ss:$0 sm:$0xff] }
 0x149   : > { %1698 = vmatpush.bf16.xpose.msrb.mxu3 %v1689_v52  ;;  %v1652_v58 = vpack.c.bf16 %v1606_v54, %v1606_v54  ;;  %v4832_v52 = vadd.f32 -1.0, %v1337_v48 }
 0x14a   : > { %v1641_v10 = vpack.c.bf16 %v1570_v6, %v1570_v6 }
 0x14b   : > { %v1740_v59 = vunpack.c.l.b16 %v1652_v58  ;;  %v1353_v58 = vmul.f32 10000.0, %v4832_v52 }
 0x14c   : > { %v1707_v7 = vunpack.c.l.b16 %v1641_v10  ;;  %v4911_v10 = vld [vmem:[%s6374_s25 + $0x80] sm:$0xf] }
 0x14d   : > { %v1741_v1 = vpack.c.b16 %v1740_v59, %v1739_v57  ;;  %v4923_v57 = vld [vmem:[%s6374_s25 + $0x98] sm:$0xf]  ;;  %v1338_v59 = vmul.f32 %v5638_v53, %v6567_v28 }
 0x14f   : > { %v1571_v5 = vpop.f32.mrf.mxu0 }
 0x150   : > { %1699 = vmatmul.bf16.vlgmr.msrb.gmra.mxu3 %v1683_v0  ;;  %v1572_v8 = vadd.f32 %v1571_v5, %v6554_v9  ;;  %v4936_v0 = vor.u32 %v5411_v56, %v4935_v55 }
 0x151   : > { %1724 = vmatpush.bf16.xpose.msra.mxu3 %v1715_v50 }
 0x152   : > { %v1642_v11 = vpack.c.bf16 %v1572_v8, %v1572_v8  ;;  %1608 = vmatpush.bf16.msrb.mxu2 %v4936_v0 }
 0x154   : > { %v1708_v13 = vunpack.c.l.b16 %v1642_v11  ;;  %v5405_v11 = vld [vmem:[%s6374_s25 + $0x88] sm:$0xf0] }
 0x156   : > { %v1709_v14 = vpack.c.b16 %v1708_v13, %v1707_v7  ;;  %v4833_v7 = vadd.f32 -1.0, %v1338_v59 }
 0x157   : > { %v1574_v12 = vpop.f32.mrf.mxu0 }
 0x158   : > { %v1575_v16 = vadd.f32 %v1574_v12, %v6554_v9 }
 0x159   : > { %1750 = vmatpush.bf16.xpose.msrb.mxu3 %v1741_v1  ;;  %v5408_v1 = vld [vmem:[%s6374_s25 + $0xa0] sm:$0xf0] }
 0x15a   : > { %v1643_v18 = vpack.c.bf16 %v1575_v16, %v1575_v16  ;;  %v4924_v8 = vor.u32 %v5408_v1, %v4923_v57  ;;  %v5402_v16 = vld [vmem:[%s6374_s25 + $0x70] sm:$0xf0] }
 0x15c   : > { %v1733_v20 = vunpack.c.l.b16 %v1643_v18  ;;  %1609 = vmatpush.bf16.msrb.mxu2 %v4924_v8  ;;  %v1339_v18 = vmul.f32 %v5638_v53, %v6570_v31 }
 0x15e   : > { %v4834_v25 = vadd.f32 -1.0, %v1339_v18 }
 0x15f   : > { %v1576_v15 = vpop.f32.mrf.mxu0 }
 0x160   : > { %1725 = vmatmul.bf16.vlgmr.msra.gmra.mxu3 %v1709_v14  ;;  %v1577_v17 = vadd.f32 %v1576_v15, %v6554_v9  ;;  %v1334_v9 = vmul.f32 %v5636_v26, %v6567_v28  ;;  %v4912_v14 = vor.u32 %v5405_v11, %v4911_v10  ;;  %v4899_v15 = vld [vmem:[%s6374_s25 + $0x68] sm:$0xf]  ;;  %v5639_v26 = vld [vmem:[%s7550_s16 + $0x3] ss:$0 sm:$0xff] }
 0x161   : > { %v1340_v33 = vmul.f32 %v5639_v26, %v6567_v28  ;;  %v1341_v56 = vmul.f32 %v5639_v26, %v6570_v31 }
 0x162   : > { %v1644_v19 = vpack.c.bf16 %v1577_v17, %v1577_v17  ;;  %v4829_v30 = vadd.f32 -1.0, %v1334_v9  ;;  %v1354_v17 = vmul.f32 10000.0, %v4833_v7  ;;  %1610 = vmatpush.bf16.msrb.mxu2 %v4912_v14  ;;  %v4875_v9 = vld [vmem:[%s6374_s25 + $0x38] sm:$0xf] }
 0x163   : > { %v4835_v41 = vadd.f32 -1.0, %v1340_v33  ;;  %v6672_v33 = vperm.slane %v6550_v4, 2 }
 0x164   : > { %v1734_v21 = vunpack.c.l.b16 %v1644_v19  ;;  %v1350_v32 = vmul.f32 10000.0, %v4829_v30  ;;  %v5396_v30 = vld [vmem:[%s6374_s25 + $0x40] sm:$0xf0] }
 0x165   : > { %v4876_v37 = vor.u32 %v5396_v30, %v4875_v9 }
 0x166   : > { %v1735_v22 = vpack.c.b16 %v1734_v21, %v1733_v20  ;;  %v4900_v21 = vor.u32 %v5402_v16, %v4899_v15 }
 0x168   : > { %1611 = vmatpush.bf16.msrb.mxu2 %v4900_v21 }
 0x170   : > { %1751 = vmatmul.bf16.vlgmr.msrb.gmra.mxu3 %v1735_v22  ;;  %v4887_v22 = vld [vmem:[%s6374_s25 + $0x50] sm:$0xf] }
 0x171   : > { %v4888_v29 = vor.u32 %v5399_v23, %v4887_v22 }
 0x173   : > { %1612 = vmatpush.bf16.msrb.mxu2 %v4888_v29 }
 0x177   : > { %1613 = vmatpush.bf16.msrb.mxu2 %v4876_v37 }
 0x1c3   : > { %v1674_v34 = vpop.f32.mrf.mxu3 }
 0x1c4   : > { %v1757_v35 = vmul.f32 0.088388346, %v1674_v34 }
 0x1c6   : > { %v6573_v36 = vadd.f32 %v1757_v35, %v1350_v32  ;;  %v1355_v32 = vmul.f32 10000.0, %v4834_v25 }
 0x1c8   : > { %v1774_v39 = vsel %vm1773_vm2, %v6573_v36, -inf }
 0x1c9   : > { %1775 = vmax.xlane.f32.xlu0 %v1774_v39  ;;  %v5393_v39 = vld [vmem:[%s6374_s25 + $0x28] sm:$0xf0] }
 0x1cb   : > { %v1676_v42 = vpop.f32.mrf.mxu3 }
 0x1cc   : > { %v1758_v43 = vmul.f32 0.088388346, %v1676_v42 }
 0x1ce   : > { %v6581_v44 = vadd.f32 %v1758_v43, %v1351_v40  ;;  %v4864_v43 = vor.u32 %v5393_v39, %v4863_v38 }
 0x1d0   : > { %v1777_v46 = vsel %vm1773_vm2, %v6581_v44, -inf  ;;  %1614 = vmatpush.bf16.msrb.mxu2 %v4864_v43 }
 0x1d1   : > { %1778 = vmax.xlane.f32.xlu0 %v1777_v46  ;;  %v5390_v46 = vld [vmem:[%s6374_s25 + $0x10] sm:$0xf0]  ;;  %s7566_s25 = sld [smem:[#allocation29_spill]] }
 0x1d3   : > { %v1700_v49 = vpop.f32.mrf.mxu3 }
 0x1d4   : > { %v1759_v50 = vmul.f32 0.088388346, %v1700_v49  ;;  %v4852_v49 = vor.u32 %v5390_v46, %v4851_v45 }
 0x1d6   : > { %v6586_v51 = vadd.f32 %v1759_v50, %v1352_v47  ;;  %v1356_v47 = vmul.f32 10000.0, %v4835_v41  ;;  %1615 = vmatpush.bf16.msrb.mxu2 %v4852_v49 }
 0x1d8   : > { %v1780_v54 = vsel %vm1773_vm2, %v6586_v51, -inf }
 0x1d9   : > { %1781 = vmax.xlane.f32.xlu1 %v1780_v54  ;;  %1616 = vmatmul.bf16.vlgmr.msrb.gmra.mxu2 %v6527_v60 }
 0x1db   : > { %v1702_v5 = vpop.f32.mrf.mxu3 }
 0x1dc   : > { %v1760_v6 = vmul.f32 0.088388346, %v1702_v5 }
 0x1de   : > { %v6600_v12 = vadd.f32 %v1760_v6, %v1353_v58  ;;  %v4836_v58 = vadd.f32 -1.0, %v1341_v56 }
 0x1e0   : > { %v1783_v13 = vsel %vm1773_vm2, %v6600_v12, -inf }
 0x1e1   : > { %1784 = vmax.xlane.f32.xlu1 %v1783_v13 }
 0x1e3   : > { %v1726_v19 = vpop.f32.mrf.mxu3 }
 0x1e4   : > { %v1761_v20 = vmul.f32 0.088388346, %v1726_v19 }
 0x1e6   : > { %v6609_v24 = vadd.f32 %v1761_v20, %v1354_v17 }
 0x1e8   : > { %v1786_v27 = vsel %vm1773_vm2, %v6609_v24, -inf }
 0x1e9   : > { %1787 = vmax.xlane.f32.xlu2 %v1786_v27  ;;  %1621 = vmatmul.bf16.gmra.mxu2 %v6540_v2 }
 0x1eb   : > { %v1728_v34 = vpop.f32.mrf.mxu3 }
 0x1ec   : > { %v1762_v35 = vmul.f32 0.088388346, %v1728_v34 }
 0x1ee   : > { %v6621_v40 = vadd.f32 %v1762_v35, %v1355_v32 }
 0x1f0   : > { %v1789_v42 = vsel %vm1773_vm2, %v6621_v40, -inf }
 0x1f1   : > { %1790 = vmax.xlane.f32.xlu2 %v1789_v42 }
 0x1f3   : > { %v1752_v48 = vpop.f32.mrf.mxu3 }
 0x1f4   : > { %v1763_v28 = vmul.f32 0.088388346, %v1752_v48 }
 0x1f6   : > { %v1771_v50 = vadd.f32 %v1763_v28, %v1356_v47 }
 0x1f8   : > { %v1792_v52 = vsel %vm1773_vm2, %v1771_v50, -inf }
 0x1f9   : > { %1793 = vmax.xlane.f32.xlu2 %v1792_v52  ;;  %1626 = vmatmul.bf16.gmra.mxu2 %v6529_v61 }
 0x1fb   : > { %v1754_v59 = vpop.f32.mrf.mxu3 }
 0x1fc   : > { %v1764_v2 = vmul.f32 0.088388346, %v1754_v59 }
 0x209   : > { %1631 = vmatmul.bf16.gmra.mxu2 %v6542_v3  ;;  %v1357_v3 = vmul.f32 10000.0, %v4836_v58 }
 0x20b   : > { %v6639_v5 = vadd.f32 %v1764_v2, %v1357_v3 }
 0x23c   : > { %v1776_v53 = vpop.xlane.xlu0 %1775 }
 0x23d   : > { %v1798_v54 = vsub.f32 %v6573_v36, %v1776_v53 }
 0x23f   : > { %v1806_v55 = vmul.f32 1.442695, %v1798_v54 }
 0x241   : > { %5650 = vpow2.f32 %v1806_v55 }
 0x244   : > { %v1779_v57 = vpop.xlane.xlu0 %1778 }
 0x245   : > { %v1799_v0 = vsub.f32 %v6581_v44, %v1779_v57  ;;  %v1795_v44 = vsel %vm1773_vm2, %v6639_v5, -inf }
 0x247   : > { %v6635_v1 = vpop.eup %5650  ;;  %v1808_v60 = vmul.f32 1.442695, %v1799_v0 }
 0x248   : > { %v1822_v61 = vsel %vm1773_vm2, %v6635_v1, 0.0 }
 0x249   : > { %5652 = vpow2.f32 %v1808_v60  ;;  %1823 = vadd.xlane.f32.xlu0 %v1822_v61 }
 0x24c   : > { %v1782_v36 = vpop.xlane.xlu1 %1781 }
 0x24d   : > { %v1800_v31 = vsub.f32 %v6586_v51, %v1782_v36 }
 0x24f   : > { %v6642_v6 = vpop.eup %5652  ;;  %v1810_v8 = vmul.f32 1.442695, %v1800_v31 }
 0x250   : > { %v1825_v10 = vsel %vm1773_vm2, %v6642_v6, 0.0 }
 0x251   : > { %5654 = vpow2.f32 %v1810_v8  ;;  %1796 = vmax.xlane.f32.xlu0 %v1795_v44  ;;  %1826 = vadd.xlane.f32.xlu1 %v1825_v10 }
 0x254   : > { %v1785_v11 = vpop.xlane.xlu1 %1784 }
 0x255   : > { %v1801_v7 = vsub.f32 %v6600_v12, %v1785_v11 }
 0x257   : > { %v6649_v13 = vpop.eup %5654  ;;  %v1812_v14 = vmul.f32 1.442695, %v1801_v7 }
 0x258   : > { %v1828_v51 = vsel %vm1773_vm2, %v6649_v13, 0.0 }
 0x259   : > { %5656 = vpow2.f32 %v1812_v14  ;;  %1829 = vadd.xlane.f32.xlu1 %v1828_v51 }
 0x25c   : > { %v1788_v15 = vpop.xlane.xlu2 %1787  ;;  %v1617_v32 = vpop.f32.mrf.mxu2 }
 0x25d   : > { %v1802_v16 = vsub.f32 %v6609_v24, %v1788_v15  ;;  %v1618_v34 = vadd.f32 %v1617_v32, %v6672_v33 }
 0x25f   : > { %v6654_v17 = vpop.eup %5656  ;;  %v1814_v18 = vmul.f32 1.442695, %v1802_v16  ;;  %v1974_v35 = vpack.c.bf16 %v1618_v34, %v1618_v34 }
 0x260   : > { %v1831_v19 = vsel %vm1773_vm2, %v6654_v17, 0.0 }
 0x261   : > { %5658 = vpow2.f32 %v1814_v18  ;;  %1832 = vadd.xlane.f32.xlu2 %v1831_v19  ;;  %v1989_v39 = vunpack.c.l.b16 %v1974_v35 }
 0x264   : > { %v1791_v12 = vpop.xlane.xlu2 %1790  ;;  %v1619_v37 = vpop.f32.mrf.mxu2 }
 0x265   : > { %v1803_v20 = vsub.f32 %v6621_v40, %v1791_v12  ;;  %v1620_v38 = vadd.f32 %v1619_v37, %v6672_v33 }
 0x267   : > { %v6659_v21 = vpop.eup %5658  ;;  %v1816_v22 = vmul.f32 1.442695, %v1803_v20  ;;  %v1975_v40 = vpack.c.bf16 %v1620_v38, %v1620_v38 }
 0x268   : > { %v1834_v23 = vsel %vm1773_vm2, %v6659_v21, 0.0 }
 0x269   : > { %5660 = vpow2.f32 %v1816_v22  ;;  %1835 = vadd.xlane.f32.xlu0 %v1834_v23  ;;  %v1990_v41 = vunpack.c.l.b16 %v1975_v40 }
 0x26b   : > { %v1991_v42 = vpack.c.b16 %v1990_v41, %v1989_v39 }
 0x26c   : > { %v1794_v24 = vpop.xlane.xlu2 %1793  ;;  %v1622_v43 = vpop.f32.mrf.mxu2 }
 0x26d   : > { %v1804_v25 = vsub.f32 %v1771_v50, %v1794_v24  ;;  %2003 = vmatpush.bf16.msra.mxu3 %v1991_v42  ;;  %v1623_v49 = vadd.f32 %v1622_v43, %v6672_v33 }
 0x26f   : > { %v6663_v26 = vpop.eup %5660  ;;  %v1818_v27 = vmul.f32 1.442695, %v1804_v25  ;;  %v1976_v54 = vpack.c.bf16 %v1623_v49, %v1623_v49 }
 0x270   : > { %v1837_v29 = vsel %vm1773_vm2, %v6663_v26, 0.0 }
 0x271   : > { %5662 = vpow2.f32 %v1818_v27  ;;  %1838 = vadd.xlane.f32.xlu1 %v1837_v29  ;;  %v2017_v58 = vunpack.c.l.b16 %v1976_v54 }
 0x274   : > { %v1624_v47 = vpop.f32.mrf.mxu2 }
 0x275   : > { %v1625_v50 = vadd.f32 %v1624_v47, %v6672_v33 }
 0x277   : > { %v6667_v9 = vpop.eup %5662  ;;  %v1977_v55 = vpack.c.bf16 %v1625_v50, %v1625_v50 }
 0x278   : > { %v1840_v30 = vsel %vm1773_vm2, %v6667_v9, 0.0 }
 0x279   : > { %1841 = vadd.xlane.f32.xlu2 %v1840_v30  ;;  %v2018_v59 = vunpack.c.l.b16 %v1977_v55 }
 0x27b   : > { %v2019_v61 = vpack.c.b16 %v2018_v59, %v2017_v58 }
 0x27c   : > { %v1627_v36 = vpop.f32.mrf.mxu2 }
 0x27d   : > { %2031 = vmatpush.bf16.msrb.mxu3 %v2019_v61  ;;  %v1628_v25 = vadd.f32 %v1627_v36, %v6672_v33 }
 0x284   : > { %v1629_v27 = vpop.f32.mrf.mxu2 }
 0x285   : > { %v1630_v35 = vadd.f32 %v1629_v27, %v6672_v33 }
 0x287   : > { %v1979_v41 = vpack.c.bf16 %v1630_v35, %v1630_v35 }
 0x2bc   : > { %v1824_v45 = vpop.xlane.xlu0 %1823 }
 0x2bd   : > { %5664 = vrcp.f32 %v1824_v45  ;;  %vm1851_vm4 = vweird.f32 %v1824_v45  ;;  %v1857_v0 = vand.u32 2147483648, %v1824_v45  ;;  %v1855_v2 = vand.u32 2147483647, %v1824_v45 }
 0x2bf   : > { %vm1856_vm6 = vcmp.eq.f32.partialorder %v1855_v2, 8.507059e+37 }
 0x2c3   : > { %v5665_v46 = vpop.eup %5664 }
 0x2c4   : > { %v1847_v48 = vmul.f32 %v5665_v46, %v1824_v45  ;;  %v1827_v28 = vpop.xlane.xlu1 %1826  ;;  %v1797_v4 = vpop.xlane.xlu0 %1796  ;;  %vm1852_vm3 = vweird.f32 %v5665_v46 }
 0x2c5   : > { %5666 = vrcp.f32 %v1827_v28  ;;  %v1805_v53 = vsub.f32 %v6639_v5, %v1797_v4  ;;  %vm1853_vm5 = vmor %vm1851_vm4, %vm1852_vm3  ;;  %v1858_v5 = vor.u32 1.1754944e-38, %v1857_v0  ;;  %v1871_v7 = vand.u32 2147483648, %v1827_v28  ;;  %v5419_v0 = vld [vmem:[%s6382_s11 + $0x38] sm:$0xff] }
 0x2c6   : > { %v1848_v52 = vsub.f32 1.0, %v1847_v48  ;;  %v1869_v15 = vand.u32 2147483647, %v1827_v28  ;;  %vm1865_vm8 = vweird.f32 %v1827_v28  ;;  %v2046_v48 = vunpack.c.l.b16 %v1979_v41  ;;  %2166 = vmatpush.bf16.msra.mxu2 %v5419_v0 }
 0x2c7   : > { %v1820_v57 = vmul.f32 1.442695, %v1805_v53  ;;  %v1872_v20 = vor.u32 1.1754944e-38, %v1871_v7 }
 0x2c8   : > { %v1849_v56 = vmul.f32 %v5665_v46, %v1848_v52  ;;  %vm1870_vm10 = vcmp.eq.f32.partialorder %v1869_v15, 8.507059e+37  ;;  %v5417_v15 = vld [vmem:[%s6382_s11 + $0x28] sm:$0xff] }
 0x2c9   : > { %5668 = vpow2.f32 %v1820_v57 }
 0x2ca   : > { %v1850_v60 = vadd.f32 %v5665_v46, %v1849_v56 }
 0x2cb   : > { %v5667_v3 = vpop.eup %5666 }
 0x2cc   : > { %v1854_v31 = vsel %vm1853_vm5, %v5665_v46, %v1850_v60  ;;  %v1861_v8 = vmul.f32 %v5667_v3, %v1827_v28  ;;  %v1830_v44 = vpop.xlane.xlu1 %1829  ;;  %vm1866_vm7 = vweird.f32 %v5667_v3  ;;  %v1632_v60 = vpop.f32.mrf.mxu2 }
 0x2cd   : > { %5670 = vrcp.f32 %v1830_v44  ;;  %v1859_v11 = vsel %vm1856_vm6, %v1858_v5, %v1854_v31  ;;  %vm1867_vm9 = vmor %vm1865_vm8, %vm1866_vm7  ;;  %vm1879_vm12 = vweird.f32 %v1830_v44  ;;  %v1883_v39 = vand.u32 2147483647, %v1830_v44 }
 0x2ce   : > { %v1862_v10 = vsub.f32 1.0, %v1861_v8  ;;  %v1958_v18 = vmul.f32 %v6635_v1, %v1859_v11  ;;  %v1978_v1 = vpack.c.bf16 %v1628_v25, %v1628_v25  ;;  %v1885_v40 = vand.u32 2147483648, %v1830_v44  ;;  %v5418_v8 = vld [vmem:[%s6382_s11 + $0x30] sm:$0xff] }
 0x2cf   : > { %v6679_v14 = vpop.eup %5668  ;;  %vm1884_vm14 = vcmp.eq.f32.partialorder %v1883_v39, 8.507059e+37  ;;  %v1633_v11 = vadd.f32 %v1632_v60, %v6672_v33  ;;  %2167 = vmatpush.bf16.msra.mxu2 %v5418_v8 }
 0x2d0   : > { %v1863_v51 = vmul.f32 %v5667_v3, %v1862_v10  ;;  %v1843_v16 = vsel %vm1773_vm2, %v6679_v14, 0.0  ;;  %v1966_v30 = vpack.c.bf16 %v1958_v18, %v1958_v18  ;;  %v2045_v46 = vunpack.c.l.b16 %v1978_v1 }
 0x2d1   : > { %1844 = vadd.xlane.f32.xlu0 %v1843_v16  ;;  %v1886_v50 = vor.u32 1.1754944e-38, %v1885_v40 }
 0x2d2   : > { %v1864_v19 = vadd.f32 %v5667_v3, %v1863_v51  ;;  %v1984_v42 = vunpack.c.l.b16 %v1966_v30  ;;  %v2047_v53 = vpack.c.b16 %v2046_v48, %v2045_v46 }
 0x2d3   : > { %v5671_v12 = vpop.eup %5670  ;;  %2168 = vmatpush.bf16.msra.mxu2 %v5417_v15 }
 0x2d4   : > { %v1868_v22 = vsel %vm1867_vm9, %v5667_v3, %v1864_v19  ;;  %v1875_v23 = vmul.f32 %v5671_v12, %v1830_v44  ;;  %v1833_v24 = vpop.xlane.xlu2 %1832  ;;  %vm1880_vm11 = vweird.f32 %v5671_v12  ;;  %2059 = vmatpush.bf16.msrb.mxu0 %v2047_v53  ;;  %v5415_v53 = vld [vmem:[%s6382_s11 + $0x18] sm:$0xff] }
 0x2d5   : > { %v1873_v29 = vsel %vm1870_vm10, %v1872_v20, %v1868_v22  ;;  %5672 = vrcp.f32 %v1833_v24  ;;  %vm1881_vm13 = vmor %vm1879_vm12, %vm1880_vm11  ;;  %v1899_v55 = vand.u32 2147483648, %v1833_v24  ;;  %v1897_v57 = vand.u32 2147483647, %v1833_v24 }
 0x2d6   : > { %v1959_v32 = vmul.f32 %v6642_v6, %v1873_v29  ;;  %v1876_v34 = vsub.f32 1.0, %v1875_v23  ;;  %vm1893_vm0 = vweird.f32 %v1833_v24  ;;  %v1980_v22 = vpack.c.bf16 %v1633_v11, %v1633_v11  ;;  %v1634_v23 = vpop.f32.mrf.mxu2 }
 0x2d7   : > { %v1900_v61 = vor.u32 1.1754944e-38, %v1899_v55  ;;  %vm1898_vm3 = vcmp.eq.f32.partialorder %v1897_v57, 8.507059e+37  ;;  %v5414_v55 = vld [vmem:[%s6382_s11 + $0x10] sm:$0xff] }
 0x2d8   : > { %v1967_v37 = vpack.c.bf16 %v1959_v32, %v1959_v32  ;;  %v1877_v38 = vmul.f32 %v5671_v12, %v1876_v34  ;;  %v2073_v34 = vunpack.c.l.b16 %v1980_v22 }
 0x2da   : > { %v1985_v43 = vunpack.c.l.b16 %v1967_v37  ;;  %v1878_v45 = vadd.f32 %v5671_v12, %v1877_v38 }
 0x2db   : > { %v5673_v47 = vpop.eup %5672 }
 0x2dc   : > { %v1882_v28 = vsel %vm1881_vm13, %v5671_v12, %v1878_v45  ;;  %v1889_v6 = vmul.f32 %v5673_v47, %v1833_v24  ;;  %v1836_v4 = vpop.xlane.xlu0 %1835  ;;  %v1986_v49 = vpack.c.b16 %v1985_v43, %v1984_v42  ;;  %vm1894_vm15 = vweird.f32 %v5673_v47 }
 0x2dd   : > { %5674 = vrcp.f32 %v1836_v4  ;;  %v1887_v54 = vsel %vm1884_vm14, %v1886_v50, %v1882_v28  ;;  %vm1895_vm1 = vmor %vm1893_vm0, %vm1894_vm15  ;;  %vm1907_vm5 = vweird.f32 %v1836_v4  ;;  %v1911_v16 = vand.u32 2147483647, %v1836_v4  ;;  %v5416_v50 = vld [vmem:[%s6382_s11 + $0x20] sm:$0xff] }
 0x2de   : > { %v1890_v52 = vsub.f32 1.0, %v1889_v6  ;;  %4937 = vmatmul.msk.bf16.vlgmr.msra.gmra.mxu3 %vm1773_vm2, %v1986_v49  ;;  %v1960_v58 = vmul.f32 %v6649_v13, %v1887_v54  ;;  %v1913_v18 = vand.u32 2147483648, %v1836_v4  ;;  %2169 = vmatpush.bf16.msra.mxu2 %v5416_v50  ;;  %v5766_v50 = vld [vmem:[#allocation2 + $0x8] sm:$0xff] }
 0x2df   : > { %vm1912_vm7 = vcmp.eq.f32.partialorder %v1911_v16, 8.507059e+37 }
 0x2e0   : > { %v1891_v56 = vmul.f32 %v5673_v47, %v1890_v52  ;;  %v1968_v5 = vpack.c.bf16 %v1960_v58, %v1960_v58  ;;  %v1914_v30 = vor.u32 1.1754944e-38, %v1913_v18 }
 0x2e2   : > { %v1892_v59 = vadd.f32 %v5673_v47, %v1891_v56  ;;  %v2012_v19 = vunpack.c.l.b16 %v1968_v5  ;;  %2170 = vmatpush.bf16.msra.mxu2 %v5415_v53 }
 0x2e3   : > { %v5675_v2 = vpop.eup %5674 }
 0x2e4   : > { %v1896_v3 = vsel %vm1895_vm1, %v5673_v47, %v1892_v59  ;;  %v1903_v36 = vmul.f32 %v5675_v2, %v1836_v4  ;;  %v1839_v31 = vpop.xlane.xlu1 %1838  ;;  %vm1908_vm4 = vweird.f32 %v5675_v2  ;;  %v5412_v59 = vld [vmem:[%s6382_s11] sm:$0xff] }
 0x2e5   : > { %v1901_v44 = vsel %vm1898_vm3, %v1900_v61, %v1896_v3  ;;  %5676 = vrcp.f32 %v1839_v31  ;;  %vm1909_vm6 = vmor %vm1907_vm5, %vm1908_vm4  ;;  %v1927_v37 = vand.u32 2147483648, %v1839_v31  ;;  %v1925_v39 = vand.u32 2147483647, %v1839_v31 }
 0x2e6   : > { %v1961_v10 = vmul.f32 %v6654_v17, %v1901_v44  ;;  %v1904_v13 = vsub.f32 1.0, %v1903_v36  ;;  %v1635_v17 = vadd.f32 %v1634_v23, %v6672_v33  ;;  %vm1921_vm9 = vweird.f32 %v1839_v31  ;;  %2171 = vmatpush.bf16.msra.mxu2 %v5414_v55  ;;  %v5767_v55 = vld [vmem:[#allocation2 + $0x20] sm:$0xff] }
 0x2e7   : > { %v1928_v43 = vor.u32 1.1754944e-38, %v1927_v37  ;;  %vm1926_vm11 = vcmp.eq.f32.partialorder %v1925_v39, 8.507059e+37  ;;  %v5640_v37 = vld [vmem:[%s7552_s24] ss:$0 sm:$0xff] }
 0x2e8   : > { %v1969_v7 = vpack.c.bf16 %v1961_v10, %v1961_v10  ;;  %v1905_v51 = vmul.f32 %v5675_v2, %v1904_v13  ;;  %v1981_v1 = vpack.c.bf16 %v1635_v17, %v1635_v17 }
 0x2ea   : > { %v2013_v12 = vunpack.c.l.b16 %v1969_v7  ;;  %v1906_v20 = vadd.f32 %v5675_v2, %v1905_v51  ;;  %v2074_v40 = vunpack.c.l.b16 %v1981_v1 }
 0x2eb   : > { %v5677_v24 = vpop.eup %5676 }
 0x2ec   : > { %v1910_v25 = vsel %vm1909_vm6, %v5675_v2, %v1906_v20  ;;  %v1917_v27 = vmul.f32 %v5677_v24, %v1839_v31  ;;  %v2014_v29 = vpack.c.b16 %v2013_v12, %v2012_v19  ;;  %vm1922_vm8 = vweird.f32 %v5677_v24 }
 0x2ed   : > { %v1915_v35 = vsel %vm1912_vm7, %v1914_v30, %v1910_v25  ;;  %v2075_v42 = vpack.c.b16 %v2074_v40, %v2073_v34  ;;  %vm1923_vm10 = vmor %vm1921_vm9, %vm1922_vm8  ;;  %v5764_v40 = vld [vmem:[#allocation2 + $0x30] sm:$0xff] }
 0x2ee   : > { %v1918_v32 = vsub.f32 1.0, %v1917_v27  ;;  %4938 = vmatmul.msk.bf16.vlgmr.msrb.gmra.mxu3 %vm1773_vm2, %v2014_v29  ;;  %v1962_v33 = vmul.f32 %v6659_v21, %v1915_v35  ;;  %v1842_v21 = vpop.xlane.xlu2 %1841 }
 0x2ef   : > { %2087 = vmatpush.bf16.msra.mxu3 %v2075_v42  ;;  %5678 = vrcp.f32 %v1842_v21  ;;  %v1941_v60 = vand.u32 2147483648, %v1842_v21  ;;  %vm1935_vm13 = vweird.f32 %v1842_v21  ;;  %v1939_v2 = vand.u32 2147483647, %v1842_v21 }
 0x2f0   : > { %v1919_v38 = vmul.f32 %v5677_v24, %v1918_v32  ;;  %v1970_v48 = vpack.c.bf16 %v1962_v33, %v1962_v33 }
 0x2f1   : > { %v1942_v31 = vor.u32 1.1754944e-38, %v1941_v60  ;;  %vm1940_vm15 = vcmp.eq.f32.partialorder %v1939_v2, 8.507059e+37 }
 0x2f2   : > { %v1920_v41 = vadd.f32 %v5677_v24, %v1919_v38  ;;  %v2040_v6 = vunpack.c.l.b16 %v1970_v48 }
 0x2f4   : > { %v1924_v45 = vsel %vm1923_vm10, %v5677_v24, %v1920_v41 }
 0x2f5   : > { %v1929_v46 = vsel %vm1926_vm11, %v1928_v43, %v1924_v45  ;;  %v5679_v52 = vpop.eup %5678  ;;  %v5765_v43 = vld [vmem:[#allocation2] sm:$0xff] }
 0x2f6   : > { %v1963_v47 = vmul.f32 %v6663_v26, %v1929_v46  ;;  %v1931_v54 = vmul.f32 %v5679_v52, %v1842_v21  ;;  %v5413_v26 = vld [vmem:[%s6382_s11 + $0x8] sm:$0xff]  ;;  %vm1936_vm12 = vweird.f32 %v5679_v52  ;;  %s7559_s11 = sld [smem:[#allocation39_spill]] }
 0x2f7   : > { %2172 = vmatpush.bf16.msra.mxu2 %v5413_v26  ;;  %vm1937_vm14 = vmor %vm1935_vm13, %vm1936_vm12 }
 0x2f8   : > { %v1971_v28 = vpack.c.bf16 %v1963_v47, %v1963_v47  ;;  %v1932_v56 = vsub.f32 1.0, %v1931_v54 }
 0x2fa   : > { %v2041_v4 = vunpack.c.l.b16 %v1971_v28  ;;  %v1933_v57 = vmul.f32 %v5679_v52, %v1932_v56 }
 0x2fb   : > { %2173 = vmatpush.bf16.msra.mxu2 %v5412_v59 }
 0x2fc   : > { %v2042_v49 = vpack.c.b16 %v2041_v4, %v2040_v6  ;;  %v1934_v0 = vadd.f32 %v5679_v52, %v1933_v57  ;;  %s7560_s15 = scalar_lea.vmem %s7559_s11, %s6408_s8  ;;  %s7567_s11 = sld [smem:[#allocation46_spill]] }
 0x2fe   : > { %4939 = vmatmul.msk.bf16.vlgmr.msrb.gmra.mxu0 %vm1773_vm2, %v2042_v49  ;;  %v1938_v3 = vsel %vm1937_vm14, %v5679_v52, %v1934_v0 }
 0x2ff   : > { %v1943_v44 = vsel %vm1940_vm15, %v1942_v31, %v1938_v3 }
 0x300   : > { %v1964_v11 = vmul.f32 %v6667_v9, %v1943_v44 }
 0x302   : > { %v1972_v18 = vpack.c.bf16 %v1964_v11, %v1964_v11 }
 0x304   : > { %v2068_v20 = vunpack.c.l.b16 %v1972_v18 }
 0x344   : > { %v1845_v58 = vpop.xlane.xlu0 %1844 }
 0x345   : > { %5680 = vrcp.f32 %v1845_v58  ;;  %v1955_v5 = vand.u32 2147483648, %v1845_v58  ;;  %v1953_v13 = vand.u32 2147483647, %v1845_v58  ;;  %vm1949_vm1 = vweird.f32 %v1845_v58 }
 0x347   : > { %v1956_v51 = vor.u32 1.1754944e-38, %v1955_v5  ;;  %vm1954_vm4 = vcmp.eq.f32.partialorder %v1953_v13, 8.507059e+37 }
 0x34b   : > { %v5681_v61 = vpop.eup %5680 }
 0x34c   : > { %v1945_v36 = vmul.f32 %v5681_v61, %v1845_v58  ;;  %vm1950_vm0 = vweird.f32 %v5681_v61 }
 0x34d   : > { %vm1951_vm3 = vmor %vm1949_vm1, %vm1950_vm0 }
 0x34e   : > { %v1946_v8 = vsub.f32 1.0, %v1945_v36 }
 0x350   : > { %v1947_v10 = vmul.f32 %v5681_v61, %v1946_v8 }
 0x352   : > { %v1948_v7 = vadd.f32 %v5681_v61, %v1947_v10  ;;  %v5768_v10 = vld [vmem:[#allocation2 + $0x28] sm:$0xff] }
 0x354   : > { %v1952_v15 = vsel %vm1951_vm3, %v5681_v61, %v1948_v7  ;;  %v5079_v7 = vld [vmem:[%s6391_s21 + $0x70] sm:$0xf] }
 0x355   : > { %v1957_v16 = vsel %vm1954_vm4, %v1956_v51, %v1952_v15  ;;  %v5447_v51 = vld [vmem:[%s6391_s21 + $0x74] sm:$0xf0]  ;;  %v5071_v15 = vld [vmem:[%s6391_s21 + $0x60] sm:$0xf] }
 0x356   : > { %v1965_v19 = vmul.f32 %v6679_v14, %v1957_v16  ;;  %v5080_v18 = vor.u32 %v5447_v51, %v5079_v7 }
 0x358   : > { %v1973_v12 = vpack.c.bf16 %v1965_v19, %v1965_v19  ;;  %v5445_v19 = vld [vmem:[%s6391_s21 + $0x64] sm:$0xf0]  ;;  %2629 = vmatpush.bf16.msra.mxu0 %v5080_v18 }
 0x35a   : > { %v2069_v22 = vunpack.c.l.b16 %v1973_v12 }
 0x35c   : > { %v2070_v23 = vpack.c.b16 %v2069_v22, %v2068_v20 }
 0x35e   : > { %4940 = vmatmul.msk.bf16.vlgmr.msra.gmra.mxu3 %vm1773_vm2, %v2070_v23  ;;  %v5072_v23 = vor.u32 %v5445_v19, %v5071_v15 }
 0x360   : > { %2630 = vmatpush.bf16.msra.mxu0 %v5072_v23 }
 0x361   : > { %v2005_v24 = vpop.f32.mrf.mxu3 }
 0x369   : > { %v2007_v17 = vpop.f32.mrf.mxu3 }
 0x36a   : > { %v2094_v9 = vpack.c.bf16 %v2007_v17, %v2005_v24  ;;  %v5063_v17 = vld [vmem:[%s6391_s21 + $0x50] sm:$0xf] }
 0x36c   : > { %2174 = vmatmul.bf16.vlgmr.msra.gmra.mxu2 %v2094_v9  ;;  %v5443_v9 = vld [vmem:[%s6391_s21 + $0x54] sm:$0xf0] }
 0x371   : > { %v2033_v25 = vpop.f32.mrf.mxu3 }
 0x379   : > { %v2035_v27 = vpop.f32.mrf.mxu3 }
 0x37a   : > { %v2095_v29 = vpack.c.bf16 %v2035_v27, %v2033_v25  ;;  %v5769_v25 = vld [vmem:[#allocation2 + $0x38] sm:$0xff] }
 0x37b   : > { %v2061_v30 = vpop.f32.mrf.mxu0 }
 0x37c   : > { %2179 = vmatmul.bf16.gmra.mxu2 %v2095_v29 }
 0x383   : > { %v2063_v32 = vpop.f32.mrf.mxu0 }
 0x384   : > { %v2096_v34 = vpack.c.bf16 %v2063_v32, %v2061_v30  ;;  %v5064_v30 = vor.u32 %v5443_v9, %v5063_v17  ;;  %v5055_v32 = vld [vmem:[%s6391_s21 + $0x40] sm:$0xf] }
 0x386   : > { %2631 = vmatpush.bf16.msra.mxu0 %v5064_v30 }
 0x38c   : > { %2184 = vmatmul.bf16.gmra.mxu2 %v2096_v34  ;;  %v5441_v34 = vld [vmem:[%s6391_s21 + $0x44] sm:$0xf0] }
 0x3e1   : > { %v2089_v14 = vpop.f32.mrf.mxu3 }
 0x3e9   : > { %v2091_v1 = vpop.f32.mrf.mxu3 }
 0x3ea   : > { %v2097_v35 = vpack.c.bf16 %v2091_v1, %v2089_v14 }
 0x3ec   : > { %2189 = vmatmul.bf16.gmra.mxu2 %v2097_v35  ;;  %v5056_v35 = vor.u32 %v5441_v34, %v5055_v32 }
 0x3ee   : > { %2632 = vmatpush.bf16.msra.mxu0 %v5056_v35 }
 0x3ef   : > { %v2175_v38 = vpop.f32.mrf.mxu2 }
 0x3f0   : > { %v2176_v39 = vadd.f32 %v5640_v37, %v2175_v38  ;;  %v5047_v38 = vld [vmem:[%s6391_s21 + $0x30] sm:$0xf] }
 0x3f2   : > { %v2195_v41 = vadd.f32 %v5764_v40, %v2176_v39  ;;  %v5439_v39 = vld [vmem:[%s6391_s21 + $0x34] sm:$0xf0] }
 0x3f4   : > { %2203 = vadd.xlane.f32.xlu1 %v2195_v41 }
 0x3f7   : > { %v2177_v33 = vpop.f32.mrf.mxu2 }
 0x3f8   : > { %v2178_v42 = vadd.f32 %v5640_v37, %v2177_v33  ;;  %v5039_v33 = vld [vmem:[%s6391_s21 + $0x20] sm:$0xf] }
 0x3fa   : > { %v2196_v45 = vadd.f32 %v5765_v43, %v2178_v42  ;;  %v5437_v42 = vld [vmem:[%s6391_s21 + $0x24] sm:$0xf0] }
 0x3fc   : > { %2205 = vadd.xlane.f32.xlu2 %v2196_v45 }
 0x3ff   : > { %v2180_v46 = vpop.f32.mrf.mxu2 }
 0x400   : > { %v2181_v47 = vadd.f32 %v5640_v37, %v2180_v46  ;;  %v5040_v46 = vor.u32 %v5437_v42, %v5039_v33 }
 0x402   : > { %v2197_v48 = vadd.f32 %v2181_v47, %v6534_v62  ;;  %v6085_v62 = vmov 128.0  }
 0x403   : > { %5682 = vrcp.f32 %v6085_v62  ;;  %v6783_v62 = vld [vmem:[%s7553_s3] sm:$0xff] }
 0x404   : > { %2207 = vadd.xlane.f32.xlu0 %v2197_v48 }
 0x407   : > { %v2182_v28 = vpop.f32.mrf.mxu2 }
 0x408   : > { %v2183_v6 = vadd.f32 %v5640_v37, %v2182_v28  ;;  %v5435_v28 = vld [vmem:[%s6391_s21 + $0x14] sm:$0xf0] }
 0x40a   : > { %v6714_v4 = vadd.f32 %v2183_v6, %v6536_v63  ;;  %v5683_v63 = vpop.eup %5682 }
 0x40b   : > { %v2220_v26 = vmul.f32 128.0, %v5683_v63  ;;  %vm2224_vm5 = vweird.f32 %v5683_v63 }
 0x40c   : > { %2209 = vadd.xlane.f32.xlu1 %v6714_v4 }
 0x40d   : > { %v2221_v57 = vsub.f32 1.0, %v2220_v26  ;;  %v5426_v26 = vld [vmem:[%s6389_s9 + $0x30] sm:$0xff] }
 0x40f   : > { %v2185_v49 = vpop.f32.mrf.mxu2  ;;  %v2222_v58 = vmul.f32 %v5683_v63, %v2221_v57  ;;  %v5424_v57 = vld [vmem:[%s6389_s9 + $0x20] sm:$0xff] }
 0x410   : > { %v2186_v21 = vadd.f32 %v5640_v37, %v2185_v49  ;;  %v5023_v49 = vld [vmem:[%s6391_s21] sm:$0xf] }
 0x411   : > { %v2223_v59 = vadd.f32 %v5683_v63, %v2222_v58  ;;  %v5423_v58 = vld [vmem:[%s6389_s9 + $0x18] sm:$0xff] }
 0x412   : > { %v6717_v52 = vadd.f32 %v5766_v50, %v2186_v21  ;;  %v5433_v21 = vld [vmem:[%s6391_s21 + $0x4] sm:$0xf0] }
 0x413   : > { %v6723_v0 = vsel %vm2224_vm5, %v5683_v63, %v2223_v59  ;;  %v5427_v63 = vld [vmem:[%s6389_s9 + $0x38] sm:$0xff]  ;;  %v5422_v59 = vld [vmem:[%s6389_s9 + $0x10] sm:$0xff] }
 0x414   : > { %2211 = vadd.xlane.f32.xlu2 %v6717_v52  ;;  %2466 = vmatpush.bf16.msrb.mxu3 %v5427_v63 }
 0x417   : > { %v2187_v53 = vpop.f32.mrf.mxu2 }
 0x418   : > { %v2188_v54 = vadd.f32 %v5640_v37, %v2187_v53  ;;  %2467 = vmatpush.bf16.msrb.mxu3 %v5426_v26 }
 0x41a   : > { %v6720_v56 = vadd.f32 %v5767_v55, %v2188_v54 }
 0x41c   : > { %2213 = vadd.xlane.f32.xlu0 %v6720_v56 }
 0x467   : > { %v2204_v60 = vpop.xlane.xlu1 %2203 }
 0x468   : > { %v2226_v2 = vmul.f32 %v6723_v0, %v2204_v60  ;;  %v5421_v60 = vld [vmem:[%s6389_s9 + $0x8] sm:$0xff] }
 0x46a   : > { %v6726_v61 = vsub.f32 %v2195_v41, %v2226_v2  ;;  %v5048_v41 = vor.u32 %v5439_v39, %v5047_v38 }
 0x46c   : > { %v2242_v3 = vmul.f32 %v6726_v61, %v6726_v61  ;;  %2633 = vmatpush.bf16.msra.mxu0 %v5048_v41 }
 0x46e   : > { %2250 = vadd.xlane.f32.xlu1 %v2242_v3 }
 0x46f   : > { %v2206_v36 = vpop.xlane.xlu2 %2205  ;;  %v2190_v8 = vpop.f32.mrf.mxu2 }
 0x470   : > { %v2227_v31 = vmul.f32 %v6723_v0, %v2206_v36  ;;  %v2191_v44 = vadd.f32 %v5640_v37, %v2190_v8  ;;  %2634 = vmatpush.bf16.msra.mxu0 %v5040_v46 }
 0x472   : > { %v6731_v5 = vsub.f32 %v2196_v45, %v2227_v31  ;;  %v6733_v13 = vadd.f32 %v5768_v10, %v2191_v44  ;;  %v5420_v31 = vld [vmem:[%s6389_s9] sm:$0xff] }
 0x474   : > { %v2243_v11 = vmul.f32 %v6731_v5, %v6731_v5  ;;  %2215 = vadd.xlane.f32.xlu0 %v6733_v13 }
 0x476   : > { %2252 = vadd.xlane.f32.xlu2 %v2243_v11 }
 0x477   : > { %v2208_v16 = vpop.xlane.xlu0 %2207  ;;  %v2192_v12 = vpop.f32.mrf.mxu2 }
 0x478   : > { %v2228_v20 = vmul.f32 %v6723_v0, %v2208_v16  ;;  %v2193_v22 = vadd.f32 %v5640_v37, %v2192_v12 }
 0x47a   : > { %v6743_v24 = vsub.f32 %v2197_v48, %v2228_v20  ;;  %v6747_v27 = vadd.f32 %v5769_v25, %v2193_v22  ;;  %v5031_v48 = vld [vmem:[%s6391_s21 + $0x10] sm:$0xf] }
 0x47c   : > { %v2244_v29 = vmul.f32 %v6743_v24, %v6743_v24  ;;  %2217 = vadd.xlane.f32.xlu1 %v6747_v27 }
 0x47e   : > { %2254 = vadd.xlane.f32.xlu2 %v2244_v29 }
 0x47f   : > { %v2210_v14 = vpop.xlane.xlu1 %2209 }
 0x480   : > { %v2229_v1 = vmul.f32 %v6723_v0, %v2210_v14  ;;  %v6812_v14 = vld [vmem:[%s7553_s3 + $0x8] sm:$0xff] }
 0x482   : > { %v6756_v37 = vsub.f32 %v6714_v4, %v2229_v1  ;;  %v5032_v4 = vor.u32 %v5435_v28, %v5031_v48 }
 0x484   : > { %v2245_v40 = vmul.f32 %v6756_v37, %v6756_v37  ;;  %2635 = vmatpush.bf16.msra.mxu0 %v5032_v4 }
 0x486   : > { %2256 = vadd.xlane.f32.xlu0 %v2245_v40 }
 0x487   : > { %v2212_v43 = vpop.xlane.xlu2 %2211 }
 0x488   : > { %v2230_v45 = vmul.f32 %v6723_v0, %v2212_v43  ;;  %v6822_v43 = vld [vmem:[%s7555_s20] ss:$0 sm:$0xff] }
 0x48a   : > { %v6766_v47 = vsub.f32 %v6717_v52, %v2230_v45  ;;  %v5024_v52 = vor.u32 %v5433_v21, %v5023_v49 }
 0x48c   : > { %v2246_v6 = vmul.f32 %v6766_v47, %v6766_v47  ;;  %2636 = vmatpush.bf16.msra.mxu0 %v5024_v52 }
 0x48e   : > { %2258 = vadd.xlane.f32.xlu1 %v2246_v6 }
 0x48f   : > { %v2214_v50 = vpop.xlane.xlu0 %2213  ;;  %2637 = vmatmul.bf16.vlgmr.msra.gmra.mxu0 %v6783_v62 }
 0x490   : > { %v2231_v53 = vmul.f32 %v6723_v0, %v2214_v50 }
 0x492   : > { %v6776_v54 = vsub.f32 %v6720_v56, %v2231_v53  ;;  %v5425_v56 = vld [vmem:[%s6389_s9 + $0x28] sm:$0xff]  ;;  %s7562_s9 = smov %s7561_s5 }
 0x493   : > { %2468 = vmatpush.bf16.msrb.mxu3 %v5425_v56  ;;  %v6846_v56 = vld [vmem:[%s7553_s3 + $0x10] sm:$0xff] }
 0x494   : > { %v2247_v55 = vmul.f32 %v6776_v54, %v6776_v54 }
 0x496   : > { %2260 = vadd.xlane.f32.xlu2 %v2247_v55 }
 0x497   : > { %2469 = vmatpush.bf16.msrb.mxu3 %v5424_v57 }
 0x49b   : > { %2470 = vmatpush.bf16.msrb.mxu3 %v5423_v58 }
 0x49f   : > { %2471 = vmatpush.bf16.msrb.mxu3 %v5422_v59  ;;  %2642 = vmatmul.bf16.gmra.mxu0 %v6812_v14 }
 0x4a3   : > { %2472 = vmatpush.bf16.msrb.mxu3 %v5421_v60 }
 0x4a7   : > { %2473 = vmatpush.bf16.msrb.mxu3 %v5420_v31  ;;  %v5444_v31 = vld [vmem:[%s6391_s21 + $0x64] sm:$0xf] }
 0x4af   : > { %2647 = vmatmul.bf16.gmra.mxu0 %v6846_v56 }
 0x4e1   : > { %v2251_v2 = vpop.xlane.xlu1 %2250 }
 0x4e2   : > { %v2266_v3 = vmul.f32 %v2251_v2, %v6723_v0 }
 0x4e4   : > { %v2274_v36 = vadd.f32 1e-05, %v2266_v3  ;;  %v5446_v3 = vld [vmem:[%s6391_s21 + $0x74] sm:$0xf] }
 0x4e6   : > { %5684 = vrsqrt.f32 %v2274_v36  ;;  %vm2288_vm7 = vweird.f32 %v2274_v36 }
 0x4e7   : > { %v2216_v8 = vpop.xlane.xlu0 %2215 }
 0x4e8   : > { %v2232_v44 = vmul.f32 %v6723_v0, %v2216_v8 }
 0x4e9   : > { %v2253_v10 = vpop.xlane.xlu2 %2252 }
 0x4ea   : > { %v2267_v11 = vmul.f32 %v2253_v10, %v6723_v0  ;;  %v6798_v7 = vsub.f32 %v6733_v13, %v2232_v44 }
 0x4ec   : > { %v5685_v51 = vpop.eup %5684  ;;  %v2275_v15 = vadd.f32 1e-05, %v2267_v11  ;;  %v2248_v18 = vmul.f32 %v6798_v7, %v6798_v7 }
 0x4ed   : > { %v2283_v16 = vmul.f32 %v5685_v51, %v2274_v36  ;;  %vm2289_vm6 = vweird.f32 %v5685_v51  ;;  %v5081_v36 = vld [vmem:[%s6391_s21 + $0x78] sm:$0xf0] }
 0x4ee   : > { %5686 = vrsqrt.f32 %v2275_v15  ;;  %2262 = vadd.xlane.f32.xlu0 %v2248_v18  ;;  %vm2290_vm8 = vmor %vm2288_vm7, %vm2289_vm6  ;;  %vm2298_vm10 = vweird.f32 %v2275_v15  ;;  %v5084_v11 = vor.u32 %v5446_v3, %v5081_v36  ;;  %v5434_v3 = vld [vmem:[%s6391_s21 + $0x14] sm:$0xf]  ;;  %v5033_v36 = vld [vmem:[%s6391_s21 + $0x18] sm:$0xf0] }
 0x4ef   : > { %v2284_v19 = vmul.f32 %v5685_v51, %v2283_v16  ;;  %v2218_v12 = vpop.xlane.xlu1 %2217 }
 0x4f0   : > { %v2233_v22 = vmul.f32 %v6723_v0, %v2218_v12  ;;  %2658 = vmatpush.bf16.msrb.mxu1 %v5084_v11  ;;  %v5036_v11 = vor.u32 %v5434_v3, %v5033_v36 }
 0x4f1   : > { %v2285_v20 = vmul.f32 0.5, %v2284_v19  ;;  %v2255_v23 = vpop.xlane.xlu2 %2254 }
 0x4f2   : > { %v2268_v17 = vmul.f32 %v2255_v23, %v6723_v0  ;;  %v6805_v13 = vsub.f32 %v6747_v27, %v2233_v22  ;;  %v5442_v22 = vld [vmem:[%s6391_s21 + $0x54] sm:$0xf]  ;;  %v5065_v23 = vld [vmem:[%s6391_s21 + $0x58] sm:$0xf0] }
 0x4f3   : > { %v2286_v9 = vsub.f32 1.5, %v2285_v20 }
 0x4f4   : > { %v5687_v25 = vpop.eup %5686  ;;  %v2276_v29 = vadd.f32 1e-05, %v2268_v17  ;;  %v2249_v34 = vmul.f32 %v6805_v13, %v6805_v13 }
 0x4f5   : > { %v2287_v30 = vmul.f32 %v5685_v51, %v2286_v9  ;;  %v2293_v32 = vmul.f32 %v5687_v25, %v2275_v15  ;;  %vm2299_vm9 = vweird.f32 %v5687_v25 }
 0x4f6   : > { %5688 = vrsqrt.f32 %v2276_v29  ;;  %2264 = vadd.xlane.f32.xlu1 %v2249_v34  ;;  %vm2300_vm11 = vmor %vm2298_vm10, %vm2299_vm9  ;;  %vm2308_vm13 = vweird.f32 %v2276_v29 }
 0x4f7   : > { %v2294_v1 = vmul.f32 %v5687_v25, %v2293_v32  ;;  %v2291_v27 = vsel %vm2290_vm8, %v5685_v51, %v2287_v30  ;;  %v5073_v51 = vld [vmem:[%s6391_s21 + $0x68] sm:$0xf0]  ;;  %v5068_v30 = vor.u32 %v5442_v22, %v5065_v23 }
 0x4f8   : > { %v2362_v33 = vmul.f32 %v2291_v27, %v6726_v61  ;;  %v6831_v61 = vld [vmem:[%s1265_s29] ss:$0 sm:$0xff]  ;;  %v5076_v18 = vor.u32 %v5444_v31, %v5073_v51 }
 0x4f9   : > { %v2295_v35 = vmul.f32 0.5, %v2294_v1  ;;  %v2257_v38 = vpop.xlane.xlu0 %2256  ;;  %v5057_v1 = vld [vmem:[%s6391_s21 + $0x48] sm:$0xf0] }
 0x4fa   : > { %v2269_v39 = vmul.f32 %v2257_v38, %v6723_v0  ;;  %v2374_v4 = vmul.f32 %v6822_v43, %v2362_v33  ;;  %2659 = vmatpush.bf16.msrb.mxu1 %v5076_v18  ;;  %v5432_v18 = vld [vmem:[%s6391_s21 + $0x4] sm:$0xf] }
 0x4fb   : > { %v2296_v40 = vsub.f32 1.5, %v2295_v35  ;;  %v6872_v35 = vld [vmem:[%s6428_s2] sm:$0x3] }
 0x4fc   : > { %v5689_v41 = vpop.eup %5688  ;;  %v2277_v42 = vadd.f32 1e-05, %v2269_v39  ;;  %v6838_v63 = vadd.f32 %v6831_v61, %v2374_v4 }
 0x4fd   : > { %v2297_v45 = vmul.f32 %v5687_v25, %v2296_v40  ;;  %v2303_v46 = vmul.f32 %v5689_v41, %v2276_v29  ;;  %vm2309_vm12 = vweird.f32 %v5689_v41 }
 0x4fe   : > { %5690 = vrsqrt.f32 %v2277_v42  ;;  %vm6851_vm14 = vmor %vm2308_vm13, %vm2309_vm12  ;;  %vm2318_vm0 = vweird.f32 %v2277_v42  ;;  %2660 = vmatpush.bf16.msrb.mxu1 %v5068_v30 }
 0x4ff   : > { %v2301_v48 = vsel %vm2300_vm11, %v5687_v25, %v2297_v45  ;;  %v2304_v28 = vmul.f32 %v5689_v41, %v2303_v46  ;;  %v6885_v45 = vperm.slane %v6872_v35, 0  ;;  %v5438_v46 = vld [vmem:[%s6391_s21 + $0x34] sm:$0xf] }
 0x500   : > { %v2363_v6 = vmul.f32 %v2301_v48, %v6731_v5  ;;  %v5049_v48 = vld [vmem:[%s6391_s21 + $0x38] sm:$0xf0] }
 0x501   : > { %v2305_v49 = vmul.f32 0.5, %v2304_v28  ;;  %v2259_v21 = vpop.xlane.xlu1 %2258 }
 0x502   : > { %v2270_v50 = vmul.f32 %v2259_v21, %v6723_v0  ;;  %v2375_v53 = vmul.f32 %v6822_v43, %v2363_v6 }
 0x503   : > { %v2306_v52 = vsub.f32 1.5, %v2305_v49 }
 0x504   : > { %v5691_v55 = vpop.eup %5690  ;;  %v6835_v5 = vadd.f32 1e-05, %v2270_v50  ;;  %v6841_v26 = vadd.f32 %v6831_v61, %v2375_v53  ;;  %v5052_v50 = vor.u32 %v5438_v46, %v5049_v48 }
 0x505   : > { %v2307_v57 = vmul.f32 %v5689_v41, %v2306_v52  ;;  %v2313_v58 = vmul.f32 %v5691_v55, %v2277_v42  ;;  %vm2319_vm15 = vweird.f32 %v5691_v55  ;;  %v5436_v52 = vld [vmem:[%s6391_s21 + $0x24] sm:$0xf] }
 0x506   : > { %5692 = vrsqrt.f32 %v6835_v5  ;;  %v2394_v59 = vpack.c.bf16 %v6841_v26, %v6838_v63  ;;  %vm2320_vm1 = vmor %vm2318_vm0, %vm2319_vm15  ;;  %vm2328_vm4 = vweird.f32 %v6835_v5 }
 0x507   : > { %v2314_v2 = vmul.f32 %v5691_v55, %v2313_v58  ;;  %v2311_v10 = vsel %vm6851_vm14, %v5689_v41, %v2307_v57 }
 0x508   : > { %2474 = vmatmul.bf16.vlgmr.msrb.gmra.mxu3 %v2394_v59  ;;  %v2364_v20 = vmul.f32 %v2311_v10, %v6743_v24  ;;  %v5440_v24 = vld [vmem:[%s6391_s21 + $0x44] sm:$0xf] }
 0x509   : > { %v2315_v8 = vmul.f32 0.5, %v2314_v2  ;;  %v2261_v44 = vpop.xlane.xlu2 %2260  ;;  %v5060_v40 = vor.u32 %v5440_v24, %v5057_v1 }
 0x50a   : > { %v2271_v15 = vmul.f32 %v2261_v44, %v6723_v0  ;;  %v2376_v34 = vmul.f32 %v6822_v43, %v2364_v20 }
 0x50b   : > { %v2316_v16 = vsub.f32 1.5, %v2315_v8  ;;  %2661 = vmatpush.bf16.msrb.mxu1 %v5060_v40 }
 0x50c   : > { %v5693_v19 = vpop.eup %5692  ;;  %v2279_v12 = vadd.f32 1e-05, %v2271_v15  ;;  %v6876_v33 = vadd.f32 %v6831_v61, %v2376_v34  ;;  %v2638_v4 = vpop.f32.mrf.mxu0 }
 0x50d   : > { %v2317_v17 = vmul.f32 %v5691_v55, %v2316_v16  ;;  %v2323_v9 = vmul.f32 %v5693_v19, %v6835_v5  ;;  %vm2329_vm3 = vweird.f32 %v5693_v19  ;;  %v2639_v53 = vadd.f32 %v2638_v4, %v6885_v45 }
 0x50e   : > { %5694 = vrsqrt.f32 %v2279_v12  ;;  %vm2330_vm5 = vmor %vm2328_vm4, %vm2329_vm3  ;;  %vm2338_vm7 = vweird.f32 %v2279_v12 }
 0x50f   : > { %v2324_v25 = vmul.f32 %v5693_v19, %v2323_v9  ;;  %v2321_v29 = vsel %vm2320_vm1, %v5691_v55, %v2317_v17  ;;  %v5041_v55 = vld [vmem:[%s6391_s21 + $0x28] sm:$0xf0]  ;;  %2662 = vmatpush.bf16.msrb.mxu1 %v5052_v50  ;;  %v2695_v2 = vpack.c.bf16 %v2639_v53, %v2639_v53 }
 0x510   : > { %v2365_v32 = vmul.f32 %v2321_v29, %v6756_v37  ;;  %v5431_v37 = vld [vmem:[%s7553_s3 + $0x18] sm:$0xff]  ;;  %v5044_v60 = vor.u32 %v5436_v52, %v5041_v55 }
 0x511   : > { %v2325_v27 = vmul.f32 0.5, %v2324_v25  ;;  %2652 = vmatmul.bf16.gmra.mxu0 %v5431_v37  ;;  %v2711_v16 = vunpack.c.l.b16 %v2695_v2 }
 0x512   : > { %v2377_v38 = vmul.f32 %v6822_v43, %v2365_v32 }
 0x513   : > { %v2326_v39 = vsub.f32 1.5, %v2325_v27  ;;  %2663 = vmatpush.bf16.msrb.mxu1 %v5044_v60 }
 0x514   : > { %v5695_v41 = vpop.eup %5694  ;;  %v6879_v42 = vadd.f32 %v6831_v61, %v2377_v38  ;;  %v2640_v8 = vpop.f32.mrf.mxu0 }
 0x515   : > { %v2327_v28 = vmul.f32 %v5693_v19, %v2326_v39  ;;  %v2333_v6 = vmul.f32 %v5695_v41, %v2279_v12  ;;  %vm2339_vm6 = vweird.f32 %v5695_v41  ;;  %v2641_v44 = vadd.f32 %v2640_v8, %v6885_v45 }
 0x516   : > { %v2395_v49 = vpack.c.bf16 %v6879_v42, %v6876_v33  ;;  %vm2340_vm8 = vmor %vm2338_vm7, %vm2339_vm6 }
 0x517   : > { %v2334_v21 = vmul.f32 %v5695_v41, %v2333_v6  ;;  %v2331_v58 = vsel %vm2330_vm5, %v5693_v19, %v2327_v28  ;;  %v5025_v19 = vld [vmem:[%s6391_s21 + $0x8] sm:$0xf0]  ;;  %2664 = vmatpush.bf16.msrb.mxu1 %v5036_v11 }
 0x518   : > { %2479 = vmatmul.bf16.gmra.mxu3 %v2395_v49  ;;  %v2366_v5 = vmul.f32 %v2331_v58, %v6766_v47  ;;  %v2696_v47 = vpack.c.bf16 %v2641_v44, %v2641_v44  ;;  %v5028_v12 = vor.u32 %v5432_v18, %v5025_v19 }
 0x519   : > { %v2335_v57 = vmul.f32 0.5, %v2334_v21 }
 0x51a   : > { %v2378_v15 = vmul.f32 %v6822_v43, %v2366_v5  ;;  %v2712_v22 = vunpack.c.l.b16 %v2696_v47 }
 0x51b   : > { %v2336_v59 = vsub.f32 1.5, %v2335_v57  ;;  %2665 = vmatpush.bf16.msrb.mxu1 %v5028_v12 }
 0x51c   : > { %v6905_v23 = vadd.f32 %v6831_v61, %v2378_v15  ;;  %v2713_v9 = vpack.c.b16 %v2712_v22, %v2711_v16 }
 0x51d   : > { %v2337_v31 = vmul.f32 %v5695_v41, %v2336_v59 }
 0x51e   : > { %2666 = vmatmul.bf16.vlgmr.msrb.gmra.mxu1 %v6783_v62 }
 0x51f   : > { %v2341_v10 = vsel %vm2340_vm8, %v5695_v41, %v2337_v31  ;;  %2722 = vmatpush.bf16.xpose.msra.mxu1 %v2713_v9 }
 0x520   : > { %v2367_v51 = vmul.f32 %v2341_v10, %v6776_v54 }
 0x522   : > { %v2379_v20 = vmul.f32 %v6822_v43, %v2367_v51 }
 0x524   : > { %v6908_v17 = vadd.f32 %v6831_v61, %v2379_v20 }
 0x526   : > { %v2396_v54 = vpack.c.bf16 %v6908_v17, %v6905_v23 }
 0x528   : > { %2484 = vmatmul.bf16.gmra.mxu3 %v2396_v54 }
 0x52e   : > { %2671 = vmatmul.bf16.gmra.mxu1 %v6812_v14  ;;  %v2643_v14 = vpop.f32.mrf.mxu0 }
 0x52f   : > { %v2644_v28 = vadd.f32 %v2643_v14, %v6885_v45 }
 0x531   : > { %v2697_v4 = vpack.c.bf16 %v2644_v28, %v2644_v28 }
 0x533   : > { %v2737_v55 = vunpack.c.l.b16 %v2697_v4 }
 0x536   : > { %v2645_v21 = vpop.f32.mrf.mxu0 }
 0x537   : > { %v2646_v53 = vadd.f32 %v2645_v21, %v6885_v45 }
 0x539   : > { %v2698_v57 = vpack.c.bf16 %v2646_v53, %v2646_v53 }
 0x53b   : > { %v2738_v60 = vunpack.c.l.b16 %v2698_v57 }
 0x53d   : > { %v2739_v2 = vpack.c.b16 %v2738_v60, %v2737_v55 }
 0x53e   : > { %2676 = vmatmul.bf16.gmra.mxu1 %v6846_v56  ;;  %v2648_v36 = vpop.f32.mrf.mxu0 }
 0x53f   : > { %2748 = vmatpush.bf16.xpose.msrb.mxu2 %v2739_v2 }
 0x546   : > { %v2650_v10 = vpop.f32.mrf.mxu0 }
 0x54e   : > { %2681 = vmatmul.bf16.gmra.mxu1 %v5431_v37 }
 0x561   : > { %v2263_v25 = vpop.xlane.xlu0 %2262 }
 0x562   : > { %v2272_v29 = vmul.f32 %v2263_v25, %v6723_v0 }
 0x564   : > { %v2280_v30 = vadd.f32 1e-05, %v2272_v29 }
 0x566   : > { %5696 = vrsqrt.f32 %v2280_v30  ;;  %vm2348_vm10 = vweird.f32 %v2280_v30 }
 0x569   : > { %v2265_v32 = vpop.xlane.xlu1 %2264 }
 0x56a   : > { %v2273_v34 = vmul.f32 %v2265_v32, %v6723_v0 }
 0x56c   : > { %v5697_v24 = vpop.eup %5696  ;;  %v2281_v1 = vadd.f32 1e-05, %v2273_v34 }
 0x56d   : > { %v2343_v27 = vmul.f32 %v5697_v24, %v2280_v30  ;;  %vm2349_vm9 = vweird.f32 %v5697_v24 }
 0x56e   : > { %5698 = vrsqrt.f32 %v2281_v1  ;;  %vm2350_vm11 = vmor %vm2348_vm10, %vm2349_vm9  ;;  %vm2358_vm13 = vweird.f32 %v2281_v1 }
 0x56f   : > { %v2344_v38 = vmul.f32 %v5697_v24, %v2343_v27 }
 0x571   : > { %v2345_v39 = vmul.f32 0.5, %v2344_v38 }
 0x573   : > { %v2346_v62 = vsub.f32 1.5, %v2345_v39 }
 0x574   : > { %v5699_v40 = vpop.eup %5698 }
 0x575   : > { %v2347_v41 = vmul.f32 %v5697_v24, %v2346_v62  ;;  %v2353_v56 = vmul.f32 %v5699_v40, %v2281_v1  ;;  %vm2359_vm12 = vweird.f32 %v5699_v40 }
 0x576   : > { %vm2360_vm14 = vmor %vm2358_vm13, %vm2359_vm12 }
 0x577   : > { %v2354_v37 = vmul.f32 %v5699_v40, %v2353_v56  ;;  %v2351_v48 = vsel %vm2350_vm11, %v5697_v24, %v2347_v41 }
 0x578   : > { %v2368_v49 = vmul.f32 %v2351_v48, %v6798_v7 }
 0x579   : > { %v2355_v46 = vmul.f32 0.5, %v2354_v37 }
 0x57a   : > { %v2380_v59 = vmul.f32 %v6822_v43, %v2368_v49 }
 0x57b   : > { %v2356_v6 = vsub.f32 1.5, %v2355_v46 }
 0x57c   : > { %v6924_v7 = vadd.f32 %v6831_v61, %v2380_v59 }
 0x57d   : > { %v2357_v50 = vmul.f32 %v5699_v40, %v2356_v6 }
 0x57f   : > { %v2361_v52 = vsel %vm2360_vm14, %v5699_v40, %v2357_v50  ;;  %v2522_v40 = vperm.slane %v6872_v35, 1 }
 0x580   : > { %v2369_v58 = vmul.f32 %v2361_v52, %v6805_v13  ;;  %v2649_v13 = vadd.f32 %v2648_v36, %v6885_v45 }
 0x582   : > { %v2381_v5 = vmul.f32 %v6822_v43, %v2369_v58  ;;  %v6937_v43 = vld [vmem:[%s7560_s15] ss:$0 sm:$0xff]  ;;  %v2699_v44 = vpack.c.bf16 %v2649_v13, %v2649_v13  ;;  %s7568_s15 = scalar_lea.vmem %s7567_s11, %s6408_s8 }
 0x584   : > { %v6927_v3 = vadd.f32 %v6831_v61, %v2381_v5  ;;  %v2651_v61 = vadd.f32 %v2650_v10, %v6885_v45  ;;  %v2763_v51 = vunpack.c.l.b16 %v2699_v44 }
 0x586   : > { %v2397_v31 = vpack.c.bf16 %v6927_v3, %v6924_v7  ;;  %v2700_v15 = vpack.c.bf16 %v2651_v61, %v2651_v61 }
 0x588   : > { %2489 = vmatmul.bf16.gmra.mxu3 %v2397_v31  ;;  %v2764_v16 = vunpack.c.l.b16 %v2700_v15 }
 0x58a   : > { %v2765_v20 = vpack.c.b16 %v2764_v16, %v2763_v51 }
 0x58b   : > { %v2475_v8 = vpop.f32.mrf.mxu3 }
 0x58c   : > { %v2476_v11 = vadd.f32 %v6937_v43, %v2475_v8  ;;  %2774 = vmatpush.bf16.xpose.msra.mxu3 %v2765_v20 }
 0x58e   : > { %v2687_v18 = vpack.c.bf16 %v2476_v11, %v2476_v11  ;;  %v2653_v29 = vpop.f32.mrf.mxu0 }
 0x58f   : > { %v2654_v30 = vadd.f32 %v2653_v29, %v6885_v45 }
 0x590   : > { %v2705_v12 = vunpack.c.l.b16 %v2687_v18 }
 0x591   : > { %v2701_v24 = vpack.c.bf16 %v2654_v30, %v2654_v30 }
 0x593   : > { %v2477_v47 = vpop.f32.mrf.mxu3  ;;  %v2789_v14 = vunpack.c.l.b16 %v2701_v24 }
 0x594   : > { %v2478_v19 = vadd.f32 %v6937_v43, %v2477_v47 }
 0x596   : > { %v2688_v22 = vpack.c.bf16 %v2478_v19, %v2478_v19  ;;  %v2655_v38 = vpop.f32.mrf.mxu0 }
 0x597   : > { %v2656_v39 = vadd.f32 %v2655_v38, %v6885_v45 }
 0x598   : > { %v2706_v9 = vunpack.c.l.b16 %v2688_v22 }
 0x599   : > { %v2702_v41 = vpack.c.bf16 %v2656_v39, %v2656_v39 }
 0x59a   : > { %v2707_v54 = vpack.c.b16 %v2706_v9, %v2705_v12 }
 0x59b   : > { %v2480_v25 = vpop.f32.mrf.mxu3  ;;  %v2667_v56 = vpop.f32.mrf.mxu1  ;;  %v2790_v48 = vunpack.c.l.b16 %v2702_v41 }
 0x59c   : > { %2723 = vmatmul.bf16.vlgmr.msra.gmra.mxu1 %v2707_v54  ;;  %v2481_v32 = vadd.f32 %v6937_v43, %v2480_v25  ;;  %v2668_v6 = vadd.f32 %v2667_v56, %v2522_v40 }
 0x59d   : > { %v2791_v49 = vpack.c.b16 %v2790_v48, %v2789_v14  ;;  %v1358_v14 = vld [vmem:[%s7561_s5] sm:$0x1] }
 0x59e   : > { %v2689_v1 = vpack.c.bf16 %v2481_v32, %v2481_v32  ;;  %v3035_v21 = vpack.c.bf16 %v2668_v6, %v2668_v6  ;;  %v4837_v41 = vadd.f32 -1.0, %v1358_v14 }
 0x59f   : > { %2800 = vmatpush.bf16.xpose.msrb.mxu0 %v2791_v49 }
 0x5a0   : > { %v2731_v37 = vunpack.c.l.b16 %v2689_v1  ;;  %v3050_v52 = vunpack.c.l.b16 %v3035_v21 }
 0x5a3   : > { %v2482_v34 = vpop.f32.mrf.mxu3  ;;  %v2669_v50 = vpop.f32.mrf.mxu1 }
 0x5a4   : > { %v2483_v27 = vadd.f32 %v6937_v43, %v2482_v34  ;;  %v2670_v45 = vadd.f32 %v2669_v50, %v2522_v40 }
 0x5a6   : > { %v2690_v62 = vpack.c.bf16 %v2483_v27, %v2483_v27  ;;  %v3036_v55 = vpack.c.bf16 %v2670_v45, %v2670_v45 }
 0x5a8   : > { %v2732_v46 = vunpack.c.l.b16 %v2690_v62  ;;  %v3051_v59 = vunpack.c.l.b16 %v3036_v55 }
 0x5aa   : > { %v2733_v28 = vpack.c.b16 %v2732_v46, %v2731_v37  ;;  %v3052_v5 = vpack.c.b16 %v3051_v59, %v3050_v52  ;;  %v1366_v46 = vmul.f32 10000.0, %v4837_v41 }
 0x5ab   : > { %v2485_v4 = vpop.f32.mrf.mxu3  ;;  %v2672_v2 = vpop.f32.mrf.mxu1 }
 0x5ac   : > { %2749 = vmatmul.bf16.vlgmr.msrb.gmra.mxu2 %v2733_v28  ;;  %v2486_v53 = vadd.f32 %v6937_v43, %v2485_v4  ;;  %3064 = vmatpush.bf16.msrb.mxu1 %v3052_v5  ;;  %v2673_v8 = vadd.f32 %v2672_v2, %v2522_v40 }
 0x5ae   : > { %v2691_v57 = vpack.c.bf16 %v2486_v53, %v2486_v53  ;;  %v3037_v44 = vpack.c.bf16 %v2673_v8, %v2673_v8 }
 0x5b0   : > { %v2757_v36 = vunpack.c.l.b16 %v2691_v57  ;;  %v3078_v11 = vunpack.c.l.b16 %v3037_v44  ;;  %v1359_v57 = vld [vmem:[%s7562_s9 + $0x1] sm:$0x1] }
 0x5b1   : > { %v4838_v59 = vadd.f32 -1.0, %v1359_v57 }
 0x5b3   : > { %v2487_v35 = vpop.f32.mrf.mxu3  ;;  %v2674_v10 = vpop.f32.mrf.mxu1 }
 0x5b4   : > { %v2488_v58 = vadd.f32 %v6937_v43, %v2487_v35  ;;  %v2675_v61 = vadd.f32 %v2674_v10, %v2522_v40 }
 0x5b6   : > { %v2692_v60 = vpack.c.bf16 %v2488_v58, %v2488_v58  ;;  %v3038_v51 = vpack.c.bf16 %v2675_v61, %v2675_v61 }
 0x5b8   : > { %v2758_v31 = vunpack.c.l.b16 %v2692_v60  ;;  %v3079_v15 = vunpack.c.l.b16 %v3038_v51  ;;  %v1367_v60 = vmul.f32 10000.0, %v4838_v59 }
 0x5ba   : > { %v2759_v13 = vpack.c.b16 %v2758_v31, %v2757_v36  ;;  %v3080_v16 = vpack.c.b16 %v3079_v15, %v3078_v11  ;;  %v2820_v5 = vperm.slane %v1367_v60, 0 }
 0x5bb   : > { %v2677_v47 = vpop.f32.mrf.mxu1 }
 0x5bc   : > { %2775 = vmatmul.bf16.vlgmr.msra.gmra.mxu3 %v2759_v13  ;;  %3092 = vmatpush.bf16.msra.mxu2 %v3080_v16  ;;  %v2678_v18 = vadd.f32 %v2677_v47, %v2522_v40  ;;  %v1360_v13 = vld [vmem:[%s7562_s9 + $0x2] sm:$0x1] }
 0x5bd   : > { %v4839_v44 = vadd.f32 -1.0, %v1360_v13 }
 0x5be   : > { %v3039_v19 = vpack.c.bf16 %v2678_v18, %v2678_v18 }
 0x5bf   : > { %v1368_v51 = vmul.f32 10000.0, %v4839_v44 }
 0x5c0   : > { %v3106_v12 = vunpack.c.l.b16 %v3039_v19 }
 0x5c1   : > { %v2821_v16 = vperm.slane %v1368_v51, 0 }
 0x5c3   : > { %v2679_v20 = vpop.f32.mrf.mxu1 }
 0x5c4   : > { %v2680_v22 = vadd.f32 %v2679_v20, %v2522_v40 }
 0x5c6   : > { %v3040_v9 = vpack.c.bf16 %v2680_v22, %v2680_v22 }
 0x5c8   : > { %v3107_v54 = vunpack.c.l.b16 %v3040_v9 }
 0x5ca   : > { %v3108_v25 = vpack.c.b16 %v3107_v54, %v3106_v12 }
 0x5cb   : > { %v2682_v29 = vpop.f32.mrf.mxu1 }
 0x5cc   : > { %3120 = vmatpush.bf16.msrb.mxu3 %v3108_v25  ;;  %v2683_v30 = vadd.f32 %v2682_v29, %v2522_v40  ;;  %v1361_v25 = vld [vmem:[%s7562_s9 + $0x3] sm:$0x1] }
 0x5cd   : > { %v4840_v29 = vadd.f32 -1.0, %v1361_v25 }
 0x5ce   : > { %v3041_v32 = vpack.c.bf16 %v2683_v30, %v2683_v30 }
 0x5d0   : > { %v3134_v1 = vunpack.c.l.b16 %v3041_v32 }
 0x5d3   : > { %v2684_v34 = vpop.f32.mrf.mxu1 }
 0x5d4   : > { %v2685_v24 = vadd.f32 %v2684_v34, %v2522_v40  ;;  %v2819_v40 = vperm.slane %v1366_v46, 0 }
 0x5d6   : > { %v3042_v27 = vpack.c.bf16 %v2685_v24, %v2685_v24  ;;  %v1369_v24 = vmul.f32 10000.0, %v4840_v29 }
 0x5d8   : > { %v3135_v38 = vunpack.c.l.b16 %v3042_v27 }
 0x5da   : > { %v3136_v39 = vpack.c.b16 %v3135_v38, %v3134_v1  ;;  %v2822_v1 = vperm.slane %v1369_v24, 0 }
 0x5dc   : > { %3148 = vmatpush.bf16.msra.mxu0 %v3136_v39 }
 0x60b   : > { %v2490_v62 = vpop.f32.mrf.mxu3 }
 0x60c   : > { %v2491_v56 = vadd.f32 %v6937_v43, %v2490_v62 }
 0x60e   : > { %v2693_v48 = vpack.c.bf16 %v2491_v56, %v2491_v56 }
 0x610   : > { %v2783_v4 = vunpack.c.l.b16 %v2693_v48 }
 0x613   : > { %v2492_v37 = vpop.f32.mrf.mxu3 }
 0x614   : > { %v2493_v28 = vadd.f32 %v6937_v43, %v2492_v37 }
 0x616   : > { %v2694_v6 = vpack.c.bf16 %v2493_v28, %v2493_v28 }
 0x618   : > { %v2784_v49 = vunpack.c.l.b16 %v2694_v6 }
 0x619   : > { %v2724_v21 = vpop.f32.mrf.mxu1 }
 0x61a   : > { %v2807_v50 = vmul.f32 0.088388346, %v2724_v21  ;;  %v2785_v53 = vpack.c.b16 %v2784_v49, %v2783_v4 }
 0x61c   : > { %v2827_v45 = vadd.f32 %v2819_v40, %v2807_v50  ;;  %2801 = vmatmul.bf16.vlgmr.msrb.gmra.mxu0 %v2785_v53 }
 0x61e   : > { %v2835_v52 = vsel %vm1773_vm2, %v2827_v45, -inf }
 0x61f   : > { %2836 = vmax.xlane.f32.xlu2 %v2835_v52 }
 0x621   : > { %v2726_v55 = vpop.f32.mrf.mxu1 }
 0x622   : > { %v2808_v35 = vmul.f32 0.088388346, %v2726_v55 }
 0x624   : > { %v2828_v58 = vadd.f32 %v2819_v40, %v2808_v35 }
 0x626   : > { %v2838_v43 = vsel %vm1773_vm2, %v2828_v58, -inf }
 0x627   : > { %2839 = vmax.xlane.f32.xlu0 %v2838_v43 }
 0x62f   : > { %v2750_v2 = vpop.f32.mrf.mxu2 }
 0x630   : > { %v2809_v36 = vmul.f32 0.088388346, %v2750_v2 }
 0x632   : > { %v2829_v31 = vadd.f32 %v2820_v5, %v2809_v36 }
 0x634   : > { %v2841_v8 = vsel %vm1773_vm2, %v2829_v31, -inf }
 0x635   : > { %2842 = vmax.xlane.f32.xlu1 %v2841_v8 }
 0x637   : > { %v2752_v10 = vpop.f32.mrf.mxu2 }
 0x638   : > { %v2810_v61 = vmul.f32 0.088388346, %v2752_v10 }
 0x63a   : > { %v2830_v11 = vadd.f32 %v2820_v5, %v2810_v61 }
 0x63c   : > { %v2844_v15 = vsel %vm1773_vm2, %v2830_v11, -inf }
 0x63d   : > { %2845 = vmax.xlane.f32.xlu2 %v2844_v15 }
 0x63f   : > { %v2776_v47 = vpop.f32.mrf.mxu3 }
 0x640   : > { %v2811_v18 = vmul.f32 0.088388346, %v2776_v47 }
 0x642   : > { %v2831_v19 = vadd.f32 %v2821_v16, %v2811_v18 }
 0x644   : > { %v2847_v20 = vsel %vm1773_vm2, %v2831_v19, -inf }
 0x645   : > { %2848 = vmax.xlane.f32.xlu0 %v2847_v20 }
 0x647   : > { %v2778_v22 = vpop.f32.mrf.mxu3 }
 0x648   : > { %v2812_v12 = vmul.f32 0.088388346, %v2778_v22 }
 0x64a   : > { %v2832_v9 = vadd.f32 %v2821_v16, %v2812_v12 }
 0x64c   : > { %v2850_v54 = vsel %vm1773_vm2, %v2832_v9, -inf }
 0x64d   : > { %2851 = vmax.xlane.f32.xlu1 %v2850_v54 }
 0x692   : > { %v2837_v30 = vpop.xlane.xlu2 %2836 }
 0x693   : > { %v2859_v32 = vsub.f32 %v2827_v45, %v2837_v30 }
 0x695   : > { %v2867_v34 = vmul.f32 1.442695, %v2859_v32 }
 0x697   : > { %5700 = vpow2.f32 %v2867_v34 }
 0x699   : > { %v2802_v27 = vpop.f32.mrf.mxu0 }
 0x69a   : > { %v2840_v38 = vpop.xlane.xlu0 %2839  ;;  %v2813_v39 = vmul.f32 0.088388346, %v2802_v27 }
 0x69b   : > { %v2860_v62 = vsub.f32 %v2828_v58, %v2840_v38 }
 0x69c   : > { %v2833_v56 = vadd.f32 %v2822_v1, %v2813_v39 }
 0x69d   : > { %v6969_v14 = vpop.eup %5700  ;;  %v2869_v41 = vmul.f32 1.442695, %v2860_v62 }
 0x69e   : > { %v2883_v37 = vsel %vm1773_vm2, %v6969_v14, 0.0  ;;  %v2853_v46 = vsel %vm1773_vm2, %v2833_v56, -inf }
 0x69f   : > { %5702 = vpow2.f32 %v2869_v41  ;;  %2884 = vadd.xlane.f32.xlu1 %v2883_v37  ;;  %2854 = vmax.xlane.f32.xlu2 %v2853_v46 }
 0x6a1   : > { %v2804_v48 = vpop.f32.mrf.mxu0 }
 0x6a2   : > { %v2814_v28 = vmul.f32 0.088388346, %v2804_v48 }
 0x6a4   : > { %v2834_v40 = vadd.f32 %v2822_v1, %v2814_v28 }
 0x6a5   : > { %v6974_v6 = vpop.eup %5702 }
 0x6a6   : > { %v2886_v4 = vsel %vm1773_vm2, %v6974_v6, 0.0  ;;  %v2856_v49 = vsel %vm1773_vm2, %v2834_v40, -inf }
 0x6a7   : > { %2857 = vmax.xlane.f32.xlu0 %v2856_v49  ;;  %2887 = vadd.xlane.f32.xlu2 %v2886_v4 }
 0x6a8   : > { %v2843_v21 = vpop.xlane.xlu1 %2842 }
 0x6a9   : > { %v2861_v50 = vsub.f32 %v2829_v31, %v2843_v21 }
 0x6ab   : > { %v2871_v53 = vmul.f32 1.442695, %v2861_v50 }
 0x6ad   : > { %5704 = vpow2.f32 %v2871_v53 }
 0x6b0   : > { %v2846_v45 = vpop.xlane.xlu2 %2845 }
 0x6b1   : > { %v2862_v52 = vsub.f32 %v2830_v11, %v2846_v45 }
 0x6b3   : > { %v6979_v55 = vpop.eup %5704  ;;  %v2873_v35 = vmul.f32 1.442695, %v2862_v52 }
 0x6b4   : > { %v2889_v57 = vsel %vm1773_vm2, %v6979_v55, 0.0 }
 0x6b5   : > { %5706 = vpow2.f32 %v2873_v35  ;;  %2890 = vadd.xlane.f32.xlu0 %v2889_v57 }
 0x6b8   : > { %v2849_v58 = vpop.xlane.xlu0 %2848 }
 0x6b9   : > { %v2863_v43 = vsub.f32 %v2831_v19, %v2849_v58 }
 0x6bb   : > { %v6983_v59 = vpop.eup %5706  ;;  %v2875_v60 = vmul.f32 1.442695, %v2863_v43 }
 0x6bc   : > { %v2892_v5 = vsel %vm1773_vm2, %v6983_v59, 0.0 }
 0x6bd   : > { %5708 = vpow2.f32 %v2875_v60  ;;  %2893 = vadd.xlane.f32.xlu1 %v2892_v5 }
 0x6c0   : > { %v2852_v2 = vpop.xlane.xlu1 %2851 }
 0x6c1   : > { %v2864_v36 = vsub.f32 %v2832_v9, %v2852_v2 }
 0x6c3   : > { %v6987_v31 = vpop.eup %5708  ;;  %v2877_v13 = vmul.f32 1.442695, %v2864_v36 }
 0x6c4   : > { %v2895_v8 = vsel %vm1773_vm2, %v6987_v31, 0.0 }
 0x6c5   : > { %5710 = vpow2.f32 %v2877_v13  ;;  %2896 = vadd.xlane.f32.xlu2 %v2895_v8 }
 0x6cb   : > { %v6991_v44 = vpop.eup %5710 }
 0x6cc   : > { %v2898_v10 = vsel %vm1773_vm2, %v6991_v44, 0.0 }
 0x6cd   : > { %2899 = vadd.xlane.f32.xlu0 %v2898_v10 }
 0x712   : > { %v2885_v61 = vpop.xlane.xlu1 %2884  ;;  %v2855_v11 = vpop.xlane.xlu2 %2854 }
 0x713   : > { %5712 = vrcp.f32 %v2885_v61  ;;  %v2865_v51 = vsub.f32 %v2833_v56, %v2855_v11  ;;  %v2918_v30 = vand.u32 2147483648, %v2885_v61  ;;  %vm2912_vm0 = vweird.f32 %v2885_v61 }
 0x714   : > { %v2916_v32 = vand.u32 2147483647, %v2885_v61 }
 0x715   : > { %v2879_v15 = vmul.f32 1.442695, %v2865_v51  ;;  %v2919_v27 = vor.u32 1.1754944e-38, %v2918_v30 }
 0x716   : > { %vm2917_vm3 = vcmp.eq.f32.partialorder %v2916_v32, 8.507059e+37 }
 0x717   : > { %5714 = vpow2.f32 %v2879_v15 }
 0x719   : > { %v5713_v16 = vpop.eup %5712 }
 0x71a   : > { %v2908_v47 = vmul.f32 %v5713_v16, %v2885_v61  ;;  %v2888_v18 = vpop.xlane.xlu2 %2887  ;;  %v2858_v19 = vpop.xlane.xlu0 %2857  ;;  %vm2913_vm15 = vweird.f32 %v5713_v16 }
 0x71b   : > { %5716 = vrcp.f32 %v2888_v18  ;;  %v2866_v22 = vsub.f32 %v2834_v40, %v2858_v19  ;;  %vm2914_vm1 = vmor %vm2912_vm0, %vm2913_vm15  ;;  %v2932_v62 = vand.u32 2147483648, %v2888_v18  ;;  %v2930_v37 = vand.u32 2147483647, %v2888_v18 }
 0x71c   : > { %v2909_v20 = vsub.f32 1.0, %v2908_v47  ;;  %vm2926_vm5 = vweird.f32 %v2888_v18 }
 0x71d   : > { %v6995_v12 = vpop.eup %5714  ;;  %v2881_v54 = vmul.f32 1.442695, %v2866_v22  ;;  %v2933_v4 = vor.u32 1.1754944e-38, %v2932_v62  ;;  %vm2931_vm7 = vcmp.eq.f32.partialorder %v2930_v37, 8.507059e+37 }
 0x71e   : > { %v2910_v9 = vmul.f32 %v5713_v16, %v2909_v20  ;;  %v2901_v25 = vsel %vm1773_vm2, %v6995_v12, 0.0 }
 0x71f   : > { %2902 = vadd.xlane.f32.xlu1 %v2901_v25  ;;  %5718 = vpow2.f32 %v2881_v54 }
 0x720   : > { %v2911_v29 = vadd.f32 %v5713_v16, %v2910_v9 }
 0x721   : > { %v5717_v34 = vpop.eup %5716 }
 0x722   : > { %v2915_v24 = vsel %vm2914_vm1, %v5713_v16, %v2911_v29  ;;  %v2922_v1 = vmul.f32 %v5717_v34, %v2888_v18  ;;  %vm2927_vm4 = vweird.f32 %v5717_v34 }
 0x723   : > { %v2920_v39 = vsel %vm2917_vm3, %v2919_v27, %v2915_v24  ;;  %vm2928_vm6 = vmor %vm2926_vm5, %vm2927_vm4 }
 0x724   : > { %v2923_v38 = vsub.f32 1.0, %v2922_v1  ;;  %v3019_v28 = vmul.f32 %v6969_v14, %v2920_v39 }
 0x725   : > { %v6999_v41 = vpop.eup %5718 }
 0x726   : > { %v2924_v56 = vmul.f32 %v5717_v34, %v2923_v38  ;;  %v2904_v46 = vsel %vm1773_vm2, %v6999_v41, 0.0  ;;  %v3027_v50 = vpack.c.bf16 %v3019_v28, %v3019_v28 }
 0x727   : > { %2905 = vadd.xlane.f32.xlu2 %v2904_v46 }
 0x728   : > { %v2891_v48 = vpop.xlane.xlu0 %2890  ;;  %v2925_v40 = vadd.f32 %v5717_v34, %v2924_v56  ;;  %v3045_v58 = vunpack.c.l.b16 %v3027_v50 }
 0x729   : > { %5720 = vrcp.f32 %v2891_v48  ;;  %v2946_v2 = vand.u32 2147483648, %v2891_v48  ;;  %vm2940_vm9 = vweird.f32 %v2891_v48  ;;  %v2944_v13 = vand.u32 2147483647, %v2891_v48 }
 0x72a   : > { %v2929_v49 = vsel %vm2928_vm6, %v5717_v34, %v2925_v40 }
 0x72b   : > { %v2934_v21 = vsel %vm2931_vm7, %v2933_v4, %v2929_v49  ;;  %v2947_v11 = vor.u32 1.1754944e-38, %v2946_v2  ;;  %vm2945_vm11 = vcmp.eq.f32.partialorder %v2944_v13, 8.507059e+37  ;;  %v5453_v13 = vld [vmem:[%s7563_s12 + $0x28] sm:$0xff] }
 0x72c   : > { %v3020_v53 = vmul.f32 %v6974_v6, %v2934_v21 }
 0x72e   : > { %v3028_v52 = vpack.c.bf16 %v3020_v53, %v3020_v53 }
 0x72f   : > { %v5721_v45 = vpop.eup %5720 }
 0x730   : > { %v2936_v35 = vmul.f32 %v5721_v45, %v2891_v48  ;;  %v2894_v57 = vpop.xlane.xlu1 %2893  ;;  %v3046_v43 = vunpack.c.l.b16 %v3028_v52  ;;  %vm2941_vm8 = vweird.f32 %v5721_v45 }
 0x731   : > { %5722 = vrcp.f32 %v2894_v57  ;;  %vm2942_vm10 = vmor %vm2940_vm9, %vm2941_vm8  ;;  %v2960_v16 = vand.u32 2147483648, %v2894_v57  ;;  %v2958_v18 = vand.u32 2147483647, %v2894_v57  ;;  %vm2954_vm13 = vweird.f32 %v2894_v57 }
 0x732   : > { %v2937_v14 = vsub.f32 1.0, %v2936_v35  ;;  %v3047_v60 = vpack.c.b16 %v3046_v43, %v3045_v58 }
 0x733   : > { %v2961_v9 = vor.u32 1.1754944e-38, %v2960_v16  ;;  %vm2959_vm15 = vcmp.eq.f32.partialorder %v2958_v18, 8.507059e+37 }
 0x734   : > { %v2938_v5 = vmul.f32 %v5721_v45, %v2937_v14  ;;  %5085 = vmatmul.msk.bf16.vlgmr.msrb.gmra.mxu1 %vm1773_vm2, %v3047_v60 }
 0x736   : > { %v2939_v36 = vadd.f32 %v5721_v45, %v2938_v5 }
 0x737   : > { %v5723_v8 = vpop.eup %5722 }
 0x738   : > { %v2943_v6 = vsel %vm2942_vm10, %v5721_v45, %v2939_v36  ;;  %v2950_v10 = vmul.f32 %v5723_v8, %v2894_v57  ;;  %v2897_v61 = vpop.xlane.xlu2 %2896  ;;  %vm2955_vm12 = vweird.f32 %v5723_v8  ;;  %v5454_v36 = vld [vmem:[%s7563_s12 + $0x30] sm:$0xff] }
 0x739   : > { %5724 = vrcp.f32 %v2897_v61  ;;  %v2948_v15 = vsel %vm2945_vm11, %v2947_v11, %v2943_v6  ;;  %vm2956_vm14 = vmor %vm2954_vm13, %vm2955_vm12  ;;  %vm2968_vm1 = vweird.f32 %v2897_v61  ;;  %v2972_v56 = vand.u32 2147483647, %v2897_v61  ;;  %v5451_v6 = vld [vmem:[%s7563_s12 + $0x18] sm:$0xff] }
 0x73a   : > { %v2951_v51 = vsub.f32 1.0, %v2950_v10  ;;  %v3021_v19 = vmul.f32 %v6979_v55, %v2948_v15  ;;  %v2974_v55 = vand.u32 2147483648, %v2897_v61 }
 0x73b   : > { %vm2973_vm4 = vcmp.eq.f32.partialorder %v2972_v56, 8.507059e+37 }
 0x73c   : > { %v2952_v47 = vmul.f32 %v5723_v8, %v2951_v51  ;;  %v3029_v32 = vpack.c.bf16 %v3021_v19, %v3021_v19  ;;  %v2975_v40 = vor.u32 1.1754944e-38, %v2974_v55  ;;  %v5448_v51 = vld [vmem:[%s7563_s12] sm:$0xff] }
 0x73e   : > { %v2953_v20 = vadd.f32 %v5723_v8, %v2952_v47  ;;  %v3073_v38 = vunpack.c.l.b16 %v3029_v32 }
 0x73f   : > { %v5725_v22 = vpop.eup %5724 }
 0x740   : > { %v2957_v54 = vsel %vm2956_vm14, %v5723_v8, %v2953_v20  ;;  %v2964_v25 = vmul.f32 %v5725_v22, %v2897_v61  ;;  %v2900_v29 = vpop.xlane.xlu0 %2899  ;;  %vm2969_vm0 = vweird.f32 %v5725_v22  ;;  %v5452_v8 = vld [vmem:[%s7563_s12 + $0x20] sm:$0xff]  ;;  %v5449_v61 = vld [vmem:[%s7563_s12 + $0x8] sm:$0xff] }
 0x741   : > { %v2962_v30 = vsel %vm2959_vm15, %v2961_v9, %v2957_v54  ;;  %5726 = vrcp.f32 %v2900_v29  ;;  %vm2970_vm3 = vmor %vm2968_vm1, %vm2969_vm0  ;;  %v2988_v49 = vand.u32 2147483648, %v2900_v29  ;;  %v2986_v50 = vand.u32 2147483647, %v2900_v29 }
 0x742   : > { %v3022_v34 = vmul.f32 %v6983_v59, %v2962_v30  ;;  %v2965_v24 = vsub.f32 1.0, %v2964_v25  ;;  %vm2982_vm6 = vweird.f32 %v2900_v29 }
 0x743   : > { %v2989_v52 = vor.u32 1.1754944e-38, %v2988_v49  ;;  %vm2987_vm8 = vcmp.eq.f32.partialorder %v2986_v50, 8.507059e+37 }
 0x744   : > { %v3030_v1 = vpack.c.bf16 %v3022_v34, %v3022_v34  ;;  %v2966_v27 = vmul.f32 %v5725_v22, %v2965_v24 }
 0x746   : > { %v3074_v39 = vunpack.c.l.b16 %v3030_v1  ;;  %v2967_v62 = vadd.f32 %v5725_v22, %v2966_v27 }
 0x747   : > { %v5727_v37 = vpop.eup %5726 }
 0x748   : > { %v2971_v46 = vsel %vm2970_vm3, %v5725_v22, %v2967_v62  ;;  %v2978_v48 = vmul.f32 %v5727_v37, %v2900_v29  ;;  %v3075_v28 = vpack.c.b16 %v3074_v39, %v3073_v38  ;;  %vm2983_vm5 = vweird.f32 %v5727_v37 }
 0x749   : > { %v2976_v59 = vsel %vm2973_vm4, %v2975_v40, %v2971_v46  ;;  %vm2984_vm7 = vmor %vm2982_vm6, %vm2983_vm5 }
 0x74a   : > { %v2979_v4 = vsub.f32 1.0, %v2978_v48  ;;  %5086 = vmatmul.msk.bf16.vlgmr.msra.gmra.mxu2 %vm1773_vm2, %v3075_v28  ;;  %v3023_v53 = vmul.f32 %v6987_v31, %v2976_v59  ;;  %v5455_v31 = vld [vmem:[%s7563_s12 + $0x38] sm:$0xff] }
 0x74b   : > { %3227 = vmatpush.bf16.msra.mxu1 %v5455_v31 }
 0x74c   : > { %v2980_v21 = vmul.f32 %v5727_v37, %v2979_v4  ;;  %v3031_v58 = vpack.c.bf16 %v3023_v53, %v3023_v53 }
 0x74e   : > { %v2981_v45 = vadd.f32 %v5727_v37, %v2980_v21  ;;  %v3101_v60 = vunpack.c.l.b16 %v3031_v58 }
 0x74f   : > { %3228 = vmatpush.bf16.msra.mxu1 %v5454_v36 }
 0x750   : > { %v2985_v35 = vsel %vm2984_vm7, %v5727_v37, %v2981_v45 }
 0x751   : > { %v2990_v57 = vsel %vm2987_vm8, %v2989_v52, %v2985_v35  ;;  %v5644_v35 = vld [vmem:[%s7565_s14] ss:$0 sm:$0xff] }
 0x752   : > { %v3024_v43 = vmul.f32 %v6991_v44, %v2990_v57  ;;  %v5450_v44 = vld [vmem:[%s7563_s12 + $0x10] sm:$0xff] }
 0x753   : > { %3229 = vmatpush.bf16.msra.mxu1 %v5453_v13 }
 0x754   : > { %v3032_v14 = vpack.c.bf16 %v3024_v43, %v3024_v43 }
 0x756   : > { %v3102_v5 = vunpack.c.l.b16 %v3032_v14 }
 0x757   : > { %3230 = vmatpush.bf16.msra.mxu1 %v5452_v8 }
 0x758   : > { %v3103_v2 = vpack.c.b16 %v3102_v5, %v3101_v60 }
 0x75a   : > { %5087 = vmatmul.msk.bf16.vlgmr.msrb.gmra.mxu3 %vm1773_vm2, %v3103_v2 }
 0x75b   : > { %3231 = vmatpush.bf16.msra.mxu1 %v5451_v6 }
 0x75f   : > { %3232 = vmatpush.bf16.msra.mxu1 %v5450_v44 }
 0x763   : > { %3233 = vmatpush.bf16.msra.mxu1 %v5449_v61 }
 0x767   : > { %3234 = vmatpush.bf16.msra.mxu1 %v5448_v51 }
 0x792   : > { %v2903_v10 = vpop.xlane.xlu1 %2902 }
 0x793   : > { %5728 = vrcp.f32 %v2903_v10  ;;  %v3002_v20 = vand.u32 2147483648, %v2903_v10  ;;  %vm2996_vm10 = vweird.f32 %v2903_v10  ;;  %v3000_v22 = vand.u32 2147483647, %v2903_v10 }
 0x795   : > { %v3003_v29 = vor.u32 1.1754944e-38, %v3002_v20  ;;  %vm3001_vm12 = vcmp.eq.f32.partialorder %v3000_v22, 8.507059e+37 }
 0x799   : > { %v5729_v11 = vpop.eup %5728 }
 0x79a   : > { %v2992_v15 = vmul.f32 %v5729_v11, %v2903_v10  ;;  %v2906_v16 = vpop.xlane.xlu2 %2905  ;;  %vm2997_vm9 = vweird.f32 %v5729_v11 }
 0x79b   : > { %5730 = vrcp.f32 %v2906_v16  ;;  %vm2998_vm11 = vmor %vm2996_vm10, %vm2997_vm9  ;;  %v3016_v34 = vand.u32 2147483648, %v2906_v16  ;;  %v3014_v1 = vand.u32 2147483647, %v2906_v16  ;;  %vm3010_vm14 = vweird.f32 %v2906_v16 }
 0x79c   : > { %v2993_v47 = vsub.f32 1.0, %v2992_v15 }
 0x79d   : > { %v3017_v38 = vor.u32 1.1754944e-38, %v3016_v34  ;;  %vm3015_vm0 = vcmp.eq.f32.partialorder %v3014_v1, 8.507059e+37 }
 0x79e   : > { %v2994_v18 = vmul.f32 %v5729_v11, %v2993_v47 }
 0x7a0   : > { %v2995_v19 = vadd.f32 %v5729_v11, %v2994_v18 }
 0x7a1   : > { %v5731_v9 = vpop.eup %5730 }
 0x7a2   : > { %v2999_v54 = vsel %vm2998_vm11, %v5729_v11, %v2995_v19  ;;  %v3006_v25 = vmul.f32 %v5731_v9, %v2906_v16  ;;  %vm3011_vm13 = vweird.f32 %v5731_v9 }
 0x7a3   : > { %v3004_v32 = vsel %vm3001_vm12, %v3003_v29, %v2999_v54  ;;  %vm3012_vm15 = vmor %vm3010_vm14, %vm3011_vm13 }
 0x7a4   : > { %v3007_v30 = vsub.f32 1.0, %v3006_v25  ;;  %v3025_v27 = vmul.f32 %v6995_v12, %v3004_v32 }
 0x7a6   : > { %v3008_v24 = vmul.f32 %v5731_v9, %v3007_v30  ;;  %v3033_v56 = vpack.c.bf16 %v3025_v27, %v3025_v27 }
 0x7a8   : > { %v3009_v55 = vadd.f32 %v5731_v9, %v3008_v24  ;;  %v3129_v48 = vunpack.c.l.b16 %v3033_v56 }
 0x7aa   : > { %v3013_v39 = vsel %vm3012_vm15, %v5731_v9, %v3009_v55 }
 0x7ab   : > { %v3018_v62 = vsel %vm3015_vm0, %v3017_v38, %v3013_v39 }
 0x7ac   : > { %v3026_v37 = vmul.f32 %v6999_v41, %v3018_v62 }
 0x7ae   : > { %v3034_v46 = vpack.c.bf16 %v3026_v37, %v3026_v37 }
 0x7b0   : > { %v3130_v28 = vunpack.c.l.b16 %v3034_v46 }
 0x7b1   : > { %v3066_v40 = vpop.f32.mrf.mxu1 }
 0x7b2   : > { %v3131_v4 = vpack.c.b16 %v3130_v28, %v3129_v48  ;;  %v5235_v28 = vld [vmem:[%s7566_s25 + $0xe0] sm:$0xf] }
 0x7b4   : > { %5088 = vmatmul.msk.bf16.vlgmr.msra.gmra.mxu0 %vm1773_vm2, %v3131_v4  ;;  %v5484_v4 = vld [vmem:[%s7566_s25 + $0xe4] sm:$0xf] }
 0x7b9   : > { %v3068_v59 = vpop.f32.mrf.mxu1 }
 0x7ba   : > { %v3155_v12 = vpack.c.bf16 %v3068_v59, %v3066_v40  ;;  %v5486_v40 = vld [vmem:[%s7566_s25 + $0xec] sm:$0xf0] }
 0x7bb   : > { %v5236_v59 = vor.u32 %v5486_v40, %v5235_v28 }
 0x7bc   : > { %3235 = vmatmul.bf16.vlgmr.msra.gmra.mxu1 %v3155_v12  ;;  %v5237_v12 = vld [vmem:[%s7566_s25 + $0xf0] sm:$0xf0] }
 0x7bd   : > { %3654 = vmatpush.bf16.msrb.mxu2 %v5236_v59  ;;  %v5181_v59 = vld [vmem:[%s7566_s25 + $0x78] sm:$0xf0] }
 0x7cd   : > { %v3094_v49 = vpop.f32.mrf.mxu2 }
 0x7d5   : > { %v3096_v21 = vpop.f32.mrf.mxu2 }
 0x7d6   : > { %v3156_v50 = vpack.c.bf16 %v3096_v21, %v3094_v49  ;;  %v5243_v49 = vld [vmem:[%s7566_s25 + $0xe8] sm:$0xf]  ;;  %v5487_v21 = vld [vmem:[%s7566_s25 + $0xf4] sm:$0xf0] }
 0x7d8   : > { %3240 = vmatmul.bf16.gmra.mxu1 %v3156_v50  ;;  %v5240_v50 = vor.u32 %v5484_v4, %v5237_v12  ;;  %v5469_v4 = vld [vmem:[%s7566_s25 + $0x6c] sm:$0xf] }
 0x7d9   : > { %v5184_v12 = vor.u32 %v5469_v4, %v5181_v59 }
 0x7da   : > { %3683 = vmatpush.bf16.msra.mxu3 %v5240_v50  ;;  %v5464_v50 = vld [vmem:[%s7566_s25 + $0x44] sm:$0xf] }
 0x7dd   : > { %v3122_v53 = vpop.f32.mrf.mxu3 }
 0x7e5   : > { %v3124_v45 = vpop.f32.mrf.mxu3 }
 0x7e6   : > { %v3157_v52 = vpack.c.bf16 %v3124_v45, %v3122_v53  ;;  %v5244_v53 = vor.u32 %v5487_v21, %v5243_v49  ;;  %v5485_v45 = vld [vmem:[%s7566_s25 + $0xec] sm:$0xf]  ;;  %v5155_v49 = vld [vmem:[%s7566_s25 + $0x40] sm:$0xf]  ;;  %v5466_v21 = vld [vmem:[%s7566_s25 + $0x4c] sm:$0xf0] }
 0x7e8   : > { %3245 = vmatmul.bf16.gmra.mxu1 %v3157_v52  ;;  %v5245_v52 = vld [vmem:[%s7566_s25 + $0xf8] sm:$0xf0]  ;;  %3712 = vmatpush.bf16.msrb.mxu0 %v5244_v53  ;;  %v5156_v53 = vor.u32 %v5466_v21, %v5155_v49 }
 0x831   : > { %v3150_v41 = vpop.f32.mrf.mxu0 }
 0x839   : > { %v3236_v57 = vpop.f32.mrf.mxu1  ;;  %v3152_v58 = vpop.f32.mrf.mxu0 }
 0x83a   : > { %v3237_v43 = vadd.f32 %v5644_v35, %v3236_v57  ;;  %v3158_v14 = vpack.c.bf16 %v3152_v58, %v3150_v41  ;;  %v5248_v41 = vor.u32 %v5485_v45, %v5245_v52  ;;  %v5482_v57 = vld [vmem:[%s7566_s25 + $0xcc] sm:$0xf0]  ;;  %v5480_v58 = vld [vmem:[%s7566_s25 + $0xc4] sm:$0xf]  ;;  %v5157_v45 = vld [vmem:[%s7566_s25 + $0x50] sm:$0xf0] }
 0x83b   : > { %v5163_v52 = vld [vmem:[%s7566_s25 + $0x48] sm:$0xf] }
 0x83c   : > { %v3256_v60 = vadd.f32 %v3237_v43, %v6838_v63  ;;  %3250 = vmatmul.bf16.gmra.mxu1 %v3158_v14  ;;  %v5221_v14 = vld [vmem:[%s7566_s25 + $0xd0] sm:$0xf0] }
 0x83d   : > { %3741 = vmatpush.bf16.msrb.mxu1 %v5248_v41  ;;  %v5467_v41 = vld [vmem:[%s7566_s25 + $0x54] sm:$0xf0] }
 0x83e   : > { %3264 = vadd.xlane.f32.xlu0 %v3256_v60 }
 0x841   : > { %v3238_v5 = vpop.f32.mrf.mxu1 }
 0x842   : > { %v3239_v2 = vadd.f32 %v5644_v35, %v3238_v5  ;;  %v5483_v5 = vld [vmem:[%s7566_s25 + $0xd4] sm:$0xf0] }
 0x844   : > { %v3257_v31 = vadd.f32 %v3239_v2, %v6841_v26  ;;  %v5224_v2 = vor.u32 %v5480_v58, %v5221_v14  ;;  %v5465_v58 = vld [vmem:[%s7566_s25 + $0x4c] sm:$0xf] }
 0x846   : > { %3266 = vadd.xlane.f32.xlu1 %v3257_v31  ;;  %3684 = vmatpush.bf16.msra.mxu3 %v5224_v2  ;;  %v5460_v2 = vld [vmem:[%s7566_s25 + $0x24] sm:$0xf] }
 0x855   : > { %v3241_v36 = vpop.f32.mrf.mxu1 }
 0x856   : > { %v3242_v13 = vadd.f32 %v5644_v35, %v3241_v36  ;;  %v5481_v36 = vld [vmem:[%s7566_s25 + $0xcc] sm:$0xf] }
 0x858   : > { %v3258_v8 = vadd.f32 %v3242_v13, %v6876_v33  ;;  %v5229_v13 = vld [vmem:[%s7566_s25 + $0xd8] sm:$0xf0] }
 0x85a   : > { %3268 = vadd.xlane.f32.xlu2 %v3258_v8 }
 0x85d   : > { %v3243_v6 = vpop.f32.mrf.mxu1 }
 0x85e   : > { %v3244_v44 = vadd.f32 %v5644_v35, %v3243_v6  ;;  %v5203_v6 = vld [vmem:[%s7566_s25 + $0xa0] sm:$0xf] }
 0x860   : > { %v3259_v10 = vadd.f32 %v3244_v44, %v6879_v42  ;;  %v5478_v44 = vld [vmem:[%s7566_s25 + $0xac] sm:$0xf0] }
 0x862   : > { %3270 = vadd.xlane.f32.xlu0 %v3259_v10 }
 0x865   : > { %v3246_v61 = vpop.f32.mrf.mxu1 }
 0x866   : > { %v3247_v11 = vadd.f32 %v5644_v35, %v3246_v61  ;;  %v5204_v61 = vor.u32 %v5478_v44, %v5203_v6  ;;  %v5463_v6 = vld [vmem:[%s7566_s25 + $0x34] sm:$0xf0] }
 0x868   : > { %v3260_v63 = vadd.f32 %v3247_v11, %v6905_v23  ;;  %v5205_v11 = vld [vmem:[%s7566_s25 + $0xb0] sm:$0xf0] }
 0x86a   : > { %3272 = vadd.xlane.f32.xlu1 %v3260_v63 }
 0x86d   : > { %v3248_v51 = vpop.f32.mrf.mxu1 }
 0x86e   : > { %v3249_v15 = vadd.f32 %v5644_v35, %v3248_v51  ;;  %v5479_v51 = vld [vmem:[%s7566_s25 + $0xb4] sm:$0xf0] }
 0x870   : > { %v3261_v26 = vadd.f32 %v3249_v15, %v6908_v17 }
 0x872   : > { %3274 = vadd.xlane.f32.xlu2 %v3261_v26 }
 0x8b1   : > { %v3265_v16 = vpop.xlane.xlu0 %3264 }
 0x8b2   : > { %v3280_v47 = vmul.f32 %v3265_v16, %v6723_v0  ;;  %v5477_v16 = vld [vmem:[%s7566_s25 + $0xac] sm:$0xf] }
 0x8b4   : > { %v7035_v33 = vsub.f32 %v3256_v60, %v3280_v47  ;;  %v5227_v60 = vld [vmem:[%s7566_s25 + $0xc8] sm:$0xf]  ;;  %v5213_v47 = vld [vmem:[%s7566_s25 + $0xb8] sm:$0xf0] }
 0x8b6   : > { %v3296_v18 = vmul.f32 %v7035_v33, %v7035_v33 }
 0x8b8   : > { %3304 = vadd.xlane.f32.xlu0 %v3296_v18  ;;  %v5216_v18 = vor.u32 %v5477_v16, %v5213_v47  ;;  %v5458_v16 = vld [vmem:[%s7566_s25 + $0xc] sm:$0xf0] }
 0x8b9   : > { %v3267_v42 = vpop.xlane.xlu1 %3266  ;;  %v3251_v20 = vpop.f32.mrf.mxu1 }
 0x8ba   : > { %v3281_v19 = vmul.f32 %v3267_v42, %v6723_v0  ;;  %v3252_v23 = vadd.f32 %v5644_v35, %v3251_v20  ;;  %v5187_v42 = vld [vmem:[%s7566_s25 + $0x80] sm:$0xf]  ;;  %v5472_v20 = vld [vmem:[%s7566_s25 + $0x84] sm:$0xf] }
 0x8bc   : > { %v7040_v22 = vsub.f32 %v3257_v31, %v3281_v19  ;;  %v7043_v9 = vadd.f32 %v3252_v23, %v6924_v7  ;;  %v5228_v31 = vor.u32 %v5483_v5, %v5227_v60  ;;  %v5474_v19 = vld [vmem:[%s7566_s25 + $0x8c] sm:$0xf0]  ;;  %v5139_v60 = vld [vmem:[%s7566_s25 + $0x20] sm:$0xf] }
 0x8bd   : > { %v5188_v23 = vor.u32 %v5474_v19, %v5187_v42  ;;  %v5462_v5 = vld [vmem:[%s7566_s25 + $0x2c] sm:$0xf0]  ;;  %v5125_v42 = vld [vmem:[%s7566_s25 + $0x10] sm:$0xf0]  ;;  %v5131_v19 = vld [vmem:[%s7566_s25 + $0x8] sm:$0xf] }
 0x8be   : > { %v3297_v17 = vmul.f32 %v7040_v22, %v7040_v22  ;;  %3276 = vadd.xlane.f32.xlu2 %v7043_v9  ;;  %3713 = vmatpush.bf16.msrb.mxu0 %v5228_v31 }
 0x8c0   : > { %3306 = vadd.xlane.f32.xlu1 %v3297_v17  ;;  %v5189_v17 = vld [vmem:[%s7566_s25 + $0x90] sm:$0xf0] }
 0x8c1   : > { %v3253_v54 = vpop.f32.mrf.mxu1 }
 0x8c2   : > { %v3254_v25 = vadd.f32 %v5644_v35, %v3253_v54  ;;  %v5219_v35 = vld [vmem:[%s7566_s25 + $0xc0] sm:$0xf]  ;;  %v5195_v54 = vld [vmem:[%s7566_s25 + $0x88] sm:$0xf] }
 0x8c3   : > { %v5220_v43 = vor.u32 %v5482_v57, %v5219_v35  ;;  %v5160_v35 = vor.u32 %v5464_v50, %v5157_v45  ;;  %v5164_v57 = vor.u32 %v5467_v41, %v5163_v52 }
 0x8c4   : > { %v7049_v29 = vadd.f32 %v3254_v25, %v6927_v3  ;;  %v5475_v25 = vld [vmem:[%s7566_s25 + $0x94] sm:$0xf0] }
 0x8c5   : > { %3655 = vmatpush.bf16.msrb.mxu2 %v5220_v43  ;;  %v5165_v43 = vld [vmem:[%s7566_s25 + $0x58] sm:$0xf0] }
 0x8c6   : > { %3278 = vadd.xlane.f32.xlu0 %v7049_v29  ;;  %v5168_v14 = vor.u32 %v5465_v58, %v5165_v43 }
 0x8c9   : > { %3656 = vmatpush.bf16.msrb.mxu2 %v5204_v61 }
 0x8cd   : > { %v3269_v30 = vpop.xlane.xlu2 %3268  ;;  %3657 = vmatpush.bf16.msrb.mxu2 %v5188_v23  ;;  %v5459_v23 = vld [vmem:[%s7566_s25 + $0x14] sm:$0xf0] }
 0x8ce   : > { %v3282_v32 = vmul.f32 %v3269_v30, %v6723_v0  ;;  %v5192_v30 = vor.u32 %v5472_v20, %v5189_v17  ;;  %v5457_v17 = vld [vmem:[%s7566_s25 + $0xc] sm:$0xf] }
 0x8d0   : > { %v7053_v34 = vsub.f32 %v3258_v8, %v3282_v32  ;;  %v5232_v8 = vor.u32 %v5481_v36, %v5229_v13  ;;  %v5196_v32 = vor.u32 %v5475_v25, %v5195_v54  ;;  %v5140_v36 = vor.u32 %v5462_v5, %v5139_v60  ;;  %v5141_v13 = vld [vmem:[%s7566_s25 + $0x30] sm:$0xf0]  ;;  %v5133_v54 = vld [vmem:[%s7566_s25 + $0x18] sm:$0xf0]  ;;  %v7164_v60 = vld [vmem:[%s1271_s23] ss:$0 sm:$0xff] }
 0x8d1   : > { %v5132_v25 = vor.u32 %v5459_v23, %v5131_v19 }
 0x8d2   : > { %v3298_v7 = vmul.f32 %v7053_v34, %v7053_v34  ;;  %3742 = vmatpush.bf16.msrb.mxu1 %v5232_v8  ;;  %v5147_v8 = vld [vmem:[%s7566_s25 + $0x28] sm:$0xf] }
 0x8d3   : > { %v5148_v61 = vor.u32 %v5463_v6, %v5147_v8 }
 0x8d4   : > { %3308 = vadd.xlane.f32.xlu1 %v3298_v7  ;;  %v5473_v7 = vld [vmem:[%s7566_s25 + $0x8c] sm:$0xf] }
 0x8d5   : > { %v3271_v24 = vpop.xlane.xlu0 %3270 }
 0x8d6   : > { %v3283_v1 = vmul.f32 %v3271_v24, %v6723_v0  ;;  %3743 = vmatpush.bf16.msrb.mxu1 %v5216_v18  ;;  %v5197_v24 = vld [vmem:[%s7566_s25 + $0x98] sm:$0xf0]  ;;  %v5456_v18 = vld [vmem:[%s7566_s25 + $0x4] sm:$0xf] }
 0x8d7   : > { %v5128_v20 = vor.u32 %v5456_v18, %v5125_v42 }
 0x8d8   : > { %v7058_v27 = vsub.f32 %v3259_v10, %v3283_v1  ;;  %v5476_v10 = vld [vmem:[%s7566_s25 + $0xa4] sm:$0xf]  ;;  %v5200_v1 = vor.u32 %v5473_v7, %v5197_v24 }
 0x8d9   : > { %v5208_v15 = vor.u32 %v5476_v10, %v5205_v11  ;;  %v5144_v10 = vor.u32 %v5460_v2, %v5141_v13  ;;  %v5461_v11 = vld [vmem:[%s7566_s25 + $0x2c] sm:$0xf] }
 0x8da   : > { %v3299_v3 = vmul.f32 %v7058_v27, %v7058_v27  ;;  %3744 = vmatpush.bf16.msrb.mxu1 %v5200_v1 }
 0x8db   : > { %3685 = vmatpush.bf16.msra.mxu3 %v5208_v15 }
 0x8dc   : > { %3310 = vadd.xlane.f32.xlu2 %v3299_v3  ;;  %v5171_v3 = vld [vmem:[%s7566_s25 + $0x60] sm:$0xf] }
 0x8dd   : > { %v3273_v55 = vpop.xlane.xlu1 %3272 }
 0x8de   : > { %v3284_v38 = vmul.f32 %v3273_v55, %v6723_v0  ;;  %v5470_v55 = vld [vmem:[%s7566_s25 + $0x6c] sm:$0xf0]  ;;  %3745 = vmatpush.bf16.msrb.mxu1 %v5184_v12 }
 0x8df   : > { %3686 = vmatpush.bf16.msra.mxu3 %v5192_v30  ;;  %v5136_v30 = vor.u32 %v5457_v17, %v5133_v54 }
 0x8e0   : > { %v7063_v39 = vsub.f32 %v3260_v63, %v3284_v38  ;;  %v5211_v63 = vld [vmem:[%s7566_s25 + $0xa8] sm:$0xf]  ;;  %v5468_v38 = vld [vmem:[%s7566_s25 + $0x64] sm:$0xf] }
 0x8e2   : > { %v3300_v62 = vmul.f32 %v7063_v39, %v7063_v39  ;;  %3746 = vmatpush.bf16.msrb.mxu1 %v5168_v14 }
 0x8e4   : > { %3312 = vadd.xlane.f32.xlu0 %v3300_v62  ;;  %v5172_v62 = vor.u32 %v5470_v55, %v5171_v3 }
 0x8e5   : > { %v3275_v56 = vpop.xlane.xlu2 %3274 }
 0x8e6   : > { %v3285_v37 = vmul.f32 %v3275_v56, %v6723_v0  ;;  %v5173_v56 = vld [vmem:[%s7566_s25 + $0x70] sm:$0xf0]  ;;  %3658 = vmatpush.bf16.msrb.mxu2 %v5172_v62 }
 0x8e7   : > { %v5176_v28 = vor.u32 %v5468_v38, %v5173_v56 }
 0x8e8   : > { %v7068_v46 = vsub.f32 %v3261_v26, %v3285_v37  ;;  %v5212_v26 = vor.u32 %v5479_v51, %v5211_v63  ;;  %v5179_v37 = vld [vmem:[%s7566_s25 + $0x68] sm:$0xf]  ;;  %v5149_v63 = vld [vmem:[%s7566_s25 + $0x38] sm:$0xf0] }
 0x8e9   : > { %3687 = vmatpush.bf16.msra.mxu3 %v5176_v28  ;;  %v5152_v51 = vor.u32 %v5461_v11, %v5149_v63 }
 0x8ea   : > { %v3301_v48 = vmul.f32 %v7068_v46, %v7068_v46  ;;  %3714 = vmatpush.bf16.msrb.mxu0 %v5212_v26  ;;  %3659 = vmatpush.bf16.msrb.mxu2 %v5156_v53  ;;  %v5123_v26 = vld [vmem:[%s7566_s25] sm:$0xf] }
 0x8eb   : > { %3747 = vmatpush.bf16.msrb.mxu1 %v5152_v51  ;;  %v5124_v47 = vor.u32 %v5458_v16, %v5123_v26 }
 0x8ec   : > { %3314 = vadd.xlane.f32.xlu1 %v3301_v48  ;;  %v5471_v48 = vld [vmem:[%s7566_s25 + $0x74] sm:$0xf0] }
 0x8ed   : > { %v5180_v40 = vor.u32 %v5471_v48, %v5179_v37  ;;  %3688 = vmatpush.bf16.msra.mxu3 %v5160_v35 }
 0x8ee   : > { %3715 = vmatpush.bf16.msrb.mxu0 %v5196_v32  ;;  %3660 = vmatpush.bf16.msrb.mxu2 %v5140_v36 }
 0x8ef   : > { %3748 = vmatpush.bf16.msrb.mxu1 %v5136_v30 }
 0x8f1   : > { %3689 = vmatpush.bf16.msra.mxu3 %v5144_v10 }
 0x8f2   : > { %3716 = vmatpush.bf16.msrb.mxu0 %v5180_v40  ;;  %3661 = vmatpush.bf16.msrb.mxu2 %v5124_v47 }
 0x8f5   : > { %3690 = vmatpush.bf16.msra.mxu3 %v5128_v20 }
 0x8f6   : > { %3717 = vmatpush.bf16.msrb.mxu0 %v5164_v57 }
 0x8fa   : > { %3718 = vmatpush.bf16.msrb.mxu0 %v5148_v61 }
 0x8fe   : > { %3719 = vmatpush.bf16.msrb.mxu0 %v5132_v25 }
 0x92b   : > { %v3305_v31 = vpop.xlane.xlu0 %3304 }
 0x92c   : > { %v3320_v44 = vmul.f32 %v3305_v31, %v6723_v0 }
 0x92e   : > { %v3328_v15 = vadd.f32 1e-05, %v3320_v44 }
 0x930   : > { %5732 = vrsqrt.f32 %v3328_v15  ;;  %vm3342_vm1 = vweird.f32 %v3328_v15 }
 0x931   : > { %v3277_v32 = vpop.xlane.xlu2 %3276 }
 0x932   : > { %v3286_v7 = vmul.f32 %v3277_v32, %v6723_v0 }
 0x933   : > { %v3307_v24 = vpop.xlane.xlu1 %3306 }
 0x934   : > { %v3321_v1 = vmul.f32 %v3307_v24, %v6723_v0  ;;  %v7140_v3 = vsub.f32 %v7043_v9, %v3286_v7 }
 0x936   : > { %v5733_v55 = vpop.eup %5732  ;;  %v3329_v38 = vadd.f32 1e-05, %v3321_v1  ;;  %v3302_v56 = vmul.f32 %v7140_v3, %v7140_v3 }
 0x937   : > { %v3337_v62 = vmul.f32 %v5733_v55, %v3328_v15  ;;  %vm3343_vm2 = vweird.f32 %v5733_v55 }
 0x938   : > { %5734 = vrsqrt.f32 %v3329_v38  ;;  %3316 = vadd.xlane.f32.xlu2 %v3302_v56  ;;  %vm3344_vm3 = vmor %vm3342_vm1, %vm3343_vm2  ;;  %vm3352_vm5 = vweird.f32 %v3329_v38 }
 0x939   : > { %v3338_v37 = vmul.f32 %v5733_v55, %v3337_v62  ;;  %v3279_v48 = vpop.xlane.xlu0 %3278 }
 0x93a   : > { %v3287_v40 = vmul.f32 %v3279_v48, %v6723_v0 }
 0x93b   : > { %v3339_v28 = vmul.f32 0.5, %v3338_v37 }
 0x93c   : > { %v7146_v59 = vsub.f32 %v7049_v29, %v3287_v40  ;;  %v7155_v29 = vld [vmem:[%s7568_s15] ss:$0 sm:$0xff] }
 0x93d   : > { %v3340_v4 = vsub.f32 1.5, %v3339_v28 }
 0x93e   : > { %v5735_v9 = vpop.eup %5734  ;;  %v3303_v21 = vmul.f32 %v7146_v59, %v7146_v59 }
 0x93f   : > { %v3341_v12 = vmul.f32 %v5733_v55, %v3340_v4  ;;  %v3347_v49 = vmul.f32 %v5735_v9, %v3329_v38  ;;  %vm3353_vm4 = vweird.f32 %v5735_v9 }
 0x940   : > { %3318 = vadd.xlane.f32.xlu0 %v3303_v21  ;;  %vm3354_vm6 = vmor %vm3352_vm5, %vm3353_vm4 }
 0x941   : > { %v3348_v50 = vmul.f32 %v5735_v9, %v3347_v49  ;;  %v3345_v53 = vsel %vm3344_vm3, %v5733_v55, %v3341_v12 }
 0x942   : > { %v3416_v41 = vmul.f32 %v3345_v53, %v7035_v33 }
 0x943   : > { %v3349_v45 = vmul.f32 0.5, %v3348_v50 }
 0x944   : > { %v3428_v5 = vmul.f32 %v7155_v29, %v3416_v41 }
 0x945   : > { %v3350_v52 = vsub.f32 1.5, %v3349_v45 }
 0x946   : > { %v7170_v31 = vadd.f32 %v7164_v60, %v3428_v5  ;;  %v5495_v5 = vld [vmem:[%s6468_s27 + $0x38] sm:$0xff] }
 0x947   : > { %v3309_v35 = vpop.xlane.xlu1 %3308  ;;  %v3351_v57 = vmul.f32 %v5735_v9, %v3350_v52  ;;  %4078 = vmatpush.bf16.msra.mxu2 %v5495_v5 }
 0x948   : > { %v3322_v58 = vmul.f32 %v3309_v35, %v6723_v0 }
 0x949   : > { %v3355_v43 = vsel %vm3354_vm6, %v5735_v9, %v3351_v57 }
 0x94a   : > { %v3330_v14 = vadd.f32 1e-05, %v3322_v58  ;;  %v3417_v2 = vmul.f32 %v3355_v43, %v7040_v22 }
 0x94c   : > { %5736 = vrsqrt.f32 %v3330_v14  ;;  %v3429_v33 = vmul.f32 %v7155_v29, %v3417_v2  ;;  %vm3362_vm8 = vweird.f32 %v3330_v14  ;;  %v5503_v2 = vld [vmem:[%s6468_s27 + $0x78] sm:$0xff] }
 0x94d   : > { %4107 = vmatpush.bf16.msrb.mxu3 %v5503_v2 }
 0x94e   : > { %v7173_v36 = vadd.f32 %v7164_v60, %v3429_v33  ;;  %v5510_v33 = vld [vmem:[%s6468_s27 + $0xb0] sm:$0xff] }
 0x94f   : > { %v3311_v13 = vpop.xlane.xlu2 %3310 }
 0x950   : > { %v3323_v8 = vmul.f32 %v3311_v13, %v6723_v0  ;;  %v3448_v6 = vpack.c.bf16 %v7173_v36, %v7170_v31  ;;  %v5518_v13 = vld [vmem:[%s6468_s27 + $0xf0] sm:$0xff] }
 0x952   : > { %v5737_v44 = vpop.eup %5736  ;;  %v3331_v10 = vadd.f32 1e-05, %v3323_v8  ;;  %3662 = vmatmul.bf16.vlgmr.msrb.gmra.mxu2 %v3448_v6  ;;  %3691 = vmatmul.bf16.vlgmr.msra.gmra.mxu3 %v3448_v6  ;;  %v5494_v8 = vld [vmem:[%s6468_s27 + $0x30] sm:$0xff] }
 0x953   : > { %v3357_v61 = vmul.f32 %v5737_v44, %v3330_v14  ;;  %3720 = vmatmul.bf16.vlgmr.msrb.gmra.mxu0 %v3448_v6  ;;  %3749 = vmatmul.bf16.vlgmr.msrb.gmra.mxu1 %v3448_v6  ;;  %vm3363_vm7 = vweird.f32 %v5737_v44  ;;  %v5519_v14 = vld [vmem:[%s6468_s27 + $0xf8] sm:$0xff]  ;;  %v5502_v6 = vld [vmem:[%s6468_s27 + $0x70] sm:$0xff] }
 0x954   : > { %5738 = vrsqrt.f32 %v3331_v10  ;;  %vm3364_vm9 = vmor %vm3362_vm8, %vm3363_vm7  ;;  %vm3372_vm11 = vweird.f32 %v3331_v10  ;;  %4165 = vmatpush.bf16.msra.mxu1 %v5519_v14  ;;  %4079 = vmatpush.bf16.msra.mxu2 %v5494_v8 }
 0x955   : > { %v3358_v22 = vmul.f32 %v5737_v44, %v3357_v61  ;;  %4108 = vmatpush.bf16.msrb.mxu3 %v5502_v6  ;;  %v5493_v61 = vld [vmem:[%s6468_s27 + $0x28] sm:$0xff]  ;;  %v3484_v6 = vld [vmem:[%s6462_s30] sm:$0xf] }
 0x957   : > { %v3359_v11 = vmul.f32 0.5, %v3358_v22  ;;  %v3313_v63 = vpop.xlane.xlu0 %3312 }
 0x958   : > { %v3324_v51 = vmul.f32 %v3313_v63, %v6723_v0  ;;  %4166 = vmatpush.bf16.msra.mxu1 %v5518_v13  ;;  %4080 = vmatpush.bf16.msra.mxu2 %v5493_v61  ;;  %v7255_v61 = vperm.slane %v3484_v6, 0 }
 0x959   : > { %v3360_v15 = vsub.f32 1.5, %v3359_v11  ;;  %v5501_v11 = vld [vmem:[%s6468_s27 + $0x68] sm:$0xff] }
 0x95a   : > { %v5739_v26 = vpop.eup %5738  ;;  %v3332_v16 = vadd.f32 1e-05, %v3324_v51  ;;  %4109 = vmatpush.bf16.msrb.mxu3 %v5501_v11 }
 0x95b   : > { %v3361_v47 = vmul.f32 %v5737_v44, %v3360_v15  ;;  %v3367_v18 = vmul.f32 %v5739_v26, %v3331_v10  ;;  %vm3373_vm10 = vweird.f32 %v5739_v26  ;;  %v5517_v10 = vld [vmem:[%s6468_s27 + $0xe8] sm:$0xff]  ;;  %v5508_v15 = vld [vmem:[%s6468_s27 + $0xa0] sm:$0xff] }
 0x95c   : > { %5740 = vrsqrt.f32 %v3332_v16  ;;  %vm3374_vm12 = vmor %vm3372_vm11, %vm3373_vm10  ;;  %vm3382_vm14 = vweird.f32 %v3332_v16  ;;  %4167 = vmatpush.bf16.msra.mxu1 %v5517_v10  ;;  %v7251_v10 = vperm.slane %v3484_v6, 2 }
 0x95d   : > { %v3368_v42 = vmul.f32 %v5739_v26, %v3367_v18  ;;  %v3365_v19 = vsel %vm3364_vm9, %v5737_v44, %v3361_v47  ;;  %v5509_v44 = vld [vmem:[%s6468_s27 + $0xa8] sm:$0xff]  ;;  %v5500_v47 = vld [vmem:[%s6468_s27 + $0x60] sm:$0xff]  ;;  %v5507_v18 = vld [vmem:[%s6468_s27 + $0x98] sm:$0xff] }
 0x95e   : > { %v3418_v30 = vmul.f32 %v3365_v19, %v7053_v34  ;;  %4110 = vmatpush.bf16.msrb.mxu3 %v5500_v47 }
 0x95f   : > { %v3369_v20 = vmul.f32 0.5, %v3368_v42  ;;  %v3315_v23 = vpop.xlane.xlu1 %3314  ;;  %v5515_v42 = vld [vmem:[%s6468_s27 + $0xd8] sm:$0xff] }
 0x960   : > { %v3325_v17 = vmul.f32 %v3315_v23, %v6723_v0  ;;  %v3430_v62 = vmul.f32 %v7155_v29, %v3418_v30  ;;  %v5491_v23 = vld [vmem:[%s6468_s27 + $0x18] sm:$0xff]  ;;  %v5506_v30 = vld [vmem:[%s6468_s27 + $0x90] sm:$0xff] }
 0x961   : > { %v3370_v54 = vsub.f32 1.5, %v3369_v20 }
 0x962   : > { %v5741_v25 = vpop.eup %5740  ;;  %v3333_v32 = vadd.f32 1e-05, %v3325_v17  ;;  %v7185_v40 = vadd.f32 %v7164_v60, %v3430_v62  ;;  %v5499_v17 = vld [vmem:[%s6468_s27 + $0x58] sm:$0xff]  ;;  %v5513_v62 = vld [vmem:[%s6468_s27 + $0xc8] sm:$0xff] }
 0x963   : > { %v3371_v7 = vmul.f32 %v5739_v26, %v3370_v54  ;;  %v3377_v24 = vmul.f32 %v5741_v25, %v3332_v16  ;;  %vm3383_vm13 = vweird.f32 %v5741_v25  ;;  %v5492_v16 = vld [vmem:[%s6468_s27 + $0x20] sm:$0xff]  ;;  %4111 = vmatpush.bf16.msrb.mxu3 %v5499_v17 }
 0x964   : > { %5742 = vrsqrt.f32 %v3333_v32  ;;  %vm3384_vm15 = vmor %vm3382_vm14, %vm3383_vm13  ;;  %vm3392_vm2 = vweird.f32 %v3333_v32  ;;  %4081 = vmatpush.bf16.msra.mxu2 %v5492_v16 }
 0x965   : > { %v3375_v1 = vsel %vm3374_vm12, %v5739_v26, %v3371_v7  ;;  %v3378_v55 = vmul.f32 %v5741_v25, %v3377_v24  ;;  %v5516_v26 = vld [vmem:[%s6468_s27 + $0xe0] sm:$0xff]  ;;  %v5490_v24 = vld [vmem:[%s6468_s27 + $0x10] sm:$0xff] }
 0x966   : > { %v3419_v38 = vmul.f32 %v3375_v1, %v7058_v27  ;;  %4168 = vmatpush.bf16.msra.mxu1 %v5516_v26  ;;  %v5498_v1 = vld [vmem:[%s6468_s27 + $0x50] sm:$0xff] }
 0x967   : > { %v3379_v56 = vmul.f32 0.5, %v3378_v55  ;;  %4112 = vmatpush.bf16.msrb.mxu3 %v5498_v1 }
 0x968   : > { %v3431_v37 = vmul.f32 %v7155_v29, %v3419_v38  ;;  %4082 = vmatpush.bf16.msra.mxu2 %v5491_v23  ;;  %v5505_v38 = vld [vmem:[%s6468_s27 + $0x88] sm:$0xff] }
 0x969   : > { %v3380_v48 = vsub.f32 1.5, %v3379_v56 }
 0x96a   : > { %v5743_v28 = vpop.eup %5742  ;;  %v7188_v34 = vadd.f32 %v7164_v60, %v3431_v37  ;;  %4169 = vmatpush.bf16.msra.mxu1 %v5515_v42  ;;  %v5489_v37 = vld [vmem:[%s6468_s27 + $0x8] sm:$0xff] }
 0x96b   : > { %v3381_v4 = vmul.f32 %v5741_v25, %v3380_v48  ;;  %v3387_v9 = vmul.f32 %v5743_v28, %v3333_v32  ;;  %vm3393_vm0 = vweird.f32 %v5743_v28  ;;  %v5514_v32 = vld [vmem:[%s6468_s27 + $0xd0] sm:$0xff]  ;;  %v5497_v48 = vld [vmem:[%s6468_s27 + $0x48] sm:$0xff] }
 0x96c   : > { %v3449_v12 = vpack.c.bf16 %v7188_v34, %v7185_v40  ;;  %vm3394_vm1 = vmor %vm3392_vm2, %vm3393_vm0  ;;  %4083 = vmatpush.bf16.msra.mxu2 %v5490_v24  ;;  %4113 = vmatpush.bf16.msrb.mxu3 %v5497_v48 }
 0x96d   : > { %v3388_v27 = vmul.f32 %v5743_v28, %v3387_v9  ;;  %v3385_v49 = vsel %vm3384_vm15, %v5741_v25, %v3381_v4  ;;  %v5504_v9 = vld [vmem:[%s6468_s27 + $0x80] sm:$0xff] }
 0x96e   : > { %3667 = vmatmul.bf16.gmra.mxu2 %v3449_v12  ;;  %3696 = vmatmul.bf16.gmra.mxu3 %v3449_v12  ;;  %v3420_v53 = vmul.f32 %v3385_v49, %v7063_v39 }
 0x96f   : > { %v3389_v21 = vmul.f32 0.5, %v3388_v27  ;;  %3725 = vmatmul.bf16.gmra.mxu0 %v3449_v12  ;;  %3754 = vmatmul.bf16.gmra.mxu1 %v3449_v12  ;;  %v5512_v12 = vld [vmem:[%s6468_s27 + $0xc0] sm:$0xff] }
 0x970   : > { %v3432_v35 = vmul.f32 %v7155_v29, %v3420_v53  ;;  %4170 = vmatpush.bf16.msra.mxu1 %v5514_v32  ;;  %4084 = vmatpush.bf16.msra.mxu2 %v5489_v37 }
 0x971   : > { %v3390_v50 = vsub.f32 1.5, %v3389_v21  ;;  %v5488_v21 = vld [vmem:[%s6468_s27] sm:$0xff] }
 0x972   : > { %v7197_v58 = vadd.f32 %v7164_v60, %v3432_v35 }
 0x973   : > { %v3391_v45 = vmul.f32 %v5743_v28, %v3390_v50  ;;  %v5496_v50 = vld [vmem:[%s6468_s27 + $0x40] sm:$0xff] }
 0x974   : > { %4171 = vmatpush.bf16.msra.mxu1 %v5513_v62  ;;  %4085 = vmatpush.bf16.msra.mxu2 %v5488_v21 }
 0x975   : > { %v3395_v52 = vsel %vm3394_vm1, %v5743_v28, %v3391_v45  ;;  %4114 = vmatpush.bf16.msrb.mxu3 %v5496_v50 }
 0x976   : > { %v3421_v41 = vmul.f32 %v3395_v52, %v7068_v46  ;;  %v5511_v46 = vld [vmem:[%s6468_s27 + $0xb8] sm:$0xff] }
 0x977   : > { %4136 = vmatpush.bf16.msra.mxu0 %v5511_v46 }
 0x978   : > { %v3433_v57 = vmul.f32 %v7155_v29, %v3421_v41  ;;  %4172 = vmatpush.bf16.msra.mxu1 %v5512_v12 }
 0x97a   : > { %v7200_v39 = vadd.f32 %v7164_v60, %v3433_v57 }
 0x97b   : > { %4137 = vmatpush.bf16.msra.mxu0 %v5510_v33 }
 0x97c   : > { %v3450_v43 = vpack.c.bf16 %v7200_v39, %v7197_v58 }
 0x97e   : > { %3672 = vmatmul.bf16.gmra.mxu2 %v3450_v43  ;;  %3701 = vmatmul.bf16.gmra.mxu3 %v3450_v43 }
 0x97f   : > { %3730 = vmatmul.bf16.gmra.mxu0 %v3450_v43  ;;  %3759 = vmatmul.bf16.gmra.mxu1 %v3450_v43 }
 0x980   : > { %4138 = vmatpush.bf16.msra.mxu0 %v5509_v44 }
 0x984   : > { %4139 = vmatpush.bf16.msra.mxu0 %v5508_v15 }
 0x988   : > { %4140 = vmatpush.bf16.msra.mxu0 %v5507_v18 }
 0x98c   : > { %4141 = vmatpush.bf16.msra.mxu0 %v5506_v30 }
 0x990   : > { %4142 = vmatpush.bf16.msra.mxu0 %v5505_v38 }
 0x994   : > { %4143 = vmatpush.bf16.msra.mxu0 %v5504_v9 }
 0x9ab   : > { %v3317_v22 = vpop.xlane.xlu2 %3316 }
 0x9ac   : > { %v3326_v63 = vmul.f32 %v3317_v22, %v6723_v0 }
 0x9ae   : > { %v3334_v51 = vadd.f32 1e-05, %v3326_v63 }
 0x9b0   : > { %5744 = vrsqrt.f32 %v3334_v51  ;;  %vm3402_vm4 = vweird.f32 %v3334_v51 }
 0x9b3   : > { %v3319_v19 = vpop.xlane.xlu0 %3318 }
 0x9b4   : > { %v3327_v20 = vmul.f32 %v3319_v19, %v6723_v0 }
 0x9b6   : > { %v5745_v54 = vpop.eup %5744  ;;  %v3335_v25 = vadd.f32 1e-05, %v3327_v20 }
 0x9b7   : > { %v3397_v7 = vmul.f32 %v5745_v54, %v3334_v51  ;;  %vm3403_vm3 = vweird.f32 %v5745_v54 }
 0x9b8   : > { %5746 = vrsqrt.f32 %v3335_v25  ;;  %vm3404_vm5 = vmor %vm3402_vm4, %vm3403_vm3  ;;  %vm3412_vm7 = vweird.f32 %v3335_v25 }
 0x9b9   : > { %v3398_v55 = vmul.f32 %v5745_v54, %v3397_v7 }
 0x9bb   : > { %v3399_v56 = vmul.f32 0.5, %v3398_v55 }
 0x9bd   : > { %v3400_v28 = vsub.f32 1.5, %v3399_v56 }
 0x9be   : > { %v5747_v4 = vpop.eup %5746 }
 0x9bf   : > { %v3401_v27 = vmul.f32 %v5745_v54, %v3400_v28  ;;  %v3407_v49 = vmul.f32 %v5747_v4, %v3335_v25  ;;  %vm3413_vm6 = vweird.f32 %v5747_v4 }
 0x9c0   : > { %vm3414_vm8 = vmor %vm3412_vm7, %vm3413_vm6 }
 0x9c1   : > { %v3408_v53 = vmul.f32 %v5747_v4, %v3407_v49  ;;  %v3405_v45 = vsel %vm3404_vm5, %v5745_v54, %v3401_v27 }
 0x9c2   : > { %v3422_v35 = vmul.f32 %v3405_v45, %v7140_v3 }
 0x9c3   : > { %v3409_v52 = vmul.f32 0.5, %v3408_v53 }
 0x9c4   : > { %v3434_v14 = vmul.f32 %v7155_v29, %v3422_v35 }
 0x9c5   : > { %v3410_v41 = vsub.f32 1.5, %v3409_v52 }
 0x9c6   : > { %v7243_v2 = vadd.f32 %v7164_v60, %v3434_v14 }
 0x9c7   : > { %v3411_v57 = vmul.f32 %v5747_v4, %v3410_v41 }
 0x9c9   : > { %v3415_v43 = vsel %vm3414_vm8, %v5747_v4, %v3411_v57 }
 0x9ca   : > { %v3423_v46 = vmul.f32 %v3415_v43, %v7146_v59 }
 0x9cc   : > { %v3435_v5 = vmul.f32 %v7155_v29, %v3423_v46  ;;  %v7253_v29 = vperm.slane %v3484_v6, 3 }
 0x9ce   : > { %v7246_v33 = vadd.f32 %v7164_v60, %v3435_v5  ;;  %v7257_v60 = vperm.slane %v3484_v6, 1 }
 0x9d0   : > { %v3721_v13 = vpop.f32.mrf.mxu0  ;;  %v3750_v8 = vpop.f32.mrf.mxu1  ;;  %v3451_v3 = vpack.c.bf16 %v7246_v33, %v7243_v2 }
 0x9d1   : > { %v3722_v15 = vadd.f32 %v3721_v13, %v7251_v10  ;;  %v3751_v26 = vadd.f32 %v3750_v8, %v7253_v29 }
 0x9d2   : > { %3677 = vmatmul.bf16.gmra.mxu2 %v3451_v3  ;;  %3706 = vmatmul.bf16.gmra.mxu3 %v3451_v3 }
 0x9d3   : > { %3735 = vmatmul.bf16.gmra.mxu0 %v3451_v3  ;;  %3764 = vmatmul.bf16.gmra.mxu1 %v3451_v3  ;;  %v3772_v54 = vmax.f32 %v3722_v15, 0.0  ;;  %v3773_v25 = vmax.f32 %v3751_v26, 0.0 }
 0x9d5   : > { %v3663_v59 = vpop.f32.mrf.mxu2  ;;  %v3692_v44 = vpop.f32.mrf.mxu3 }
 0x9d6   : > { %v3664_v16 = vadd.f32 %v3663_v59, %v7255_v61  ;;  %v3693_v47 = vadd.f32 %v3692_v44, %v7257_v60 }
 0x9d8   : > { %v3723_v22 = vpop.f32.mrf.mxu0  ;;  %v3752_v11 = vpop.f32.mrf.mxu1  ;;  %v3770_v30 = vmax.f32 %v3664_v16, 0.0  ;;  %v3771_v32 = vmax.f32 %v3693_v47, 0.0 }
 0x9d9   : > { %v3724_v63 = vadd.f32 %v3723_v22, %v7251_v10  ;;  %v3753_v51 = vadd.f32 %v3752_v11, %v7253_v29 }
 0x9db   : > { %v3776_v19 = vmax.f32 %v3724_v63, 0.0  ;;  %v3777_v20 = vmax.f32 %v3753_v51, 0.0 }
 0x9dd   : > { %v3665_v18 = vpop.f32.mrf.mxu2  ;;  %v3694_v42 = vpop.f32.mrf.mxu3  ;;  %v3804_v1 = vpack.c.bf16 %v3776_v19, %v3772_v54  ;;  %v3805_v55 = vpack.c.bf16 %v3777_v20, %v3773_v25 }
 0x9de   : > { %v3666_v23 = vadd.f32 %v3665_v18, %v7255_v61  ;;  %v3695_v17 = vadd.f32 %v3694_v42, %v7257_v60 }
 0x9e0   : > { %v3774_v7 = vmax.f32 %v3666_v23, 0.0  ;;  %v3775_v24 = vmax.f32 %v3695_v17, 0.0 }
 0x9e2   : > { %v3802_v38 = vpack.c.bf16 %v3774_v7, %v3770_v30  ;;  %v3803_v62 = vpack.c.bf16 %v3775_v24, %v3771_v32 }
 0x9e3   : > { %4144 = vmatmul.bf16.vlgmr.msra.gmra.mxu0 %v3804_v1  ;;  %4173 = vmatmul.bf16.vlgmr.msra.gmra.mxu1 %v3805_v55 }
 0x9e4   : > { %4086 = vmatmul.bf16.vlgmr.msra.gmra.mxu2 %v3802_v38  ;;  %4115 = vmatmul.bf16.vlgmr.msrb.gmra.mxu3 %v3803_v62 }
 0x9ec   : > { %v3726_v56 = vpop.f32.mrf.mxu0  ;;  %v3755_v37 = vpop.f32.mrf.mxu1 }
 0x9ed   : > { %v3727_v4 = vadd.f32 %v3726_v56, %v7251_v10  ;;  %v3756_v9 = vadd.f32 %v3755_v37, %v7253_v29 }
 0x9ef   : > { %v3780_v50 = vmax.f32 %v3727_v4, 0.0  ;;  %v3781_v53 = vmax.f32 %v3756_v9, 0.0 }
 0x9f1   : > { %v3668_v48 = vpop.f32.mrf.mxu2  ;;  %v3697_v28 = vpop.f32.mrf.mxu3 }
 0x9f2   : > { %v3669_v41 = vadd.f32 %v3668_v48, %v7255_v61  ;;  %v3698_v35 = vadd.f32 %v3697_v28, %v7257_v60 }
 0x9f4   : > { %v3728_v12 = vpop.f32.mrf.mxu0  ;;  %v3757_v27 = vpop.f32.mrf.mxu1  ;;  %v3778_v8 = vmax.f32 %v3669_v41, 0.0  ;;  %v3779_v3 = vmax.f32 %v3698_v35, 0.0 }
 0x9f5   : > { %v3729_v49 = vadd.f32 %v3728_v12, %v7251_v10  ;;  %v3758_v21 = vadd.f32 %v3757_v27, %v7253_v29 }
 0x9f7   : > { %v3784_v45 = vmax.f32 %v3729_v49, 0.0  ;;  %v3785_v52 = vmax.f32 %v3758_v21, 0.0 }
 0x9f9   : > { %v3808_v57 = vpack.c.bf16 %v3784_v45, %v3780_v50  ;;  %v3809_v43 = vpack.c.bf16 %v3785_v52, %v3781_v53  ;;  %v3670_v46 = vpop.f32.mrf.mxu2  ;;  %v3699_v14 = vpop.f32.mrf.mxu3 }
 0x9fa   : > { %v3671_v5 = vadd.f32 %v3670_v46, %v7255_v61  ;;  %v3700_v13 = vadd.f32 %v3699_v14, %v7257_v60 }
 0x9fb   : > { %4149 = vmatmul.bf16.gmra.mxu0 %v3808_v57  ;;  %4178 = vmatmul.bf16.gmra.mxu1 %v3809_v43 }
 0x9fc   : > { %v3782_v6 = vmax.f32 %v3671_v5, 0.0  ;;  %v3783_v59 = vmax.f32 %v3700_v13, 0.0  ;;  %v3731_v44 = vpop.f32.mrf.mxu0  ;;  %v3760_v22 = vpop.f32.mrf.mxu1 }
 0x9fd   : > { %v3732_v26 = vadd.f32 %v3731_v44, %v7251_v10  ;;  %v3761_v16 = vadd.f32 %v3760_v22, %v7253_v29 }
 0x9fe   : > { %v3806_v11 = vpack.c.bf16 %v3782_v6, %v3778_v8  ;;  %v3807_v63 = vpack.c.bf16 %v3783_v59, %v3779_v3 }
 0x9ff   : > { %v3788_v20 = vmax.f32 %v3732_v26, 0.0  ;;  %v3789_v23 = vmax.f32 %v3761_v16, 0.0 }
 0xa00   : > { %4091 = vmatmul.bf16.gmra.mxu2 %v3806_v11  ;;  %4120 = vmatmul.bf16.gmra.mxu3 %v3807_v63 }
 0xa01   : > { %v3673_v51 = vpop.f32.mrf.mxu2  ;;  %v3702_v15 = vpop.f32.mrf.mxu3 }
 0xa02   : > { %v3674_v25 = vadd.f32 %v3673_v51, %v7255_v61  ;;  %v3703_v30 = vadd.f32 %v3702_v15, %v7257_v60  ;;  %v7296_v15 = vld [vmem:[%s1284_s4] ss:$0 sm:$0xff] }
 0xa04   : > { %v3733_v47 = vpop.f32.mrf.mxu0  ;;  %v3762_v18 = vpop.f32.mrf.mxu1  ;;  %v3786_v62 = vmax.f32 %v3674_v25, 0.0  ;;  %v3787_v56 = vmax.f32 %v3703_v30, 0.0 }
 0xa05   : > { %v3734_v42 = vadd.f32 %v3733_v47, %v7251_v10  ;;  %v3763_v19 = vadd.f32 %v3762_v18, %v7253_v29 }
 0xa07   : > { %v3792_v17 = vmax.f32 %v3734_v42, 0.0  ;;  %v3793_v54 = vmax.f32 %v3763_v19, 0.0 }
 0xa09   : > { %v3812_v32 = vpack.c.bf16 %v3792_v17, %v3788_v20  ;;  %v3813_v7 = vpack.c.bf16 %v3793_v54, %v3789_v23  ;;  %v3675_v24 = vpop.f32.mrf.mxu2  ;;  %v3704_v1 = vpop.f32.mrf.mxu3 }
 0xa0a   : > { %v3676_v55 = vadd.f32 %v3675_v24, %v7255_v61  ;;  %v3705_v38 = vadd.f32 %v3704_v1, %v7257_v60 }
 0xa0b   : > { %4154 = vmatmul.bf16.gmra.mxu0 %v3812_v32  ;;  %4183 = vmatmul.bf16.gmra.mxu1 %v3813_v7 }
 0xa0c   : > { %v3790_v37 = vmax.f32 %v3676_v55, 0.0  ;;  %v3791_v48 = vmax.f32 %v3705_v38, 0.0 }
 0xa0e   : > { %v3810_v28 = vpack.c.bf16 %v3790_v37, %v3786_v62  ;;  %v3811_v4 = vpack.c.bf16 %v3791_v48, %v3787_v56 }
 0xa10   : > { %4096 = vmatmul.bf16.gmra.mxu2 %v3810_v28  ;;  %4125 = vmatmul.bf16.gmra.mxu3 %v3811_v4 }
 0xa50   : > { %v3736_v9 = vpop.f32.mrf.mxu0  ;;  %v3765_v12 = vpop.f32.mrf.mxu1 }
 0xa51   : > { %v3737_v21 = vadd.f32 %v3736_v9, %v7251_v10  ;;  %v3766_v50 = vadd.f32 %v3765_v12, %v7253_v29 }
 0xa53   : > { %v3796_v35 = vmax.f32 %v3737_v21, 0.0  ;;  %v3797_v57 = vmax.f32 %v3766_v50, 0.0 }
 0xa55   : > { %v3678_v27 = vpop.f32.mrf.mxu2  ;;  %v3707_v49 = vpop.f32.mrf.mxu3 }
 0xa56   : > { %v3679_v14 = vadd.f32 %v3678_v27, %v7255_v61  ;;  %v3708_v5 = vadd.f32 %v3707_v49, %v7257_v60 }
 0xa58   : > { %v3738_v53 = vpop.f32.mrf.mxu0  ;;  %v3767_v45 = vpop.f32.mrf.mxu1 }
 0xa59   : > { %v3739_v52 = vadd.f32 %v3738_v53, %v7251_v10  ;;  %v3768_v41 = vadd.f32 %v3767_v45, %v7253_v29  ;;  %v3794_v10 = vmax.f32 %v3679_v14, 0.0  ;;  %v3795_v29 = vmax.f32 %v3708_v5, 0.0 }
 0xa5b   : > { %v3800_v43 = vmax.f32 %v3739_v52, 0.0  ;;  %v3801_v46 = vmax.f32 %v3768_v41, 0.0 }
 0xa5d   : > { %v3816_v13 = vpack.c.bf16 %v3800_v43, %v3796_v35  ;;  %v3817_v8 = vpack.c.bf16 %v3801_v46, %v3797_v57  ;;  %v3680_v3 = vpop.f32.mrf.mxu2  ;;  %v3709_v6 = vpop.f32.mrf.mxu3 }
 0xa5e   : > { %v3681_v59 = vadd.f32 %v3680_v3, %v7255_v61  ;;  %v3710_v44 = vadd.f32 %v3709_v6, %v7257_v60 }
 0xa5f   : > { %4159 = vmatmul.bf16.gmra.mxu0 %v3816_v13  ;;  %4188 = vmatmul.bf16.gmra.mxu1 %v3817_v8 }
 0xa60   : > { %v3798_v22 = vmax.f32 %v3681_v59, 0.0  ;;  %v3799_v11 = vmax.f32 %v3710_v44, 0.0  ;;  %v4145_v16 = vpop.f32.mrf.mxu0  ;;  %v4174_v18 = vpop.f32.mrf.mxu1 }
 0xa62   : > { %v3814_v63 = vpack.c.bf16 %v3798_v22, %v3794_v10  ;;  %v3815_v51 = vpack.c.bf16 %v3799_v11, %v3795_v29 }
 0xa64   : > { %4101 = vmatmul.bf16.gmra.mxu2 %v3814_v63  ;;  %4130 = vmatmul.bf16.gmra.mxu3 %v3815_v51 }
 0xa67   : > { %v4087_v26 = vpop.f32.mrf.mxu2  ;;  %v4116_v61 = vpop.f32.mrf.mxu3 }
 0xa68   : > { %v4088_v60 = vadd.f32 %v7296_v15, %v4087_v26  ;;  %v4147_v30 = vpop.f32.mrf.mxu0  ;;  %v4176_v7 = vpop.f32.mrf.mxu1 }
 0xa6a   : > { %v4117_v47 = vadd.f32 %v4116_v61, %v4088_v60 }
 0xa6c   : > { %v4146_v42 = vadd.f32 %v4145_v16, %v4117_v47 }
 0xa6e   : > { %v4175_v19 = vadd.f32 %v4174_v18, %v4146_v42 }
 0xa6f   : > { %v4089_v20 = vpop.f32.mrf.mxu2  ;;  %v4118_v54 = vpop.f32.mrf.mxu3 }
 0xa70   : > { %v4090_v23 = vadd.f32 %v7296_v15, %v4089_v20  ;;  %v4194_v17 = vadd.f32 %v4175_v19, %v7170_v31 }
 0xa72   : > { %v4119_v25 = vadd.f32 %v4118_v54, %v4090_v23  ;;  %4202 = vadd.xlane.f32.xlu1 %v4194_v17 }
 0xa74   : > { %v4148_v32 = vadd.f32 %v4147_v30, %v4119_v25 }
 0xa76   : > { %v4177_v24 = vadd.f32 %v4176_v7, %v4148_v32 }
 0xa78   : > { %v7302_v1 = vadd.f32 %v4177_v24, %v7173_v36  ;;  %v4150_v55 = vpop.f32.mrf.mxu0  ;;  %v4179_v38 = vpop.f32.mrf.mxu1 }
 0xa7a   : > { %4204 = vadd.xlane.f32.xlu2 %v7302_v1 }
 0xa80   : > { %v4152_v28 = vpop.f32.mrf.mxu0  ;;  %v4181_v36 = vpop.f32.mrf.mxu1 }
 0xa83   : > { %v4092_v62 = vpop.f32.mrf.mxu2  ;;  %v4121_v56 = vpop.f32.mrf.mxu3 }
 0xa84   : > { %v4093_v37 = vadd.f32 %v7296_v15, %v4092_v62 }
 0xa86   : > { %v4122_v48 = vadd.f32 %v4121_v56, %v4093_v37 }
 0xa88   : > { %v4151_v31 = vadd.f32 %v4150_v55, %v4122_v48  ;;  %v4155_v57 = vpop.f32.mrf.mxu0  ;;  %v4184_v46 = vpop.f32.mrf.mxu1 }
 0xa8a   : > { %v4180_v4 = vadd.f32 %v4179_v38, %v4151_v31 }
 0xa8b   : > { %v4094_v9 = vpop.f32.mrf.mxu2  ;;  %v4123_v12 = vpop.f32.mrf.mxu3 }
 0xa8c   : > { %v4095_v27 = vadd.f32 %v7296_v15, %v4094_v9  ;;  %v4196_v49 = vadd.f32 %v4180_v4, %v7185_v40 }
 0xa8e   : > { %v4124_v21 = vadd.f32 %v4123_v12, %v4095_v27  ;;  %4206 = vadd.xlane.f32.xlu0 %v4196_v49 }
 0xa90   : > { %v4153_v50 = vadd.f32 %v4152_v28, %v4124_v21  ;;  %v4157_v59 = vpop.f32.mrf.mxu0  ;;  %v4186_v10 = vpop.f32.mrf.mxu1 }
 0xa92   : > { %v4182_v53 = vadd.f32 %v4181_v36, %v4153_v50 }
 0xa93   : > { %v4097_v45 = vpop.f32.mrf.mxu2  ;;  %v4126_v52 = vpop.f32.mrf.mxu3 }
 0xa94   : > { %v4098_v41 = vadd.f32 %v7296_v15, %v4097_v45  ;;  %v4197_v35 = vadd.f32 %v4182_v53, %v7188_v34 }
 0xa96   : > { %v4127_v43 = vadd.f32 %v4126_v52, %v4098_v41  ;;  %4208 = vadd.xlane.f32.xlu1 %v4197_v35 }
 0xa98   : > { %v4156_v14 = vadd.f32 %v4155_v57, %v4127_v43 }
 0xa9a   : > { %v4185_v5 = vadd.f32 %v4184_v46, %v4156_v14 }
 0xa9b   : > { %v4099_v13 = vpop.f32.mrf.mxu2  ;;  %v4128_v3 = vpop.f32.mrf.mxu3 }
 0xa9c   : > { %v4100_v40 = vadd.f32 %v7296_v15, %v4099_v13  ;;  %v4198_v8 = vadd.f32 %v4185_v5, %v7197_v58 }
 0xa9e   : > { %v4129_v6 = vadd.f32 %v4128_v3, %v4100_v40  ;;  %4210 = vadd.xlane.f32.xlu2 %v4198_v8 }
 0xaa0   : > { %v4158_v44 = vadd.f32 %v4157_v59, %v4129_v6 }
 0xaa2   : > { %v4187_v29 = vadd.f32 %v4186_v10, %v4158_v44 }
 0xaa4   : > { %v4199_v34 = vadd.f32 %v4187_v29, %v7200_v39 }
 0xaa6   : > { %4212 = vadd.xlane.f32.xlu0 %v4199_v34 }
 0xadc   : > { %v4160_v58 = vpop.f32.mrf.mxu0  ;;  %v4189_v47 = vpop.f32.mrf.mxu1 }
 0xae4   : > { %v4162_v30 = vpop.f32.mrf.mxu0  ;;  %v4191_v24 = vpop.f32.mrf.mxu1 }
 0xae5   : > { %v4203_v22 = vpop.xlane.xlu1 %4202 }
 0xae6   : > { %v4218_v11 = vmul.f32 %v4203_v22, %v6723_v0 }
 0xae7   : > { %v4102_v63 = vpop.f32.mrf.mxu2  ;;  %v4131_v51 = vpop.f32.mrf.mxu3 }
 0xae8   : > { %v7314_v26 = vsub.f32 %v4194_v17, %v4218_v11  ;;  %v4103_v61 = vadd.f32 %v7296_v15, %v4102_v63  ;;  %v7372_v11 = vld [vmem:[%s1277_s17] ss:$0 sm:$0xff] }
 0xaea   : > { %v4132_v60 = vadd.f32 %v4131_v51, %v4103_v61  ;;  %v4234_v16 = vmul.f32 %v7314_v26, %v7314_v26 }
 0xaec   : > { %v4161_v18 = vadd.f32 %v4160_v58, %v4132_v60  ;;  %4242 = vadd.xlane.f32.xlu0 %v4234_v16 }
 0xaed   : > { %v4205_v42 = vpop.xlane.xlu2 %4204 }
 0xaee   : > { %v4190_v39 = vadd.f32 %v4189_v47, %v4161_v18  ;;  %v4219_v20 = vmul.f32 %v4205_v42, %v6723_v0 }
 0xaef   : > { %v4104_v19 = vpop.f32.mrf.mxu2  ;;  %v4133_v54 = vpop.f32.mrf.mxu3 }
 0xaf0   : > { %v4105_v23 = vadd.f32 %v7296_v15, %v4104_v19  ;;  %v4200_v17 = vadd.f32 %v4190_v39, %v7243_v2  ;;  %v7323_v32 = vsub.f32 %v7302_v1, %v4219_v20 }
 0xaf2   : > { %v4134_v25 = vadd.f32 %v4133_v54, %v4105_v23  ;;  %4214 = vadd.xlane.f32.xlu1 %v4200_v17  ;;  %v4235_v62 = vmul.f32 %v7323_v32, %v7323_v32 }
 0xaf4   : > { %v4163_v7 = vadd.f32 %v4162_v30, %v4134_v25 }
 0xaf6   : > { %v4192_v55 = vadd.f32 %v4191_v24, %v4163_v7 }
 0xaf8   : > { %v4201_v38 = vadd.f32 %v4192_v55, %v7246_v33 }
 0xafa   : > { %4216 = vadd.xlane.f32.xlu2 %v4201_v38  ;;  %4244 = vadd.xlane.f32.xlu1 %v4235_v62 }
 0xb01   : > { %v4207_v15 = vpop.xlane.xlu0 %4206 }
 0xb02   : > { %v4220_v2 = vmul.f32 %v4207_v15, %v6723_v0 }
 0xb04   : > { %v7329_v56 = vsub.f32 %v4196_v49, %v4220_v2 }
 0xb06   : > { %v4236_v37 = vmul.f32 %v7329_v56, %v7329_v56 }
 0xb08   : > { %4246 = vadd.xlane.f32.xlu2 %v4236_v37 }
 0xb09   : > { %v4209_v1 = vpop.xlane.xlu1 %4208 }
 0xb0a   : > { %v4221_v48 = vmul.f32 %v4209_v1, %v6723_v0 }
 0xb0c   : > { %v7334_v31 = vsub.f32 %v4197_v35, %v4221_v48 }
 0xb0e   : > { %v4237_v33 = vmul.f32 %v7334_v31, %v7334_v31 }
 0xb10   : > { %4248 = vadd.xlane.f32.xlu0 %v4237_v33 }
 0xb11   : > { %v4211_v28 = vpop.xlane.xlu2 %4210 }
 0xb12   : > { %v4222_v4 = vmul.f32 %v4211_v28, %v6723_v0 }
 0xb14   : > { %v7339_v9 = vsub.f32 %v4198_v8, %v4222_v4 }
 0xb16   : > { %v4238_v12 = vmul.f32 %v7339_v9, %v7339_v9 }
 0xb18   : > { %4250 = vadd.xlane.f32.xlu1 %v4238_v12 }
 0xb19   : > { %v4213_v27 = vpop.xlane.xlu0 %4212 }
 0xb1a   : > { %v4223_v49 = vmul.f32 %v4213_v27, %v6723_v0 }
 0xb1c   : > { %v7344_v36 = vsub.f32 %v4199_v34, %v4223_v49  ;;  %v7365_v34 = vld [vmem:[%s1274_s26] ss:$0 sm:$0xff] }
 0xb1e   : > { %v4239_v21 = vmul.f32 %v7344_v36, %v7344_v36 }
 0xb20   : > { %4252 = vadd.xlane.f32.xlu2 %v4239_v21 }
 0xb5f   : > { %v4243_v50 = vpop.xlane.xlu0 %4242 }
 0xb60   : > { %v4258_v53 = vmul.f32 %v4243_v50, %v6723_v0 }
 0xb62   : > { %v4266_v45 = vadd.f32 1e-05, %v4258_v53 }
 0xb64   : > { %5748 = vrsqrt.f32 %v4266_v45  ;;  %vm4280_vm10 = vweird.f32 %v4266_v45 }
 0xb65   : > { %v4215_v52 = vpop.xlane.xlu1 %4214 }
 0xb66   : > { %v4224_v41 = vmul.f32 %v4215_v52, %v6723_v0 }
 0xb68   : > { %v7350_v35 = vsub.f32 %v4200_v17, %v4224_v41 }
 0xb6a   : > { %v5749_v57 = vpop.eup %5748  ;;  %v4240_v43 = vmul.f32 %v7350_v35, %v7350_v35 }
 0xb6b   : > { %v4275_v46 = vmul.f32 %v5749_v57, %v4266_v45  ;;  %vm4281_vm9 = vweird.f32 %v5749_v57 }
 0xb6c   : > { %4254 = vadd.xlane.f32.xlu0 %v4240_v43  ;;  %vm4282_vm11 = vmor %vm4280_vm10, %vm4281_vm9 }
 0xb6d   : > { %v4276_v14 = vmul.f32 %v5749_v57, %v4275_v46  ;;  %v4217_v5 = vpop.xlane.xlu2 %4216  ;;  %v4245_v13 = vpop.xlane.xlu1 %4244 }
 0xb6e   : > { %v4225_v40 = vmul.f32 %v4217_v5, %v6723_v0  ;;  %v4259_v8 = vmul.f32 %v4245_v13, %v6723_v0 }
 0xb6f   : > { %v4277_v3 = vmul.f32 0.5, %v4276_v14 }
 0xb70   : > { %v7356_v6 = vsub.f32 %v4201_v38, %v4225_v40  ;;  %v4267_v59 = vadd.f32 1e-05, %v4259_v8 }
 0xb71   : > { %v4278_v44 = vsub.f32 1.5, %v4277_v3 }
 0xb72   : > { %5750 = vrsqrt.f32 %v4267_v59  ;;  %v4241_v10 = vmul.f32 %v7356_v6, %v7356_v6  ;;  %vm4290_vm13 = vweird.f32 %v4267_v59 }
 0xb73   : > { %v4279_v29 = vmul.f32 %v5749_v57, %v4278_v44 }
 0xb74   : > { %4256 = vadd.xlane.f32.xlu1 %v4241_v10 }
 0xb75   : > { %v4283_v22 = vsel %vm4282_vm11, %v5749_v57, %v4279_v29 }
 0xb76   : > { %v4354_v63 = vmul.f32 %v4283_v22, %v7314_v26 }
 0xb78   : > { %v5751_v51 = vpop.eup %5750  ;;  %v4366_v61 = vmul.f32 %v7365_v34, %v4354_v63 }
 0xb79   : > { %v4285_v58 = vmul.f32 %v5751_v51, %v4267_v59  ;;  %vm4291_vm12 = vweird.f32 %v5751_v51 }
 0xb7a   : > { %v7377_v16 = vadd.f32 %v7372_v11, %v4366_v61  ;;  %vm4292_vm14 = vmor %vm4290_vm13, %vm4291_vm12 }
 0xb7b   : > { %v4247_v60 = vpop.xlane.xlu2 %4246  ;;  %v4286_v18 = vmul.f32 %v5751_v51, %v4285_v58 }
 0xb7c   : > { %v4260_v47 = vmul.f32 %v4247_v60, %v6723_v0  ;;  %4386 = vst [vmem:[#allocation2 + $0x30] sm:$0xff] %v7377_v16 }
 0xb7d   : > { %v4287_v39 = vmul.f32 0.5, %v4286_v18 }
 0xb7e   : > { %v4268_v42 = vadd.f32 1e-05, %v4260_v47 }
 0xb7f   : > { %v4288_v19 = vsub.f32 1.5, %v4287_v39 }
 0xb80   : > { %5752 = vrsqrt.f32 %v4268_v42  ;;  %vm4300_vm0 = vweird.f32 %v4268_v42 }
 0xb81   : > { %v4289_v20 = vmul.f32 %v5751_v51, %v4288_v19 }
 0xb83   : > { %v4249_v26 = vpop.xlane.xlu0 %4248  ;;  %v4293_v17 = vsel %vm4292_vm14, %v5751_v51, %v4289_v20 }
 0xb84   : > { %v4261_v23 = vmul.f32 %v4249_v26, %v6723_v0  ;;  %v4355_v25 = vmul.f32 %v4293_v17, %v7323_v32 }
 0xb86   : > { %v5753_v54 = vpop.eup %5752  ;;  %v4269_v30 = vadd.f32 1e-05, %v4261_v23  ;;  %v4367_v24 = vmul.f32 %v7365_v34, %v4355_v25 }
 0xb87   : > { %v4295_v7 = vmul.f32 %v5753_v54, %v4268_v42  ;;  %vm4301_vm15 = vweird.f32 %v5753_v54 }
 0xb88   : > { %5754 = vrsqrt.f32 %v4269_v30  ;;  %v7385_v38 = vadd.f32 %v7372_v11, %v4367_v24  ;;  %vm4302_vm2 = vmor %vm4300_vm0, %vm4301_vm15  ;;  %vm4310_vm3 = vweird.f32 %v4269_v30 }
 0xb89   : > { %v4296_v55 = vmul.f32 %v5753_v54, %v4295_v7 }
 0xb8a   : > { %4387 = vst [vmem:[#allocation2] sm:$0xff] %v7385_v38 }
 0xb8b   : > { %v4297_v62 = vmul.f32 0.5, %v4296_v55  ;;  %v4251_v15 = vpop.xlane.xlu1 %4250 }
 0xb8c   : > { %v4262_v2 = vmul.f32 %v4251_v15, %v6723_v0 }
 0xb8d   : > { %v4298_v37 = vsub.f32 1.5, %v4297_v62 }
 0xb8e   : > { %v5755_v1 = vpop.eup %5754  ;;  %v4270_v48 = vadd.f32 1e-05, %v4262_v2 }
 0xb8f   : > { %v4299_v32 = vmul.f32 %v5753_v54, %v4298_v37  ;;  %v4305_v33 = vmul.f32 %v5755_v1, %v4269_v30  ;;  %vm4311_vm1 = vweird.f32 %v5755_v1 }
 0xb90   : > { %5756 = vrsqrt.f32 %v4270_v48  ;;  %vm4312_vm4 = vmor %vm4310_vm3, %vm4311_vm1  ;;  %vm4320_vm6 = vweird.f32 %v4270_v48 }
 0xb91   : > { %v4303_v28 = vsel %vm4302_vm2, %v5753_v54, %v4299_v32  ;;  %v4306_v4 = vmul.f32 %v5755_v1, %v4305_v33 }
 0xb92   : > { %v4356_v12 = vmul.f32 %v4303_v28, %v7329_v56 }
 0xb93   : > { %v4307_v27 = vmul.f32 0.5, %v4306_v4  ;;  %v4253_v49 = vpop.xlane.xlu2 %4252 }
 0xb94   : > { %v4368_v21 = vmul.f32 %v7365_v34, %v4356_v12  ;;  %v4263_v50 = vmul.f32 %v4253_v49, %v6723_v0 }
 0xb95   : > { %v4308_v53 = vsub.f32 1.5, %v4307_v27 }
 0xb96   : > { %v5757_v45 = vpop.eup %5756  ;;  %v7393_v52 = vadd.f32 %v7372_v11, %v4368_v21  ;;  %v4271_v41 = vadd.f32 1e-05, %v4263_v50 }
 0xb97   : > { %v4309_v57 = vmul.f32 %v5755_v1, %v4308_v53  ;;  %v4315_v43 = vmul.f32 %v5757_v45, %v4270_v48  ;;  %vm4321_vm5 = vweird.f32 %v5757_v45 }
 0xb98   : > { %4388 = vst [vmem:[#allocation2 + $0x18] sm:$0xff] %v7393_v52  ;;  %5758 = vrsqrt.f32 %v4271_v41  ;;  %vm4322_vm7 = vmor %vm4320_vm6, %vm4321_vm5  ;;  %vm4330_vm9 = vweird.f32 %v4271_v41 }
 0xb99   : > { %v4313_v56 = vsel %vm4312_vm4, %v5755_v1, %v4309_v57  ;;  %v4316_v46 = vmul.f32 %v5757_v45, %v4315_v43 }
 0xb9a   : > { %v4357_v14 = vmul.f32 %v4313_v56, %v7334_v31 }
 0xb9b   : > { %v4317_v5 = vmul.f32 0.5, %v4316_v46 }
 0xb9c   : > { %v4369_v13 = vmul.f32 %v7365_v34, %v4357_v14 }
 0xb9d   : > { %v4318_v40 = vsub.f32 1.5, %v4317_v5 }
 0xb9e   : > { %v5759_v8 = vpop.eup %5758  ;;  %v7399_v3 = vadd.f32 %v7372_v11, %v4369_v13 }
 0xb9f   : > { %v4319_v59 = vmul.f32 %v5757_v45, %v4318_v40  ;;  %v4325_v44 = vmul.f32 %v5759_v8, %v4271_v41  ;;  %vm4331_vm8 = vweird.f32 %v5759_v8 }
 0xba0   : > { %4389 = vst [vmem:[#allocation2 + $0x10] sm:$0xff] %v7399_v3  ;;  %vm4332_vm10 = vmor %vm4330_vm9, %vm4331_vm8 }
 0xba1   : > { %v4323_v10 = vsel %vm4322_vm7, %v5757_v45, %v4319_v59  ;;  %v4326_v29 = vmul.f32 %v5759_v8, %v4325_v44 }
 0xba2   : > { %v4358_v22 = vmul.f32 %v4323_v10, %v7339_v9 }
 0xba3   : > { %v4327_v31 = vmul.f32 0.5, %v4326_v29 }
 0xba4   : > { %v4370_v63 = vmul.f32 %v7365_v34, %v4358_v22 }
 0xba5   : > { %v4328_v51 = vsub.f32 1.5, %v4327_v31 }
 0xba6   : > { %v4382_v61 = vadd.f32 %v7372_v11, %v4370_v63 }
 0xba7   : > { %v4329_v58 = vmul.f32 %v5759_v8, %v4328_v51 }
 0xba8   : > { %4390 = vst [vmem:[#allocation2 + $0x8] sm:$0xff] %v4382_v61 }
 0xba9   : > { %v4333_v60 = vsel %vm4332_vm10, %v5759_v8, %v4329_v58 }
 0xbaa   : > { %v4359_v47 = vmul.f32 %v4333_v60, %v7344_v36 }
 0xbac   : > { %v4371_v18 = vmul.f32 %v7365_v34, %v4359_v47 }
 0xbae   : > { %v4383_v42 = vadd.f32 %v7372_v11, %v4371_v18 }
 0xbb0   : > { %4391 = vst [vmem:[#allocation2 + $0x20] sm:$0xff] %v4383_v42 }
 0xbdf   : > { %v4255_v9 = vpop.xlane.xlu0 %4254 }
 0xbe0   : > { %v4264_v39 = vmul.f32 %v4255_v9, %v6723_v0 }
 0xbe2   : > { %v4272_v19 = vadd.f32 1e-05, %v4264_v39 }
 0xbe4   : > { %5760 = vrsqrt.f32 %v4272_v19  ;;  %vm4340_vm12 = vweird.f32 %v4272_v19 }
 0xbe7   : > { %v4257_v20 = vpop.xlane.xlu1 %4256 }
 0xbe8   : > { %v4265_v26 = vmul.f32 %v4257_v20, %v6723_v0 }
 0xbea   : > { %v5761_v23 = vpop.eup %5760  ;;  %v4273_v17 = vadd.f32 1e-05, %v4265_v26 }
 0xbeb   : > { %v4335_v54 = vmul.f32 %v5761_v23, %v4272_v19  ;;  %vm4341_vm11 = vweird.f32 %v5761_v23 }
 0xbec   : > { %5762 = vrsqrt.f32 %v4273_v17  ;;  %vm4342_vm13 = vmor %vm4340_vm12, %vm4341_vm11  ;;  %vm4350_vm15 = vweird.f32 %v4273_v17 }
 0xbed   : > { %v4336_v25 = vmul.f32 %v5761_v23, %v4335_v54 }
 0xbef   : > { %v4337_v30 = vmul.f32 0.5, %v4336_v25 }
 0xbf1   : > { %v4338_v36 = vsub.f32 1.5, %v4337_v30 }
 0xbf2   : > { %v5763_v7 = vpop.eup %5762 }
 0xbf3   : > { %v4339_v24 = vmul.f32 %v5761_v23, %v4338_v36  ;;  %v4345_v55 = vmul.f32 %v5763_v7, %v4273_v17  ;;  %vm4351_vm14 = vweird.f32 %v5763_v7 }
 0xbf4   : > { %vm4352_vm0 = vmor %vm4350_vm15, %vm4351_vm14 }
 0xbf5   : > { %v4343_v62 = vsel %vm4342_vm13, %v5761_v23, %v4339_v24  ;;  %v4346_v15 = vmul.f32 %v5763_v7, %v4345_v55 }
 0xbf6   : > { %v4360_v2 = vmul.f32 %v4343_v62, %v7350_v35 }
 0xbf7   : > { %v4347_v37 = vmul.f32 0.5, %v4346_v15 }
 0xbf8   : > { %v4372_v0 = vmul.f32 %v7365_v34, %v4360_v2 }
 0xbf9   : > { %v4348_v1 = vsub.f32 1.5, %v4347_v37 }
 0xbfa   : > { %v4384_v48 = vadd.f32 %v7372_v11, %v4372_v0 }
 0xbfb   : > { %v4349_v32 = vmul.f32 %v5763_v7, %v4348_v1 }
 0xbfc   : > { %4392 = vst [vmem:[#allocation2 + $0x28] sm:$0xff] %v4384_v48 }
 0xbfd   : > { %v4353_v33 = vsel %vm4352_vm0, %v5763_v7, %v4349_v32 }
 0xbfe   : > { %v4361_v28 = vmul.f32 %v4353_v33, %v7356_v6 }
 0xc00   : > { %v4373_v4 = vmul.f32 %v7365_v34, %v4361_v28  ;;  %4397 = sbr.rel (%p5377_p1) target bundleno = 3085 (0xc0d), region = 152 }
 0xc02   : > { %v4385_v12 = vadd.f32 %v7372_v11, %v4373_v4 }
 0xc04   : > { %4393 = vst [vmem:[#allocation2 + $0x38] sm:$0xff] %v4385_v12 }
 0xc05   : > { %4398 = vst [vmem:[#allocation15] sm:$0xff] %v7377_v16 }
 0xc06   : > { %4399 = vst [vmem:[#allocation15 + $0x8] sm:$0xff] %v7385_v38 }
 0xc07   : > { %4400 = vst [vmem:[#allocation15 + $0x10] sm:$0xff] %v7393_v52 }
 0xc08   : > { %4401 = vst [vmem:[#allocation15 + $0x18] sm:$0xff] %v7399_v3 }
 0xc09   : > { %4402 = vst [vmem:[#allocation15 + $0x20] sm:$0xff] %v4382_v61 }
 0xc0a   : > { %4403 = vst [vmem:[#allocation15 + $0x28] sm:$0xff] %v4383_v42 }
 0xc0b   : > { %4404 = vst [vmem:[#allocation15 + $0x30] sm:$0xff] %v4384_v48 }
 0xc0c   : > { %4405 = vst [vmem:[#allocation15 + $0x38] sm:$0xff] %v4385_v12 }
 0xc0d PF: > { %s7573_s8 = sld [smem:[#allocation25_spill]]  ;;  %s6086_s12 = smov [#allocation15]  }
 0xc0e   : > { %s7574_s18 = sld [smem:[#allocation54_spill]]  ;;  %s4415_s6 = sshll.u32 %s6086_s12, 4  ;;  %s4416_s6 = int_to_ptr.vmem [resolvable:$true] %s4415_s6 }
 0xc0f   : > { %s6087_s29 = smov 128   ;;  %s6088_s10 = smov 8  }
 0xc13   : > { %p5573_p2 = scmp.eq.s32.totalorder %s7573_s8, 1 }
 0xc14   : > { %s4417_s28 = sshll.u32 %s7574_s18, 4  ;;  %s4418_s28 = int_to_ptr.hbm [resolvable:$true] %s4417_s28 }
 0xc15   : > { %5547 = dma.vmem_to_hbm [thread:$0]  (%p5573_p2), %s4416_s6, 1024, %s4418_s28, [#allocation5], %s6087_s29, %s6087_s29, %s6088_s10  }
 0xc16   : > { %6049 = dma.done.wait (%p5573_p2), [#allocation5], 1024  }
 0xc17   : > { %6051 = vsyncadd (%p5573_p2), [#allocation5], 4294966272 }
 0xc18 PF: > { %s7575_s14 = sld [smem:[#allocation24_spill]] }
 0xc19   : > { %s7576_s5 = sld [smem:[#allocation21_spill]] }
 0xc1a   : > { %s7577_s26 = sld [smem:[#allocation22_spill]] }
 0xc1b   : > { %s7578_s27 = sld [smem:[#allocation27_spill]] }
 0xc1c   : > { %s7579_s28 = sld [smem:[#allocation23_spill]] }
 0xc1d   : > { %s7580_s6 = sld [smem:[#allocation26_spill]] }
 0xc1e   : > { %s47_s2 = sadd.s32 1, %s7575_s14  }
 0xc1f   : > { %p44_p3 = scmp.ge.s32.totalorder %s47_s2, 4  }
 0xc21   :  { %46 = sbr.rel (!%p44_p3) target bundleno = 37 (0x25), region = 285 }
 0xc26   :  { %4434 = vsyncpa [#allocation4], 1 }
 0xc27   :  { %4436 = vsyncpa [#allocation4 + $0x1], 1 }
 0xc28   :  { %4437 = vsyncpa [#allocation7], 1 }
 0xc29   :  { %4439 = vsyncpa [#allocation7 + $0x1], 1 }
 0xc2a   :  { %4440 = vsyncpa [#allocation10], 1 }
 0xc2b   :  { %4442 = vsyncpa [#allocation10 + $0x1], 1 }
 0xc2c   :  { %4443 = vsyncpa [#allocation13], 1 }
 0xc2d   :  { %4445 = vsyncpa [#allocation13 + $0x1], 1 }
 0xc2e   :  { %4446 = vsyncpa [#allocation5], 1 }
 0xc2f   :  { %4448 = vsyncpa [#allocation5 + $0x1], 1 }

</bundles_post_ra>
